<compile_context>
chip_gen: v7x
topology: tpu7x:2x2x1
jax: 0.10.0
libtpu: 0.0.40
codegen_flags: <defaults>
</compile_context>

<pallas_src>
import functools

import jax
import jax.numpy as jnp
import numpy as np
from jax.experimental import pallas as pl
from jax.experimental.pallas import tpu as pltpu

# ----------------------------- model dims -----------------------------------
B = 2            # real batch
TS = 8           # source sequence length
TT = 8           # target sequence length
EMB = 128        # embedding_dim (scaled down from 256)
HID = 128        # hidden_dim    (scaled down from 512)
V_IN = 256       # input_vocab_size
V_TGT = 256      # target_vocab_size
BPAD = 8         # sublane-aligned batch inside the kernel


def seq2seq_kernel(gx_enc_ref, gx_dec_ref,
                   whh_e_ref, whh_d_ref,
                   wout_ref, bout_ref,
                   logits_ref,
                   hs_scr,
                   *, batch, ts, tt, hid):
    Bc = batch          # padded batch (8) -> every slice below is (8,128)-tile aligned
    H = hid

    def gates_to_state(gates, c):
        # gate columns pre-permuted to (i, f, o, g): one sigmoid + one tanh per step
        sig = jax.nn.sigmoid(gates[:, 0:3 * H])
        g = jnp.tanh(gates[:, 3 * H:4 * H])
        i = sig[:, 0:H]
        f = sig[:, H:2 * H]
        o = sig[:, 2 * H:3 * H]
        c_new = f * c + i * g
        h_new = o * jnp.tanh(c_new)
        return h_new, c_new

    # zero initial encoder state (nn.LSTM default)
    h = jnp.zeros((Bc, H), jnp.float32)
    c = jnp.zeros((Bc, H), jnp.float32)

    # ------------- encoder recurrence (fully unrolled, Ts = 8) --------------
    # gx slabs already hold x @ W_ih + b (precomputed offline via the vocab table),
    # so each step only does the unavoidable h @ W_hh on the serial chain.
    for t in range(ts):
        gates = gx_enc_ref[t * Bc:(t + 1) * Bc, :] + jnp.dot(
            h, whh_e_ref[...], preferred_element_type=jnp.float32)
        h, c = gates_to_state(gates, c)

    # ------------- decoder recurrence (fully unrolled, Tt = 8) --------------
    # decoder starts from the encoder's final (h, c)
    for t in range(tt):
        gates = gx_dec_ref[t * Bc:(t + 1) * Bc, :] + jnp.dot(
            h, whh_d_ref[...], preferred_element_type=jnp.float32)
        h, c = gates_to_state(gates, c)
        hs_scr[t * Bc:(t + 1) * Bc, :] = h          # full-tile (8,128) store

    # ------------- single output projection + dense (64, V) store -----------
    logits_ref[...] = (
        jnp.dot(hs_scr[...], wout_ref[...], preferred_element_type=jnp.float32)
        + bout_ref[...])


# ----------------------------- wrapper ---------------------------------------
def seq2seq_forward(src_tokens, tgt_tokens, kp):
    b, ts = src_tokens.shape
    tt = tgt_tokens.shape[1]
    H = kp['whh_enc_p'].shape[0]
    V = kp['wout_t'].shape[1]
    bp = BPAD

    # zero-pad batch to 8 sublanes (padded rows compute independent junk states)
    src_p = jnp.pad(src_tokens, ((0, bp - b), (0, 0)))       # (Bp, Ts)
    tgt_p = jnp.pad(tgt_tokens, ((0, bp - b), (0, 0)))       # (Bp, Tt)

    # time-major token ids (row index = t*Bp + batch), then one gather each from the
    # fused embedding+input-projection tables -> per-step gate slabs
    gx_enc = jnp.take(kp['gx_tab_enc'], src_p.T.reshape(-1), axis=0)   # (Ts*Bp, 4H)
    gx_dec = jnp.take(kp['gx_tab_dec'], tgt_p.T.reshape(-1), axis=0)   # (Tt*Bp, 4H)

    kernel = functools.partial(seq2seq_kernel, batch=bp, ts=ts, tt=tt, hid=H)

    logits_slab = pl.pallas_call(
        kernel,
        out_shape=jax.ShapeDtypeStruct((tt * bp, V), jnp.float32),
        scratch_shapes=[
            pltpu.VMEM((tt * bp, H), jnp.float32),    # decoder hidden states
        ],
    )(gx_enc, gx_dec,
      kp['whh_enc_p'], kp['whh_dec_p'],
      kp['wout_t'], kp['b_out'])

    logits = jnp.transpose(logits_slab.reshape(tt, bp, V), (1, 0, 2))  # (Bp, Tt, V)
    return logits[:b]                                                  # (B, Tt, V)


# ------------------- offline param fusion / permutation ----------------------
def _permute_gate_cols(w, H):
    # PyTorch gate order (i, f, g, o) -> kernel order (i, f, o, g)
    return jnp.concatenate(
        [w[..., 0:2 * H], w[..., 3 * H:4 * H], w[..., 2 * H:3 * H]], axis=-1)


def prepare_kernel_params(params):
    H = params['whh_enc_t'].shape[0]
    # fused embedding + input-projection tables: emb @ W_ih + (b_ih + b_hh)
    gx_tab_enc = jnp.dot(params['emb_in'], params['wih_enc_t']) + params['b_enc']
    gx_tab_dec = jnp.dot(params['emb_tgt'], params['wih_dec_t']) + params['b_dec']
    return {
        'gx_tab_enc': _permute_gate_cols(gx_tab_enc, H),            # (V_IN, 4H)
        'gx_tab_dec': _permute_gate_cols(gx_tab_dec, H),            # (V_TGT, 4H)
        'whh_enc_p':  _permute_gate_cols(params['whh_enc_t'], H),   # (H, 4H)
        'whh_dec_p':  _permute_gate_cols(params['whh_dec_t'], H),   # (H, 4H)
        'wout_t':     params['wout_t'],                             # (H, V)
        'b_out':      params['b_out'],                              # (1, V)
    }


# ----------------------------- pure-JAX reference ----------------------------
def reference_forward(src_tokens, tgt_tokens, params):
    emb_src = jnp.take(params['emb_in'], src_tokens, axis=0)
    emb_tgt = jnp.take(params['emb_tgt'], tgt_tokens, axis=0)
    H = params['whh_enc_t'].shape[0]

    def cell(x, h, c, wih_t, whh_t, bias):
        gates = jnp.dot(x, wih_t) + jnp.dot(h, whh_t) + bias
        i = jax.nn.sigmoid(gates[:, 0:H])
        f = jax.nn.sigmoid(gates[:, H:2 * H])
        g = jnp.tanh(gates[:, 2 * H:3 * H])
        o = jax.nn.sigmoid(gates[:, 3 * H:4 * H])
        c_new = f * c + i * g
        return o * jnp.tanh(c_new), c_new

    b = src_tokens.shape[0]
    h = jnp.zeros((b, H), jnp.float32)
    c = jnp.zeros((b, H), jnp.float32)
    for t in range(src_tokens.shape[1]):
        h, c = cell(emb_src[:, t, :], h, c,
                    params['wih_enc_t'], params['whh_enc_t'], params['b_enc'])
    outs = []
    for t in range(tgt_tokens.shape[1]):
        h, c = cell(emb_tgt[:, t, :], h, c,
                    params['wih_dec_t'], params['whh_dec_t'], params['b_dec'])
        outs.append(jnp.dot(h, params['wout_t']) + params['b_out'])
    return jnp.stack(outs, axis=1)                               # (B, Tt, V)


# ----------------------------- param init ------------------------------------
def init_params(key):
    ks = jax.random.split(key, 10)
    s = 0.05
    return {
        'emb_in':    jax.random.normal(ks[0], (V_IN, EMB), jnp.float32) * s,
        'emb_tgt':   jax.random.normal(ks[1], (V_TGT, EMB), jnp.float32) * s,
        # weights stored pre-transposed: (in_dim, 4H) / (H, 4H) / (H, V)
        'wih_enc_t': jax.random.normal(ks[2], (EMB, 4 * HID), jnp.float32) * s,
        'whh_enc_t': jax.random.normal(ks[3], (HID, 4 * HID), jnp.float32) * s,
        'b_enc':     jax.random.normal(ks[4], (1, 4 * HID), jnp.float32) * s,  # b_ih + b_hh folded
        'wih_dec_t': jax.random.normal(ks[5], (EMB, 4 * HID), jnp.float32) * s,
        'whh_dec_t': jax.random.normal(ks[6], (HID, 4 * HID), jnp.float32) * s,
        'b_dec':     jax.random.normal(ks[7], (1, 4 * HID), jnp.float32) * s,
        'wout_t':    jax.random.normal(ks[8], (HID, V_TGT), jnp.float32) * s,
        'b_out':     jax.random.normal(ks[9], (1, V_TGT), jnp.float32) * s,
    }


if __name__ == "__main__":
    key = jax.random.PRNGKey(0)
    pkey, skey, tkey = jax.random.split(key, 3)
    params = init_params(pkey)
    kparams = prepare_kernel_params(params)      # one-time offline fusion/permutation

    src = jax.random.randint(skey, (B, TS), 0, V_IN, dtype=jnp.int32)
    tgt = jax.random.randint(tkey, (B, TT), 0, V_TGT, dtype=jnp.int32)

    logits = jax.jit(seq2seq_forward)(src, tgt, kparams)
    logits = jax.block_until_ready(logits)

    ref = jax.block_until_ready(reference_forward(src, tgt, params))

    assert logits.shape == (B, TT, V_TGT), logits.shape
    np.testing.assert_allclose(np.asarray(logits), np.asarray(ref),
                               rtol=2e-3, atol=2e-3)
    print("KERNEL_OK")
</pallas_src>

<mosaic_0001>
module attributes {stable_mosaic.version = 11 : i64} {
  func.func @seq2seq_kernel(%arg0: memref<64x512xf32, #tpu.memory_space<vmem>>, %arg1: memref<64x512xf32, #tpu.memory_space<vmem>>, %arg2: memref<128x512xf32, #tpu.memory_space<vmem>>, %arg3: memref<128x512xf32, #tpu.memory_space<vmem>>, %arg4: memref<128x256xf32, #tpu.memory_space<vmem>>, %arg5: memref<1x256xf32, #tpu.memory_space<vmem>>, %arg6: memref<64x256xf32, #tpu.memory_space<vmem>>, %arg7: memref<64x128xf32, #tpu.memory_space<vmem>>) attributes {dimension_semantics = [], scalar_prefetch = 0 : i64, scratch_operands = 1 : i64, tpu.core_type = #tpu.core_type<tc>} {
    %cst = arith.constant 0.000000e+00 : f32
    %0 = vector.broadcast %cst : f32 to vector<8x128xf32>
    %cst_0 = arith.constant 0.000000e+00 : f32
    %1 = vector.broadcast %cst_0 : f32 to vector<8x128xf32>
    %c0 = arith.constant 0 : index
    %c0_1 = arith.constant 0 : index
    %2 = vector.load %arg0[%c0, %c0_1] : memref<64x512xf32, #tpu.memory_space<vmem>>, vector<8x512xf32>
    %c0_2 = arith.constant 0 : index
    %c0_3 = arith.constant 0 : index
    %3 = vector.load %arg2[%c0_2, %c0_3] : memref<128x512xf32, #tpu.memory_space<vmem>>, vector<128x512xf32>
    %cst_4 = arith.constant dense<0.000000e+00> : vector<8x512xf32>
    %4 = tpu.matmul %0, %3, %cst_4 {dimension_numbers = #tpu.dot_dimension_numbers<[1], [0], [0], [1], [0, 0, 1, 1], [], []>} : vector<8x128xf32>, vector<128x512xf32>, vector<8x512xf32> -> vector<8x512xf32>
    %5 = arith.addf %2, %4 : vector<8x512xf32>
    %6 = vector.extract_strided_slice %5 {offsets = [0, 0], sizes = [8, 384], strides = [1, 1]} : vector<8x512xf32> to vector<8x384xf32>
    %7 = arith.negf %6 : vector<8x384xf32>
    %8 = math.exp %7 : vector<8x384xf32>
    %cst_5 = arith.constant 1.000000e+00 : f32
    %9 = vector.broadcast %cst_5 : f32 to vector<8x384xf32>
    %10 = arith.addf %9, %8 : vector<8x384xf32>
    %11 = arith.divf %9, %10 : vector<8x384xf32>
    %12 = vector.extract_strided_slice %5 {offsets = [0, 384], sizes = [8, 128], strides = [1, 1]} : vector<8x512xf32> to vector<8x128xf32>
    %13 = math.tanh %12 : vector<8x128xf32>
    %14 = vector.extract_strided_slice %11 {offsets = [0, 0], sizes = [8, 128], strides = [1, 1]} : vector<8x384xf32> to vector<8x128xf32>
    %15 = vector.extract_strided_slice %11 {offsets = [0, 128], sizes = [8, 128], strides = [1, 1]} : vector<8x384xf32> to vector<8x128xf32>
    %16 = vector.extract_strided_slice %11 {offsets = [0, 256], sizes = [8, 128], strides = [1, 1]} : vector<8x384xf32> to vector<8x128xf32>
    %17 = arith.mulf %15, %1 : vector<8x128xf32>
    %18 = arith.mulf %14, %13 : vector<8x128xf32>
    %19 = arith.addf %17, %18 : vector<8x128xf32>
    %20 = math.tanh %19 : vector<8x128xf32>
    %21 = arith.mulf %16, %20 : vector<8x128xf32>
    %c8 = arith.constant 8 : index
    %c0_6 = arith.constant 0 : index
    %22 = vector.load %arg0[%c8, %c0_6] : memref<64x512xf32, #tpu.memory_space<vmem>>, vector<8x512xf32>
    %c0_7 = arith.constant 0 : index
    %c0_8 = arith.constant 0 : index
    %23 = vector.load %arg2[%c0_7, %c0_8] : memref<128x512xf32, #tpu.memory_space<vmem>>, vector<128x512xf32>
    %cst_9 = arith.constant dense<0.000000e+00> : vector<8x512xf32>
    %24 = tpu.matmul %21, %23, %cst_9 {dimension_numbers = #tpu.dot_dimension_numbers<[1], [0], [0], [1], [0, 0, 1, 1], [], []>} : vector<8x128xf32>, vector<128x512xf32>, vector<8x512xf32> -> vector<8x512xf32>
    %25 = arith.addf %22, %24 : vector<8x512xf32>
    %26 = vector.extract_strided_slice %25 {offsets = [0, 0], sizes = [8, 384], strides = [1, 1]} : vector<8x512xf32> to vector<8x384xf32>
    %27 = arith.negf %26 : vector<8x384xf32>
    %28 = math.exp %27 : vector<8x384xf32>
    %cst_10 = arith.constant 1.000000e+00 : f32
    %29 = vector.broadcast %cst_10 : f32 to vector<8x384xf32>
    %30 = arith.addf %29, %28 : vector<8x384xf32>
    %31 = arith.divf %29, %30 : vector<8x384xf32>
    %32 = vector.extract_strided_slice %25 {offsets = [0, 384], sizes = [8, 128], strides = [1, 1]} : vector<8x512xf32> to vector<8x128xf32>
    %33 = math.tanh %32 : vector<8x128xf32>
    %34 = vector.extract_strided_slice %31 {offsets = [0, 0], sizes = [8, 128], strides = [1, 1]} : vector<8x384xf32> to vector<8x128xf32>
    %35 = vector.extract_strided_slice %31 {offsets = [0, 128], sizes = [8, 128], strides = [1, 1]} : vector<8x384xf32> to vector<8x128xf32>
    %36 = vector.extract_strided_slice %31 {offsets = [0, 256], sizes = [8, 128], strides = [1, 1]} : vector<8x384xf32> to vector<8x128xf32>
    %37 = arith.mulf %35, %19 : vector<8x128xf32>
    %38 = arith.mulf %34, %33 : vector<8x128xf32>
    %39 = arith.addf %37, %38 : vector<8x128xf32>
    %40 = math.tanh %39 : vector<8x128xf32>
    %41 = arith.mulf %36, %40 : vector<8x128xf32>
    %c16 = arith.constant 16 : index
    %c0_11 = arith.constant 0 : index
    %42 = vector.load %arg0[%c16, %c0_11] : memref<64x512xf32, #tpu.memory_space<vmem>>, vector<8x512xf32>
    %c0_12 = arith.constant 0 : index
    %c0_13 = arith.constant 0 : index
    %43 = vector.load %arg2[%c0_12, %c0_13] : memref<128x512xf32, #tpu.memory_space<vmem>>, vector<128x512xf32>
    %cst_14 = arith.constant dense<0.000000e+00> : vector<8x512xf32>
    %44 = tpu.matmul %41, %43, %cst_14 {dimension_numbers = #tpu.dot_dimension_numbers<[1], [0], [0], [1], [0, 0, 1, 1], [], []>} : vector<8x128xf32>, vector<128x512xf32>, vector<8x512xf32> -> vector<8x512xf32>
    %45 = arith.addf %42, %44 : vector<8x512xf32>
    %46 = vector.extract_strided_slice %45 {offsets = [0, 0], sizes = [8, 384], strides = [1, 1]} : vector<8x512xf32> to vector<8x384xf32>
    %47 = arith.negf %46 : vector<8x384xf32>
    %48 = math.exp %47 : vector<8x384xf32>
    %cst_15 = arith.constant 1.000000e+00 : f32
    %49 = vector.broadcast %cst_15 : f32 to vector<8x384xf32>
    %50 = arith.addf %49, %48 : vector<8x384xf32>
    %51 = arith.divf %49, %50 : vector<8x384xf32>
    %52 = vector.extract_strided_slice %45 {offsets = [0, 384], sizes = [8, 128], strides = [1, 1]} : vector<8x512xf32> to vector<8x128xf32>
    %53 = math.tanh %52 : vector<8x128xf32>
    %54 = vector.extract_strided_slice %51 {offsets = [0, 0], sizes = [8, 128], strides = [1, 1]} : vector<8x384xf32> to vector<8x128xf32>
    %55 = vector.extract_strided_slice %51 {offsets = [0, 128], sizes = [8, 128], strides = [1, 1]} : vector<8x384xf32> to vector<8x128xf32>
    %56 = vector.extract_strided_slice %51 {offsets = [0, 256], sizes = [8, 128], strides = [1, 1]} : vector<8x384xf32> to vector<8x128xf32>
    %57 = arith.mulf %55, %39 : vector<8x128xf32>
    %58 = arith.mulf %54, %53 : vector<8x128xf32>
    %59 = arith.addf %57, %58 : vector<8x128xf32>
    %60 = math.tanh %59 : vector<8x128xf32>
    %61 = arith.mulf %56, %60 : vector<8x128xf32>
    %c24 = arith.constant 24 : index
    %c0_16 = arith.constant 0 : index
    %62 = vector.load %arg0[%c24, %c0_16] : memref<64x512xf32, #tpu.memory_space<vmem>>, vector<8x512xf32>
    %c0_17 = arith.constant 0 : index
    %c0_18 = arith.constant 0 : index
    %63 = vector.load %arg2[%c0_17, %c0_18] : memref<128x512xf32, #tpu.memory_space<vmem>>, vector<128x512xf32>
    %cst_19 = arith.constant dense<0.000000e+00> : vector<8x512xf32>
    %64 = tpu.matmul %61, %63, %cst_19 {dimension_numbers = #tpu.dot_dimension_numbers<[1], [0], [0], [1], [0, 0, 1, 1], [], []>} : vector<8x128xf32>, vector<128x512xf32>, vector<8x512xf32> -> vector<8x512xf32>
    %65 = arith.addf %62, %64 : vector<8x512xf32>
    %66 = vector.extract_strided_slice %65 {offsets = [0, 0], sizes = [8, 384], strides = [1, 1]} : vector<8x512xf32> to vector<8x384xf32>
    %67 = arith.negf %66 : vector<8x384xf32>
    %68 = math.exp %67 : vector<8x384xf32>
    %cst_20 = arith.constant 1.000000e+00 : f32
    %69 = vector.broadcast %cst_20 : f32 to vector<8x384xf32>
    %70 = arith.addf %69, %68 : vector<8x384xf32>
    %71 = arith.divf %69, %70 : vector<8x384xf32>
    %72 = vector.extract_strided_slice %65 {offsets = [0, 384], sizes = [8, 128], strides = [1, 1]} : vector<8x512xf32> to vector<8x128xf32>
    %73 = math.tanh %72 : vector<8x128xf32>
    %74 = vector.extract_strided_slice %71 {offsets = [0, 0], sizes = [8, 128], strides = [1, 1]} : vector<8x384xf32> to vector<8x128xf32>
    %75 = vector.extract_strided_slice %71 {offsets = [0, 128], sizes = [8, 128], strides = [1, 1]} : vector<8x384xf32> to vector<8x128xf32>
    %76 = vector.extract_strided_slice %71 {offsets = [0, 256], sizes = [8, 128], strides = [1, 1]} : vector<8x384xf32> to vector<8x128xf32>
    %77 = arith.mulf %75, %59 : vector<8x128xf32>
    %78 = arith.mulf %74, %73 : vector<8x128xf32>
    %79 = arith.addf %77, %78 : vector<8x128xf32>
    %80 = math.tanh %79 : vector<8x128xf32>
    %81 = arith.mulf %76, %80 : vector<8x128xf32>
    %c32 = arith.constant 32 : index
    %c0_21 = arith.constant 0 : index
    %82 = vector.load %arg0[%c32, %c0_21] : memref<64x512xf32, #tpu.memory_space<vmem>>, vector<8x512xf32>
    %c0_22 = arith.constant 0 : index
    %c0_23 = arith.constant 0 : index
    %83 = vector.load %arg2[%c0_22, %c0_23] : memref<128x512xf32, #tpu.memory_space<vmem>>, vector<128x512xf32>
    %cst_24 = arith.constant dense<0.000000e+00> : vector<8x512xf32>
    %84 = tpu.matmul %81, %83, %cst_24 {dimension_numbers = #tpu.dot_dimension_numbers<[1], [0], [0], [1], [0, 0, 1, 1], [], []>} : vector<8x128xf32>, vector<128x512xf32>, vector<8x512xf32> -> vector<8x512xf32>
    %85 = arith.addf %82, %84 : vector<8x512xf32>
    %86 = vector.extract_strided_slice %85 {offsets = [0, 0], sizes = [8, 384], strides = [1, 1]} : vector<8x512xf32> to vector<8x384xf32>
    %87 = arith.negf %86 : vector<8x384xf32>
    %88 = math.exp %87 : vector<8x384xf32>
    %cst_25 = arith.constant 1.000000e+00 : f32
    %89 = vector.broadcast %cst_25 : f32 to vector<8x384xf32>
    %90 = arith.addf %89, %88 : vector<8x384xf32>
    %91 = arith.divf %89, %90 : vector<8x384xf32>
    %92 = vector.extract_strided_slice %85 {offsets = [0, 384], sizes = [8, 128], strides = [1, 1]} : vector<8x512xf32> to vector<8x128xf32>
    %93 = math.tanh %92 : vector<8x128xf32>
    %94 = vector.extract_strided_slice %91 {offsets = [0, 0], sizes = [8, 128], strides = [1, 1]} : vector<8x384xf32> to vector<8x128xf32>
    %95 = vector.extract_strided_slice %91 {offsets = [0, 128], sizes = [8, 128], strides = [1, 1]} : vector<8x384xf32> to vector<8x128xf32>
    %96 = vector.extract_strided_slice %91 {offsets = [0, 256], sizes = [8, 128], strides = [1, 1]} : vector<8x384xf32> to vector<8x128xf32>
    %97 = arith.mulf %95, %79 : vector<8x128xf32>
    %98 = arith.mulf %94, %93 : vector<8x128xf32>
    %99 = arith.addf %97, %98 : vector<8x128xf32>
    %100 = math.tanh %99 : vector<8x128xf32>
    %101 = arith.mulf %96, %100 : vector<8x128xf32>
    %c40 = arith.constant 40 : index
    %c0_26 = arith.constant 0 : index
    %102 = vector.load %arg0[%c40, %c0_26] : memref<64x512xf32, #tpu.memory_space<vmem>>, vector<8x512xf32>
    %c0_27 = arith.constant 0 : index
    %c0_28 = arith.constant 0 : index
    %103 = vector.load %arg2[%c0_27, %c0_28] : memref<128x512xf32, #tpu.memory_space<vmem>>, vector<128x512xf32>
    %cst_29 = arith.constant dense<0.000000e+00> : vector<8x512xf32>
    %104 = tpu.matmul %101, %103, %cst_29 {dimension_numbers = #tpu.dot_dimension_numbers<[1], [0], [0], [1], [0, 0, 1, 1], [], []>} : vector<8x128xf32>, vector<128x512xf32>, vector<8x512xf32> -> vector<8x512xf32>
    %105 = arith.addf %102, %104 : vector<8x512xf32>
    %106 = vector.extract_strided_slice %105 {offsets = [0, 0], sizes = [8, 384], strides = [1, 1]} : vector<8x512xf32> to vector<8x384xf32>
    %107 = arith.negf %106 : vector<8x384xf32>
    %108 = math.exp %107 : vector<8x384xf32>
    %cst_30 = arith.constant 1.000000e+00 : f32
    %109 = vector.broadcast %cst_30 : f32 to vector<8x384xf32>
    %110 = arith.addf %109, %108 : vector<8x384xf32>
    %111 = arith.divf %109, %110 : vector<8x384xf32>
    %112 = vector.extract_strided_slice %105 {offsets = [0, 384], sizes = [8, 128], strides = [1, 1]} : vector<8x512xf32> to vector<8x128xf32>
    %113 = math.tanh %112 : vector<8x128xf32>
    %114 = vector.extract_strided_slice %111 {offsets = [0, 0], sizes = [8, 128], strides = [1, 1]} : vector<8x384xf32> to vector<8x128xf32>
    %115 = vector.extract_strided_slice %111 {offsets = [0, 128], sizes = [8, 128], strides = [1, 1]} : vector<8x384xf32> to vector<8x128xf32>
    %116 = vector.extract_strided_slice %111 {offsets = [0, 256], sizes = [8, 128], strides = [1, 1]} : vector<8x384xf32> to vector<8x128xf32>
    %117 = arith.mulf %115, %99 : vector<8x128xf32>
    %118 = arith.mulf %114, %113 : vector<8x128xf32>
    %119 = arith.addf %117, %118 : vector<8x128xf32>
    %120 = math.tanh %119 : vector<8x128xf32>
    %121 = arith.mulf %116, %120 : vector<8x128xf32>
    %c48 = arith.constant 48 : index
    %c0_31 = arith.constant 0 : index
    %122 = vector.load %arg0[%c48, %c0_31] : memref<64x512xf32, #tpu.memory_space<vmem>>, vector<8x512xf32>
    %c0_32 = arith.constant 0 : index
    %c0_33 = arith.constant 0 : index
    %123 = vector.load %arg2[%c0_32, %c0_33] : memref<128x512xf32, #tpu.memory_space<vmem>>, vector<128x512xf32>
    %cst_34 = arith.constant dense<0.000000e+00> : vector<8x512xf32>
    %124 = tpu.matmul %121, %123, %cst_34 {dimension_numbers = #tpu.dot_dimension_numbers<[1], [0], [0], [1], [0, 0, 1, 1], [], []>} : vector<8x128xf32>, vector<128x512xf32>, vector<8x512xf32> -> vector<8x512xf32>
    %125 = arith.addf %122, %124 : vector<8x512xf32>
    %126 = vector.extract_strided_slice %125 {offsets = [0, 0], sizes = [8, 384], strides = [1, 1]} : vector<8x512xf32> to vector<8x384xf32>
    %127 = arith.negf %126 : vector<8x384xf32>
    %128 = math.exp %127 : vector<8x384xf32>
    %cst_35 = arith.constant 1.000000e+00 : f32
    %129 = vector.broadcast %cst_35 : f32 to vector<8x384xf32>
    %130 = arith.addf %129, %128 : vector<8x384xf32>
    %131 = arith.divf %129, %130 : vector<8x384xf32>
    %132 = vector.extract_strided_slice %125 {offsets = [0, 384], sizes = [8, 128], strides = [1, 1]} : vector<8x512xf32> to vector<8x128xf32>
    %133 = math.tanh %132 : vector<8x128xf32>
    %134 = vector.extract_strided_slice %131 {offsets = [0, 0], sizes = [8, 128], strides = [1, 1]} : vector<8x384xf32> to vector<8x128xf32>
    %135 = vector.extract_strided_slice %131 {offsets = [0, 128], sizes = [8, 128], strides = [1, 1]} : vector<8x384xf32> to vector<8x128xf32>
    %136 = vector.extract_strided_slice %131 {offsets = [0, 256], sizes = [8, 128], strides = [1, 1]} : vector<8x384xf32> to vector<8x128xf32>
    %137 = arith.mulf %135, %119 : vector<8x128xf32>
    %138 = arith.mulf %134, %133 : vector<8x128xf32>
    %139 = arith.addf %137, %138 : vector<8x128xf32>
    %140 = math.tanh %139 : vector<8x128xf32>
    %141 = arith.mulf %136, %140 : vector<8x128xf32>
    %c56 = arith.constant 56 : index
    %c0_36 = arith.constant 0 : index
    %142 = vector.load %arg0[%c56, %c0_36] : memref<64x512xf32, #tpu.memory_space<vmem>>, vector<8x512xf32>
    %c0_37 = arith.constant 0 : index
    %c0_38 = arith.constant 0 : index
    %143 = vector.load %arg2[%c0_37, %c0_38] : memref<128x512xf32, #tpu.memory_space<vmem>>, vector<128x512xf32>
    %cst_39 = arith.constant dense<0.000000e+00> : vector<8x512xf32>
    %144 = tpu.matmul %141, %143, %cst_39 {dimension_numbers = #tpu.dot_dimension_numbers<[1], [0], [0], [1], [0, 0, 1, 1], [], []>} : vector<8x128xf32>, vector<128x512xf32>, vector<8x512xf32> -> vector<8x512xf32>
    %145 = arith.addf %142, %144 : vector<8x512xf32>
    %146 = vector.extract_strided_slice %145 {offsets = [0, 0], sizes = [8, 384], strides = [1, 1]} : vector<8x512xf32> to vector<8x384xf32>
    %147 = arith.negf %146 : vector<8x384xf32>
    %148 = math.exp %147 : vector<8x384xf32>
    %cst_40 = arith.constant 1.000000e+00 : f32
    %149 = vector.broadcast %cst_40 : f32 to vector<8x384xf32>
    %150 = arith.addf %149, %148 : vector<8x384xf32>
    %151 = arith.divf %149, %150 : vector<8x384xf32>
    %152 = vector.extract_strided_slice %145 {offsets = [0, 384], sizes = [8, 128], strides = [1, 1]} : vector<8x512xf32> to vector<8x128xf32>
    %153 = math.tanh %152 : vector<8x128xf32>
    %154 = vector.extract_strided_slice %151 {offsets = [0, 0], sizes = [8, 128], strides = [1, 1]} : vector<8x384xf32> to vector<8x128xf32>
    %155 = vector.extract_strided_slice %151 {offsets = [0, 128], sizes = [8, 128], strides = [1, 1]} : vector<8x384xf32> to vector<8x128xf32>
    %156 = vector.extract_strided_slice %151 {offsets = [0, 256], sizes = [8, 128], strides = [1, 1]} : vector<8x384xf32> to vector<8x128xf32>
    %157 = arith.mulf %155, %139 : vector<8x128xf32>
    %158 = arith.mulf %154, %153 : vector<8x128xf32>
    %159 = arith.addf %157, %158 : vector<8x128xf32>
    %160 = math.tanh %159 : vector<8x128xf32>
    %161 = arith.mulf %156, %160 : vector<8x128xf32>
    %c0_41 = arith.constant 0 : index
    %c0_42 = arith.constant 0 : index
    %162 = vector.load %arg1[%c0_41, %c0_42] : memref<64x512xf32, #tpu.memory_space<vmem>>, vector<8x512xf32>
    %c0_43 = arith.constant 0 : index
    %c0_44 = arith.constant 0 : index
    %163 = vector.load %arg3[%c0_43, %c0_44] : memref<128x512xf32, #tpu.memory_space<vmem>>, vector<128x512xf32>
    %cst_45 = arith.constant dense<0.000000e+00> : vector<8x512xf32>
    %164 = tpu.matmul %161, %163, %cst_45 {dimension_numbers = #tpu.dot_dimension_numbers<[1], [0], [0], [1], [0, 0, 1, 1], [], []>} : vector<8x128xf32>, vector<128x512xf32>, vector<8x512xf32> -> vector<8x512xf32>
    %165 = arith.addf %162, %164 : vector<8x512xf32>
    %166 = vector.extract_strided_slice %165 {offsets = [0, 0], sizes = [8, 384], strides = [1, 1]} : vector<8x512xf32> to vector<8x384xf32>
    %167 = arith.negf %166 : vector<8x384xf32>
    %168 = math.exp %167 : vector<8x384xf32>
    %cst_46 = arith.constant 1.000000e+00 : f32
    %169 = vector.broadcast %cst_46 : f32 to vector<8x384xf32>
    %170 = arith.addf %169, %168 : vector<8x384xf32>
    %171 = arith.divf %169, %170 : vector<8x384xf32>
    %172 = vector.extract_strided_slice %165 {offsets = [0, 384], sizes = [8, 128], strides = [1, 1]} : vector<8x512xf32> to vector<8x128xf32>
    %173 = math.tanh %172 : vector<8x128xf32>
    %174 = vector.extract_strided_slice %171 {offsets = [0, 0], sizes = [8, 128], strides = [1, 1]} : vector<8x384xf32> to vector<8x128xf32>
    %175 = vector.extract_strided_slice %171 {offsets = [0, 128], sizes = [8, 128], strides = [1, 1]} : vector<8x384xf32> to vector<8x128xf32>
    %176 = vector.extract_strided_slice %171 {offsets = [0, 256], sizes = [8, 128], strides = [1, 1]} : vector<8x384xf32> to vector<8x128xf32>
    %177 = arith.mulf %175, %159 : vector<8x128xf32>
    %178 = arith.mulf %174, %173 : vector<8x128xf32>
    %179 = arith.addf %177, %178 : vector<8x128xf32>
    %180 = math.tanh %179 : vector<8x128xf32>
    %181 = arith.mulf %176, %180 : vector<8x128xf32>
    %c0_47 = arith.constant 0 : index
    %c0_48 = arith.constant 0 : index
    %182 = vector.load %arg7[%c0_47, %c0_48] : memref<64x128xf32, #tpu.memory_space<vmem>>, vector<8x128xf32>
    tpu.vector_store %arg7[%c0_47, %c0_48], %181 {strides = array<i32>} : memref<64x128xf32, #tpu.memory_space<vmem>>, vector<8x128xf32>,
    %c8_49 = arith.constant 8 : index
    %c0_50 = arith.constant 0 : index
    %183 = vector.load %arg1[%c8_49, %c0_50] : memref<64x512xf32, #tpu.memory_space<vmem>>, vector<8x512xf32>
    %c0_51 = arith.constant 0 : index
    %c0_52 = arith.constant 0 : index
    %184 = vector.load %arg3[%c0_51, %c0_52] : memref<128x512xf32, #tpu.memory_space<vmem>>, vector<128x512xf32>
    %cst_53 = arith.constant dense<0.000000e+00> : vector<8x512xf32>
    %185 = tpu.matmul %181, %184, %cst_53 {dimension_numbers = #tpu.dot_dimension_numbers<[1], [0], [0], [1], [0, 0, 1, 1], [], []>} : vector<8x128xf32>, vector<128x512xf32>, vector<8x512xf32> -> vector<8x512xf32>
    %186 = arith.addf %183, %185 : vector<8x512xf32>
    %187 = vector.extract_strided_slice %186 {offsets = [0, 0], sizes = [8, 384], strides = [1, 1]} : vector<8x512xf32> to vector<8x384xf32>
    %188 = arith.negf %187 : vector<8x384xf32>
    %189 = math.exp %188 : vector<8x384xf32>
    %cst_54 = arith.constant 1.000000e+00 : f32
    %190 = vector.broadcast %cst_54 : f32 to vector<8x384xf32>
    %191 = arith.addf %190, %189 : vector<8x384xf32>
    %192 = arith.divf %190, %191 : vector<8x384xf32>
    %193 = vector.extract_strided_slice %186 {offsets = [0, 384], sizes = [8, 128], strides = [1, 1]} : vector<8x512xf32> to vector<8x128xf32>
    %194 = math.tanh %193 : vector<8x128xf32>
    %195 = vector.extract_strided_slice %192 {offsets = [0, 0], sizes = [8, 128], strides = [1, 1]} : vector<8x384xf32> to vector<8x128xf32>
    %196 = vector.extract_strided_slice %192 {offsets = [0, 128], sizes = [8, 128], strides = [1, 1]} : vector<8x384xf32> to vector<8x128xf32>
    %197 = vector.extract_strided_slice %192 {offsets = [0, 256], sizes = [8, 128], strides = [1, 1]} : vector<8x384xf32> to vector<8x128xf32>
    %198 = arith.mulf %196, %179 : vector<8x128xf32>
    %199 = arith.mulf %195, %194 : vector<8x128xf32>
    %200 = arith.addf %198, %199 : vector<8x128xf32>
    %201 = math.tanh %200 : vector<8x128xf32>
    %202 = arith.mulf %197, %201 : vector<8x128xf32>
    %c8_55 = arith.constant 8 : index
    %c0_56 = arith.constant 0 : index
    %203 = vector.load %arg7[%c8_55, %c0_56] : memref<64x128xf32, #tpu.memory_space<vmem>>, vector<8x128xf32>
    tpu.vector_store %arg7[%c8_55, %c0_56], %202 {strides = array<i32>} : memref<64x128xf32, #tpu.memory_space<vmem>>, vector<8x128xf32>,
    %c16_57 = arith.constant 16 : index
    %c0_58 = arith.constant 0 : index
    %204 = vector.load %arg1[%c16_57, %c0_58] : memref<64x512xf32, #tpu.memory_space<vmem>>, vector<8x512xf32>
    %c0_59 = arith.constant 0 : index
    %c0_60 = arith.constant 0 : index
    %205 = vector.load %arg3[%c0_59, %c0_60] : memref<128x512xf32, #tpu.memory_space<vmem>>, vector<128x512xf32>
    %cst_61 = arith.constant dense<0.000000e+00> : vector<8x512xf32>
    %206 = tpu.matmul %202, %205, %cst_61 {dimension_numbers = #tpu.dot_dimension_numbers<[1], [0], [0], [1], [0, 0, 1, 1], [], []>} : vector<8x128xf32>, vector<128x512xf32>, vector<8x512xf32> -> vector<8x512xf32>
    %207 = arith.addf %204, %206 : vector<8x512xf32>
    %208 = vector.extract_strided_slice %207 {offsets = [0, 0], sizes = [8, 384], strides = [1, 1]} : vector<8x512xf32> to vector<8x384xf32>
    %209 = arith.negf %208 : vector<8x384xf32>
    %210 = math.exp %209 : vector<8x384xf32>
    %cst_62 = arith.constant 1.000000e+00 : f32
    %211 = vector.broadcast %cst_62 : f32 to vector<8x384xf32>
    %212 = arith.addf %211, %210 : vector<8x384xf32>
    %213 = arith.divf %211, %212 : vector<8x384xf32>
    %214 = vector.extract_strided_slice %207 {offsets = [0, 384], sizes = [8, 128], strides = [1, 1]} : vector<8x512xf32> to vector<8x128xf32>
    %215 = math.tanh %214 : vector<8x128xf32>
    %216 = vector.extract_strided_slice %213 {offsets = [0, 0], sizes = [8, 128], strides = [1, 1]} : vector<8x384xf32> to vector<8x128xf32>
    %217 = vector.extract_strided_slice %213 {offsets = [0, 128], sizes = [8, 128], strides = [1, 1]} : vector<8x384xf32> to vector<8x128xf32>
    %218 = vector.extract_strided_slice %213 {offsets = [0, 256], sizes = [8, 128], strides = [1, 1]} : vector<8x384xf32> to vector<8x128xf32>
    %219 = arith.mulf %217, %200 : vector<8x128xf32>
    %220 = arith.mulf %216, %215 : vector<8x128xf32>
    %221 = arith.addf %219, %220 : vector<8x128xf32>
    %222 = math.tanh %221 : vector<8x128xf32>
    %223 = arith.mulf %218, %222 : vector<8x128xf32>
    %c16_63 = arith.constant 16 : index
    %c0_64 = arith.constant 0 : index
    %224 = vector.load %arg7[%c16_63, %c0_64] : memref<64x128xf32, #tpu.memory_space<vmem>>, vector<8x128xf32>
    tpu.vector_store %arg7[%c16_63, %c0_64], %223 {strides = array<i32>} : memref<64x128xf32, #tpu.memory_space<vmem>>, vector<8x128xf32>,
    %c24_65 = arith.constant 24 : index
    %c0_66 = arith.constant 0 : index
    %225 = vector.load %arg1[%c24_65, %c0_66] : memref<64x512xf32, #tpu.memory_space<vmem>>, vector<8x512xf32>
    %c0_67 = arith.constant 0 : index
    %c0_68 = arith.constant 0 : index
    %226 = vector.load %arg3[%c0_67, %c0_68] : memref<128x512xf32, #tpu.memory_space<vmem>>, vector<128x512xf32>
    %cst_69 = arith.constant dense<0.000000e+00> : vector<8x512xf32>
    %227 = tpu.matmul %223, %226, %cst_69 {dimension_numbers = #tpu.dot_dimension_numbers<[1], [0], [0], [1], [0, 0, 1, 1], [], []>} : vector<8x128xf32>, vector<128x512xf32>, vector<8x512xf32> -> vector<8x512xf32>
    %228 = arith.addf %225, %227 : vector<8x512xf32>
    %229 = vector.extract_strided_slice %228 {offsets = [0, 0], sizes = [8, 384], strides = [1, 1]} : vector<8x512xf32> to vector<8x384xf32>
    %230 = arith.negf %229 : vector<8x384xf32>
    %231 = math.exp %230 : vector<8x384xf32>
    %cst_70 = arith.constant 1.000000e+00 : f32
    %232 = vector.broadcast %cst_70 : f32 to vector<8x384xf32>
    %233 = arith.addf %232, %231 : vector<8x384xf32>
    %234 = arith.divf %232, %233 : vector<8x384xf32>
    %235 = vector.extract_strided_slice %228 {offsets = [0, 384], sizes = [8, 128], strides = [1, 1]} : vector<8x512xf32> to vector<8x128xf32>
    %236 = math.tanh %235 : vector<8x128xf32>
    %237 = vector.extract_strided_slice %234 {offsets = [0, 0], sizes = [8, 128], strides = [1, 1]} : vector<8x384xf32> to vector<8x128xf32>
    %238 = vector.extract_strided_slice %234 {offsets = [0, 128], sizes = [8, 128], strides = [1, 1]} : vector<8x384xf32> to vector<8x128xf32>
    %239 = vector.extract_strided_slice %234 {offsets = [0, 256], sizes = [8, 128], strides = [1, 1]} : vector<8x384xf32> to vector<8x128xf32>
    %240 = arith.mulf %238, %221 : vector<8x128xf32>
    %241 = arith.mulf %237, %236 : vector<8x128xf32>
    %242 = arith.addf %240, %241 : vector<8x128xf32>
    %243 = math.tanh %242 : vector<8x128xf32>
    %244 = arith.mulf %239, %243 : vector<8x128xf32>
    %c24_71 = arith.constant 24 : index
    %c0_72 = arith.constant 0 : index
    %245 = vector.load %arg7[%c24_71, %c0_72] : memref<64x128xf32, #tpu.memory_space<vmem>>, vector<8x128xf32>
    tpu.vector_store %arg7[%c24_71, %c0_72], %244 {strides = array<i32>} : memref<64x128xf32, #tpu.memory_space<vmem>>, vector<8x128xf32>,
    %c32_73 = arith.constant 32 : index
    %c0_74 = arith.constant 0 : index
    %246 = vector.load %arg1[%c32_73, %c0_74] : memref<64x512xf32, #tpu.memory_space<vmem>>, vector<8x512xf32>
    %c0_75 = arith.constant 0 : index
    %c0_76 = arith.constant 0 : index
    %247 = vector.load %arg3[%c0_75, %c0_76] : memref<128x512xf32, #tpu.memory_space<vmem>>, vector<128x512xf32>
    %cst_77 = arith.constant dense<0.000000e+00> : vector<8x512xf32>
    %248 = tpu.matmul %244, %247, %cst_77 {dimension_numbers = #tpu.dot_dimension_numbers<[1], [0], [0], [1], [0, 0, 1, 1], [], []>} : vector<8x128xf32>, vector<128x512xf32>, vector<8x512xf32> -> vector<8x512xf32>
    %249 = arith.addf %246, %248 : vector<8x512xf32>
    %250 = vector.extract_strided_slice %249 {offsets = [0, 0], sizes = [8, 384], strides = [1, 1]} : vector<8x512xf32> to vector<8x384xf32>
    %251 = arith.negf %250 : vector<8x384xf32>
    %252 = math.exp %251 : vector<8x384xf32>
    %cst_78 = arith.constant 1.000000e+00 : f32
    %253 = vector.broadcast %cst_78 : f32 to vector<8x384xf32>
    %254 = arith.addf %253, %252 : vector<8x384xf32>
    %255 = arith.divf %253, %254 : vector<8x384xf32>
    %256 = vector.extract_strided_slice %249 {offsets = [0, 384], sizes = [8, 128], strides = [1, 1]} : vector<8x512xf32> to vector<8x128xf32>
    %257 = math.tanh %256 : vector<8x128xf32>
    %258 = vector.extract_strided_slice %255 {offsets = [0, 0], sizes = [8, 128], strides = [1, 1]} : vector<8x384xf32> to vector<8x128xf32>
    %259 = vector.extract_strided_slice %255 {offsets = [0, 128], sizes = [8, 128], strides = [1, 1]} : vector<8x384xf32> to vector<8x128xf32>
    %260 = vector.extract_strided_slice %255 {offsets = [0, 256], sizes = [8, 128], strides = [1, 1]} : vector<8x384xf32> to vector<8x128xf32>
    %261 = arith.mulf %259, %242 : vector<8x128xf32>
    %262 = arith.mulf %258, %257 : vector<8x128xf32>
    %263 = arith.addf %261, %262 : vector<8x128xf32>
    %264 = math.tanh %263 : vector<8x128xf32>
    %265 = arith.mulf %260, %264 : vector<8x128xf32>
    %c32_79 = arith.constant 32 : index
    %c0_80 = arith.constant 0 : index
    %266 = vector.load %arg7[%c32_79, %c0_80] : memref<64x128xf32, #tpu.memory_space<vmem>>, vector<8x128xf32>
    tpu.vector_store %arg7[%c32_79, %c0_80], %265 {strides = array<i32>} : memref<64x128xf32, #tpu.memory_space<vmem>>, vector<8x128xf32>,
    %c40_81 = arith.constant 40 : index
    %c0_82 = arith.constant 0 : index
    %267 = vector.load %arg1[%c40_81, %c0_82] : memref<64x512xf32, #tpu.memory_space<vmem>>, vector<8x512xf32>
    %c0_83 = arith.constant 0 : index
    %c0_84 = arith.constant 0 : index
    %268 = vector.load %arg3[%c0_83, %c0_84] : memref<128x512xf32, #tpu.memory_space<vmem>>, vector<128x512xf32>
    %cst_85 = arith.constant dense<0.000000e+00> : vector<8x512xf32>
    %269 = tpu.matmul %265, %268, %cst_85 {dimension_numbers = #tpu.dot_dimension_numbers<[1], [0], [0], [1], [0, 0, 1, 1], [], []>} : vector<8x128xf32>, vector<128x512xf32>, vector<8x512xf32> -> vector<8x512xf32>
    %270 = arith.addf %267, %269 : vector<8x512xf32>
    %271 = vector.extract_strided_slice %270 {offsets = [0, 0], sizes = [8, 384], strides = [1, 1]} : vector<8x512xf32> to vector<8x384xf32>
    %272 = arith.negf %271 : vector<8x384xf32>
    %273 = math.exp %272 : vector<8x384xf32>
    %cst_86 = arith.constant 1.000000e+00 : f32
    %274 = vector.broadcast %cst_86 : f32 to vector<8x384xf32>
    %275 = arith.addf %274, %273 : vector<8x384xf32>
    %276 = arith.divf %274, %275 : vector<8x384xf32>
    %277 = vector.extract_strided_slice %270 {offsets = [0, 384], sizes = [8, 128], strides = [1, 1]} : vector<8x512xf32> to vector<8x128xf32>
    %278 = math.tanh %277 : vector<8x128xf32>
    %279 = vector.extract_strided_slice %276 {offsets = [0, 0], sizes = [8, 128], strides = [1, 1]} : vector<8x384xf32> to vector<8x128xf32>
    %280 = vector.extract_strided_slice %276 {offsets = [0, 128], sizes = [8, 128], strides = [1, 1]} : vector<8x384xf32> to vector<8x128xf32>
    %281 = vector.extract_strided_slice %276 {offsets = [0, 256], sizes = [8, 128], strides = [1, 1]} : vector<8x384xf32> to vector<8x128xf32>
    %282 = arith.mulf %280, %263 : vector<8x128xf32>
    %283 = arith.mulf %279, %278 : vector<8x128xf32>
    %284 = arith.addf %282, %283 : vector<8x128xf32>
    %285 = math.tanh %284 : vector<8x128xf32>
    %286 = arith.mulf %281, %285 : vector<8x128xf32>
    %c40_87 = arith.constant 40 : index
    %c0_88 = arith.constant 0 : index
    %287 = vector.load %arg7[%c40_87, %c0_88] : memref<64x128xf32, #tpu.memory_space<vmem>>, vector<8x128xf32>
    tpu.vector_store %arg7[%c40_87, %c0_88], %286 {strides = array<i32>} : memref<64x128xf32, #tpu.memory_space<vmem>>, vector<8x128xf32>,
    %c48_89 = arith.constant 48 : index
    %c0_90 = arith.constant 0 : index
    %288 = vector.load %arg1[%c48_89, %c0_90] : memref<64x512xf32, #tpu.memory_space<vmem>>, vector<8x512xf32>
    %c0_91 = arith.constant 0 : index
    %c0_92 = arith.constant 0 : index
    %289 = vector.load %arg3[%c0_91, %c0_92] : memref<128x512xf32, #tpu.memory_space<vmem>>, vector<128x512xf32>
    %cst_93 = arith.constant dense<0.000000e+00> : vector<8x512xf32>
    %290 = tpu.matmul %286, %289, %cst_93 {dimension_numbers = #tpu.dot_dimension_numbers<[1], [0], [0], [1], [0, 0, 1, 1], [], []>} : vector<8x128xf32>, vector<128x512xf32>, vector<8x512xf32> -> vector<8x512xf32>
    %291 = arith.addf %288, %290 : vector<8x512xf32>
    %292 = vector.extract_strided_slice %291 {offsets = [0, 0], sizes = [8, 384], strides = [1, 1]} : vector<8x512xf32> to vector<8x384xf32>
    %293 = arith.negf %292 : vector<8x384xf32>
    %294 = math.exp %293 : vector<8x384xf32>
    %cst_94 = arith.constant 1.000000e+00 : f32
    %295 = vector.broadcast %cst_94 : f32 to vector<8x384xf32>
    %296 = arith.addf %295, %294 : vector<8x384xf32>
    %297 = arith.divf %295, %296 : vector<8x384xf32>
    %298 = vector.extract_strided_slice %291 {offsets = [0, 384], sizes = [8, 128], strides = [1, 1]} : vector<8x512xf32> to vector<8x128xf32>
    %299 = math.tanh %298 : vector<8x128xf32>
    %300 = vector.extract_strided_slice %297 {offsets = [0, 0], sizes = [8, 128], strides = [1, 1]} : vector<8x384xf32> to vector<8x128xf32>
    %301 = vector.extract_strided_slice %297 {offsets = [0, 128], sizes = [8, 128], strides = [1, 1]} : vector<8x384xf32> to vector<8x128xf32>
    %302 = vector.extract_strided_slice %297 {offsets = [0, 256], sizes = [8, 128], strides = [1, 1]} : vector<8x384xf32> to vector<8x128xf32>
    %303 = arith.mulf %301, %284 : vector<8x128xf32>
    %304 = arith.mulf %300, %299 : vector<8x128xf32>
    %305 = arith.addf %303, %304 : vector<8x128xf32>
    %306 = math.tanh %305 : vector<8x128xf32>
    %307 = arith.mulf %302, %306 : vector<8x128xf32>
    %c48_95 = arith.constant 48 : index
    %c0_96 = arith.constant 0 : index
    %308 = vector.load %arg7[%c48_95, %c0_96] : memref<64x128xf32, #tpu.memory_space<vmem>>, vector<8x128xf32>
    tpu.vector_store %arg7[%c48_95, %c0_96], %307 {strides = array<i32>} : memref<64x128xf32, #tpu.memory_space<vmem>>, vector<8x128xf32>,
    %c56_97 = arith.constant 56 : index
    %c0_98 = arith.constant 0 : index
    %309 = vector.load %arg1[%c56_97, %c0_98] : memref<64x512xf32, #tpu.memory_space<vmem>>, vector<8x512xf32>
    %c0_99 = arith.constant 0 : index
    %c0_100 = arith.constant 0 : index
    %310 = vector.load %arg3[%c0_99, %c0_100] : memref<128x512xf32, #tpu.memory_space<vmem>>, vector<128x512xf32>
    %cst_101 = arith.constant dense<0.000000e+00> : vector<8x512xf32>
    %311 = tpu.matmul %307, %310, %cst_101 {dimension_numbers = #tpu.dot_dimension_numbers<[1], [0], [0], [1], [0, 0, 1, 1], [], []>} : vector<8x128xf32>, vector<128x512xf32>, vector<8x512xf32> -> vector<8x512xf32>
    %312 = arith.addf %309, %311 : vector<8x512xf32>
    %313 = vector.extract_strided_slice %312 {offsets = [0, 0], sizes = [8, 384], strides = [1, 1]} : vector<8x512xf32> to vector<8x384xf32>
    %314 = arith.negf %313 : vector<8x384xf32>
    %315 = math.exp %314 : vector<8x384xf32>
    %cst_102 = arith.constant 1.000000e+00 : f32
    %316 = vector.broadcast %cst_102 : f32 to vector<8x384xf32>
    %317 = arith.addf %316, %315 : vector<8x384xf32>
    %318 = arith.divf %316, %317 : vector<8x384xf32>
    %319 = vector.extract_strided_slice %312 {offsets = [0, 384], sizes = [8, 128], strides = [1, 1]} : vector<8x512xf32> to vector<8x128xf32>
    %320 = math.tanh %319 : vector<8x128xf32>
    %321 = vector.extract_strided_slice %318 {offsets = [0, 0], sizes = [8, 128], strides = [1, 1]} : vector<8x384xf32> to vector<8x128xf32>
    %322 = vector.extract_strided_slice %318 {offsets = [0, 128], sizes = [8, 128], strides = [1, 1]} : vector<8x384xf32> to vector<8x128xf32>
    %323 = vector.extract_strided_slice %318 {offsets = [0, 256], sizes = [8, 128], strides = [1, 1]} : vector<8x384xf32> to vector<8x128xf32>
    %324 = arith.mulf %322, %305 : vector<8x128xf32>
    %325 = arith.mulf %321, %320 : vector<8x128xf32>
    %326 = arith.addf %324, %325 : vector<8x128xf32>
    %327 = math.tanh %326 : vector<8x128xf32>
    %328 = arith.mulf %323, %327 : vector<8x128xf32>
    %c56_103 = arith.constant 56 : index
    %c0_104 = arith.constant 0 : index
    %329 = vector.load %arg7[%c56_103, %c0_104] : memref<64x128xf32, #tpu.memory_space<vmem>>, vector<8x128xf32>
    tpu.vector_store %arg7[%c56_103, %c0_104], %328 {strides = array<i32>} : memref<64x128xf32, #tpu.memory_space<vmem>>, vector<8x128xf32>,
    %c0_105 = arith.constant 0 : index
    %c0_106 = arith.constant 0 : index
    %330 = vector.load %arg7[%c0_105, %c0_106] : memref<64x128xf32, #tpu.memory_space<vmem>>, vector<64x128xf32>
    %c0_107 = arith.constant 0 : index
    %c0_108 = arith.constant 0 : index
    %331 = vector.load %arg4[%c0_107, %c0_108] : memref<128x256xf32, #tpu.memory_space<vmem>>, vector<128x256xf32>
    %cst_109 = arith.constant dense<0.000000e+00> : vector<64x256xf32>
    %332 = tpu.matmul %330, %331, %cst_109 {dimension_numbers = #tpu.dot_dimension_numbers<[1], [0], [0], [1], [0, 0, 1, 1], [], []>} : vector<64x128xf32>, vector<128x256xf32>, vector<64x256xf32> -> vector<64x256xf32>
    %c0_110 = arith.constant 0 : index
    %c0_111 = arith.constant 0 : index
    %333 = vector.load %arg5[%c0_110, %c0_111] : memref<1x256xf32, #tpu.memory_space<vmem>>, vector<1x256xf32>
    %334 = vector.broadcast %333 : vector<1x256xf32> to vector<64x256xf32>
    %335 = arith.addf %332, %334 : vector<64x256xf32>
    %c0_112 = arith.constant 0 : index
    %c0_113 = arith.constant 0 : index
    %336 = vector.load %arg6[%c0_112, %c0_113] : memref<64x256xf32, #tpu.memory_space<vmem>>, vector<64x256xf32>
    tpu.vector_store %arg6[%c0_112, %c0_113], %335 {strides = array<i32>} : memref<64x256xf32, #tpu.memory_space<vmem>>, vector<64x256xf32>,
    return
  }
}

</mosaic_0001>

<bundles_post_ra>
// kernel: seq2seq_forward.1
= control target key start
LH: loop header
LB: loop body
LE: loop exit
PB: predicated region body
PF: predicated region fallthrough
CT: control target
= control target key end

     0   :  { %v4937_v3 = vmov 0.0   ;;  %s6729_s2 = inlined_call_operand.vmem [shape: f32[128,512], index: 2, kind: input, shape index: {}]   ;;  %s6730_s0 = inlined_call_operand.vmem [shape: f32[64,512], index: 0, kind: input, shape index: {}]   ;;  %s6731_s3 = inlined_call_operand.vmem [shape: f32[128,512], index: 3, kind: input, shape index: {}]   ;;  %s6732_s1 = inlined_call_operand.vmem [shape: f32[64,512], index: 1, kind: input, shape index: {}]   ;;  %s6733_s4 = inlined_call_operand.vmem [shape: f32[128,256], index: 4, kind: input, shape index: {}]   ;;  %s6734_s5 = inlined_call_operand.vmem [shape: f32[1,256], index: 5, kind: input, shape index: {}]   ;;  %s6735_s6 = inlined_call_operand.vmem [shape: f32[64,256], index: 6, kind: output, shape index: {}]  }
   0x1   :  { %v28_v0 = vld [vmem:[%s6729_s2 + $0x8] sm:$0xff]  ;;  %v27_v2 = vld [vmem:[%s6729_s2] sm:$0xff]  ;;  %155 = vmatprep.mubr.f32.mxu1 %v4937_v3  ;;  %329 = vmatprep.mubr.f32.mxu0 %v4937_v3  ;;  %v30_v48 = vld [vmem:[%s6729_s2 + $0x18] sm:$0xff] }
   0x2   :  { %v32_v1 = vld [vmem:[%s6729_s2 + $0x28] sm:$0xff]  ;;  %v31_v5 = vld [vmem:[%s6729_s2 + $0x20] sm:$0xff]  ;;  %v34_v49 = vld [vmem:[%s6729_s2 + $0x38] sm:$0xff] }
   0x3   :  { %v4984_v4 = vpack.c.bf16 %v32_v1, %v28_v0  ;;  %v36_v6 = vld [vmem:[%s6729_s2 + $0x48] sm:$0xff]  ;;  %v4995_v8 = vpack.c.bf16 %v31_v5, %v27_v2  ;;  %v35_v10 = vld [vmem:[%s6729_s2 + $0x40] sm:$0xff]  ;;  %v5138_v51 = vpack.c.bf16 %v34_v49, %v30_v48  ;;  %v29_v52 = vld [vmem:[%s6729_s2 + $0x10] sm:$0xff] }
   0x4   :  { %v40_v7 = vld [vmem:[%s6729_s2 + $0x68] sm:$0xff]  ;;  %v39_v11 = vld [vmem:[%s6729_s2 + $0x60] sm:$0xff]  ;;  %v33_v53 = vld [vmem:[%s6729_s2 + $0x30] sm:$0xff] }
   0x5   :  { %v4997_v9 = vpack.c.bf16 %v40_v7, %v36_v6  ;;  %v44_v12 = vld [vmem:[%s6729_s2 + $0x88] sm:$0xff]  ;;  %3625 = vmatprep.subr.bf16.mxu1 %v4984_v4  ;;  %3689 = vmatprep.subr.bf16.mxu0 %v4984_v4  ;;  %v5014_v14 = vpack.c.bf16 %v39_v11, %v35_v10  ;;  %v43_v16 = vld [vmem:[%s6729_s2 + $0x80] sm:$0xff]  ;;  %v38_v54 = vld [vmem:[%s6729_s2 + $0x58] sm:$0xff]  ;;  %v5154_v56 = vpack.c.bf16 %v33_v53, %v29_v52 }
   0x6   :  { %v48_v13 = vld [vmem:[%s6729_s2 + $0xa8] sm:$0xff]  ;;  %3627 = vmatpush1.bf16.msra.mxu1 %v4995_v8  ;;  %3691 = vmatpush1.bf16.msra.mxu0 %v4995_v8  ;;  %v47_v17 = vld [vmem:[%s6729_s2 + $0xa0] sm:$0xff]  ;;  %v42_v55 = vld [vmem:[%s6729_s2 + $0x78] sm:$0xff] }
   0x7   :  { %3629 = vmatprep.subr.bf16.mxu1 %v4997_v9  ;;  %v5018_v15 = vpack.c.bf16 %v48_v13, %v44_v12  ;;  %3693 = vmatprep.subr.bf16.mxu0 %v4997_v9  ;;  %v52_v18 = vld [vmem:[%s6729_s2 + $0xc8] sm:$0xff]  ;;  %v5034_v20 = vpack.c.bf16 %v47_v17, %v43_v16  ;;  %v51_v22 = vld [vmem:[%s6729_s2 + $0xc0] sm:$0xff]  ;;  %v5158_v57 = vpack.c.bf16 %v42_v55, %v38_v54  ;;  %v37_v58 = vld [vmem:[%s6729_s2 + $0x50] sm:$0xff] }
   0x8   :  { %v56_v19 = vld [vmem:[%s6729_s2 + $0xe8] sm:$0xff]  ;;  %v55_v23 = vld [vmem:[%s6729_s2 + $0xe0] sm:$0xff]  ;;  %v41_v59 = vld [vmem:[%s6729_s2 + $0x70] sm:$0xff] }
   0x9   :  { %v5038_v21 = vpack.c.bf16 %v56_v19, %v52_v18  ;;  %v60_v24 = vld [vmem:[%s6729_s2 + $0x108] sm:$0xff]  ;;  %v5054_v26 = vpack.c.bf16 %v55_v23, %v51_v22  ;;  %v59_v28 = vld [vmem:[%s6729_s2 + $0x100] sm:$0xff]  ;;  %v46_v60 = vld [vmem:[%s6729_s2 + $0x98] sm:$0xff]  ;;  %v5175_v62 = vpack.c.bf16 %v41_v59, %v37_v58 }
   0xa   :  { %3631 = vmatpush1.bf16.msra.mxu1 %v5014_v14  ;;  %3695 = vmatpush1.bf16.msra.mxu0 %v5014_v14  ;;  %v64_v25 = vld [vmem:[%s6729_s2 + $0x128] sm:$0xff]  ;;  %v63_v29 = vld [vmem:[%s6729_s2 + $0x120] sm:$0xff]  ;;  %v50_v61 = vld [vmem:[%s6729_s2 + $0xb8] sm:$0xff] }
   0xb   :  { %3633 = vmatprep.subr.bf16.mxu1 %v5018_v15  ;;  %3697 = vmatprep.subr.bf16.mxu0 %v5018_v15  ;;  %v5058_v27 = vpack.c.bf16 %v64_v25, %v60_v24  ;;  %v68_v30 = vld [vmem:[%s6729_s2 + $0x148] sm:$0xff]  ;;  %v5074_v32 = vpack.c.bf16 %v63_v29, %v59_v28  ;;  %v67_v34 = vld [vmem:[%s6729_s2 + $0x140] sm:$0xff]  ;;  %v5179_v63 = vpack.c.bf16 %v50_v61, %v46_v60  ;;  %v45_v0 = vld [vmem:[%s6729_s2 + $0x90] sm:$0xff] }
   0xc   :  { %v72_v31 = vld [vmem:[%s6729_s2 + $0x168] sm:$0xff]  ;;  %v71_v35 = vld [vmem:[%s6729_s2 + $0x160] sm:$0xff]  ;;  %v49_v1 = vld [vmem:[%s6729_s2 + $0xb0] sm:$0xff] }
   0xd   :  { %v5078_v33 = vpack.c.bf16 %v72_v31, %v68_v30  ;;  %v76_v36 = vld [vmem:[%s6729_s2 + $0x188] sm:$0xff]  ;;  %v5094_v38 = vpack.c.bf16 %v71_v35, %v67_v34  ;;  %v75_v40 = vld [vmem:[%s6729_s2 + $0x180] sm:$0xff]  ;;  %v54_v2 = vld [vmem:[%s6729_s2 + $0xd8] sm:$0xff]  ;;  %v5194_v6 = vpack.c.bf16 %v49_v1, %v45_v0 }
   0xe   :  { %3635 = vmatpush1.bf16.msra.mxu1 %v5034_v20  ;;  %3699 = vmatpush1.bf16.msra.mxu0 %v5034_v20  ;;  %v80_v37 = vld [vmem:[%s6729_s2 + $0x1a8] sm:$0xff]  ;;  %v79_v41 = vld [vmem:[%s6729_s2 + $0x1a0] sm:$0xff]  ;;  %v58_v5 = vld [vmem:[%s6729_s2 + $0xf8] sm:$0xff] }
   0xf   :  { %3637 = vmatprep.subr.bf16.mxu1 %v5038_v21  ;;  %3701 = vmatprep.subr.bf16.mxu0 %v5038_v21  ;;  %v5098_v39 = vpack.c.bf16 %v80_v37, %v76_v36  ;;  %v84_v42 = vld [vmem:[%s6729_s2 + $0x1c8] sm:$0xff]  ;;  %v5114_v44 = vpack.c.bf16 %v79_v41, %v75_v40  ;;  %v83_v46 = vld [vmem:[%s6729_s2 + $0x1c0] sm:$0xff]  ;;  %v5197_v7 = vpack.c.bf16 %v58_v5, %v54_v2  ;;  %v53_v10 = vld [vmem:[%s6729_s2 + $0xd0] sm:$0xff] }
  0x10   :  { %v88_v43 = vld [vmem:[%s6729_s2 + $0x1e8] sm:$0xff]  ;;  %v87_v47 = vld [vmem:[%s6729_s2 + $0x1e0] sm:$0xff]  ;;  %v57_v11 = vld [vmem:[%s6729_s2 + $0xf0] sm:$0xff] }
  0x11   :  { %v5118_v45 = vpack.c.bf16 %v88_v43, %v84_v42  ;;  %v5134_v50 = vpack.c.bf16 %v87_v47, %v83_v46  ;;  %v62_v12 = vld [vmem:[%s6729_s2 + $0x118] sm:$0xff]  ;;  %v5212_v16 = vpack.c.bf16 %v57_v11, %v53_v10  ;;  %v61_v18 = vld [vmem:[%s6729_s2 + $0x110] sm:$0xff]  ;;  %v24_v53 = vld [vmem:[%s6730_s0 + $0x8] sm:$0xff] }
  0x12   :  { %3639 = vmatpush1.bf16.msra.mxu1 %v5054_v26  ;;  %3703 = vmatpush1.bf16.msra.mxu0 %v5054_v26  ;;  %v66_v13 = vld [vmem:[%s6729_s2 + $0x138] sm:$0xff]  ;;  %v65_v19 = vld [vmem:[%s6729_s2 + $0x130] sm:$0xff]  ;;  %v23_v54 = vld [vmem:[%s6730_s0] sm:$0xff] }
  0x13   :  { %3641 = vmatprep.subr.bf16.mxu1 %v5058_v27  ;;  %3705 = vmatprep.subr.bf16.mxu0 %v5058_v27  ;;  %v5215_v17 = vpack.c.bf16 %v66_v13, %v62_v12  ;;  %v70_v22 = vld [vmem:[%s6729_s2 + $0x158] sm:$0xff]  ;;  %v5230_v24 = vpack.c.bf16 %v65_v19, %v61_v18  ;;  %v69_v28 = vld [vmem:[%s6729_s2 + $0x150] sm:$0xff] }
  0x14   :  { %v74_v23 = vld [vmem:[%s6729_s2 + $0x178] sm:$0xff]  ;;  %v73_v29 = vld [vmem:[%s6729_s2 + $0x170] sm:$0xff] }
  0x15   :  { %v5233_v25 = vpack.c.bf16 %v74_v23, %v70_v22  ;;  %v78_v30 = vld [vmem:[%s6729_s2 + $0x198] sm:$0xff]  ;;  %v5248_v34 = vpack.c.bf16 %v73_v29, %v69_v28  ;;  %v77_v36 = vld [vmem:[%s6729_s2 + $0x190] sm:$0xff] }
  0x16   :  { %3643 = vmatpush1.bf16.msra.mxu1 %v5074_v32  ;;  %3707 = vmatpush1.bf16.msra.mxu0 %v5074_v32  ;;  %v82_v31 = vld [vmem:[%s6729_s2 + $0x1b8] sm:$0xff]  ;;  %v81_v37 = vld [vmem:[%s6729_s2 + $0x1b0] sm:$0xff] }
  0x17   :  { %3645 = vmatprep.subr.bf16.mxu1 %v5078_v33  ;;  %3709 = vmatprep.subr.bf16.mxu0 %v5078_v33  ;;  %v5251_v35 = vpack.c.bf16 %v82_v31, %v78_v30  ;;  %v86_v40 = vld [vmem:[%s6729_s2 + $0x1d8] sm:$0xff]  ;;  %v5266_v42 = vpack.c.bf16 %v81_v37, %v77_v36  ;;  %v85_v46 = vld [vmem:[%s6729_s2 + $0x1d0] sm:$0xff] }
  0x18   :  { %v90_v41 = vld [vmem:[%s6729_s2 + $0x1f8] sm:$0xff]  ;;  %v89_v47 = vld [vmem:[%s6729_s2 + $0x1f0] sm:$0xff] }
  0x19   :  { %v5269_v43 = vpack.c.bf16 %v90_v41, %v86_v40  ;;  %v5278_v48 = vpack.c.bf16 %v89_v47, %v85_v46  ;;  %v25_v2 = vld [vmem:[%s6730_s0 + $0x10] sm:$0xff]  ;;  %v26_v10 = vld [vmem:[%s6730_s0 + $0x18] sm:$0xff]  ;;  %v261_v47 = vld [vmem:[%s6730_s0 + $0x20] sm:$0xff] }
  0x1a   :  { %3647 = vmatpush1.bf16.msra.mxu1 %v5094_v38  ;;  %3711 = vmatpush1.bf16.msra.mxu0 %v5094_v38 }
  0x1b   :  { %3649 = vmatprep.subr.bf16.mxu1 %v5098_v39  ;;  %3713 = vmatprep.subr.bf16.mxu0 %v5098_v39 }
  0x1e   :  { %3651 = vmatpush1.bf16.msra.mxu1 %v5114_v44  ;;  %3715 = vmatpush1.bf16.msra.mxu0 %v5114_v44 }
  0x1f   :  { %3653 = vmatprep.subr.bf16.mxu1 %v5118_v45  ;;  %3717 = vmatprep.subr.bf16.mxu0 %v5118_v45 }
  0x22   :  { %3655 = vmatpush1.bf16.msra.mxu1 %v5134_v50  ;;  %3719 = vmatpush1.bf16.msra.mxu0 %v5134_v50 }
  0x23   :  { %3657 = vmatprep.subr.bf16.mxu1 %v5138_v51  ;;  %3753 = vmatprep.subr.bf16.mxu0 %v4984_v4 }
  0x25   :  { %156 = vmatmul.mubr.f32.vlgmr.msra.gmra.mrb[0].mxu1 %v4937_v3 }
  0x26   :  { %3659 = vmatpush1.bf16.msra.mxu1 %v5154_v56  ;;  %226 = vmatprep.mubr.f32.mxu1 %v4937_v3 }
  0x27   :  { %3661 = vmatprep.subr.bf16.mxu1 %v5158_v57 }
  0x2a   :  { %3663 = vmatpush1.bf16.msra.mxu1 %v5175_v62 }
  0x2b   :  { %3665 = vmatprep.subr.bf16.mxu1 %v5179_v63 }
  0x2e   :  { %3667 = vmatpush1.bf16.msra.mxu1 %v5194_v6 }
  0x2f   :  { %3669 = vmatprep.subr.bf16.mxu1 %v5197_v7 }
  0x32   :  { %3671 = vmatpush1.bf16.msra.mxu1 %v5212_v16 }
  0x33   :  { %3673 = vmatprep.subr.bf16.mxu1 %v5215_v17 }
  0x36   :  { %3675 = vmatpush1.bf16.msra.mxu1 %v5230_v24 }
  0x37   :  { %3677 = vmatprep.subr.bf16.mxu1 %v5233_v25 }
  0x3a   :  { %3679 = vmatpush1.bf16.msra.mxu1 %v5248_v34 }
  0x3b   :  { %3681 = vmatprep.subr.bf16.mxu1 %v5251_v35 }
  0x3e   :  { %3683 = vmatpush1.bf16.msra.mxu1 %v5266_v42 }
  0x3f   :  { %3685 = vmatprep.subr.bf16.mxu1 %v5269_v43 }
  0x42   :  { %3687 = vmatpush1.bf16.msra.mxu1 %v5278_v48 }
  0x43   :  { %3721 = vmatprep.subr.bf16.mxu1 %v5138_v51 }
  0x45   :  { %227 = vmatmul.mubr.f32.vlgmr.msra.gmra.mrb[2].mxu1 %v4937_v3 }
  0x46   :  { %3723 = vmatpush1.bf16.msra.mxu1 %v5154_v56  ;;  %400 = vmatprep.mubr.f32.mxu1 %v4937_v3 }
  0x47   :  { %3725 = vmatprep.subr.bf16.mxu1 %v5158_v57 }
  0x4a   :  { %3727 = vmatpush1.bf16.msra.mxu1 %v5175_v62 }
  0x4b   :  { %3729 = vmatprep.subr.bf16.mxu1 %v5179_v63 }
  0x4e   :  { %3731 = vmatpush1.bf16.msra.mxu1 %v5194_v6 }
  0x4f   :  { %3733 = vmatprep.subr.bf16.mxu1 %v5197_v7 }
  0x52   :  { %3735 = vmatpush1.bf16.msra.mxu1 %v5212_v16 }
  0x53   :  { %3737 = vmatprep.subr.bf16.mxu1 %v5215_v17 }
  0x56   :  { %3739 = vmatpush1.bf16.msra.mxu1 %v5230_v24 }
  0x57   :  { %3741 = vmatprep.subr.bf16.mxu1 %v5233_v25 }
  0x5a   :  { %3743 = vmatpush1.bf16.msra.mxu1 %v5248_v34 }
  0x5b   :  { %3745 = vmatprep.subr.bf16.mxu1 %v5251_v35 }
  0x5e   :  { %3747 = vmatpush1.bf16.msra.mxu1 %v5266_v42 }
  0x5f   :  { %3749 = vmatprep.subr.bf16.mxu1 %v5269_v43 }
  0x62   :  { %3751 = vmatpush1.bf16.msra.mxu1 %v5278_v48 }
  0x63   :  { %3785 = vmatprep.subr.bf16.mxu1 %v5138_v51 }
  0xf8   :  { %v157_v49 = vpop.f32.mrb[0].mxu1 }
  0xf9   :  { %v159_v52 = vpop.f32.mrb[1].mxu1  ;;  %v233_v58 = vadd.f32 %v157_v49, %v23_v54  ;;  %v262_v49 = vld [vmem:[%s6730_s0 + $0x28] sm:$0xff] }
  0xfa   :  { %v234_v55 = vadd.f32 %v159_v52, %v24_v53 }
  0xfb   :  { %v3576_v60 = vmul.f32 -1.442695, %v233_v58 }
  0xfc   :  { %v3577_v59 = vmul.f32 -1.442695, %v234_v55 }
  0xfe   :  { %4681 = vpow2.f32 %v3577_v59 }
  0xff   :  { %4683 = vpow2.f32 %v3576_v60 }
 0x108   :  { %v4682_v61 = vpop.eup %4681 }
 0x109   :  { %v4684_v0 = vpop.eup %4683  ;;  %v247_v1 = vadd.f32 1.0, %v4682_v61 }
 0x10a   :  { %v246_v5 = vadd.f32 1.0, %v4684_v0  ;;  %v263_v0 = vld [vmem:[%s6730_s0 + $0x30] sm:$0xff] }
 0x10b   :  { %4685 = vrcp.f32 %v247_v1 }
 0x10c   :  { %4687 = vrcp.f32 %v246_v5 }
 0x115   :  { %v4686_v22 = vpop.eup %4685 }
 0x116   :  { %v4688_v23 = vpop.eup %4687  ;;  %v256_v30 = vmul.f32 0.0, %v4686_v22 }
 0x118   :  { %v228_v11 = vpop.f32.mrb[2].mxu1 }
 0x119   :  { %v235_v12 = vadd.f32 %v228_v11, %v25_v2  ;;  %v230_v13 = vpop.f32.mrb[3].mxu1  ;;  %v264_v2 = vld [vmem:[%s6730_s0 + $0x38] sm:$0xff] }
 0x11a   :  { %v236_v18 = vadd.f32 %v230_v13, %v26_v10 }
 0x11b   :  { %v3578_v19 = vmul.f32 -1.442695, %v235_v12 }
 0x11c   :  { %4689 = vtanh.f32 %v236_v18 }
 0x11d   :  { %4691 = vpow2.f32 %v3578_v19 }
 0x126   :  { %v4690_v28 = vpop.eup %4689 }
 0x127   :  { %v4692_v29 = vpop.eup %4691  ;;  %v257_v31 = vmul.f32 %v4690_v28, %v4688_v23 }
 0x128   :  { %v248_v36 = vadd.f32 1.0, %v4692_v29 }
 0x129   :  { %v5313_v37 = vadd.f32 %v257_v31, %v256_v30 }
 0x12a   :  { %4693 = vrcp.f32 %v248_v36 }
 0x12b   :  { %4695 = vtanh.f32 %v5313_v37 }
 0x134   :  { %v4694_v40 = vpop.eup %4693 }
 0x135   :  { %v4696_v41 = vpop.eup %4695 }
 0x136   :  { %v260_v46 = vmul.f32 %v4696_v41, %v4694_v40 }
 0x138   :  { %330 = vmatmul.mubr.f32.vlgmr.msra.gmra.mrb[0].mxu0 %v260_v46  ;;  %401 = vmatmul.mubr.f32.vlgmr.msra.gmra.mrb[4].mxu1 %v260_v46 }
 0x139   :  { %3755 = vmatpush1.bf16.msra.mxu0 %v4995_v8  ;;  %3787 = vmatpush1.bf16.msra.mxu1 %v5154_v56 }
 0x13a   :  { %3757 = vmatprep.subr.bf16.mxu0 %v4997_v9  ;;  %3789 = vmatprep.subr.bf16.mxu1 %v5158_v57 }
 0x13b   :  { %503 = vmatprep.mubr.f32.mxu0 %v4937_v3  ;;  %574 = vmatprep.mubr.f32.mxu1 %v4937_v3 }
 0x13d   :  { %3759 = vmatpush1.bf16.msra.mxu0 %v5014_v14  ;;  %3791 = vmatpush1.bf16.msra.mxu1 %v5175_v62 }
 0x13e   :  { %3761 = vmatprep.subr.bf16.mxu0 %v5018_v15  ;;  %3793 = vmatprep.subr.bf16.mxu1 %v5179_v63 }
 0x141   :  { %3763 = vmatpush1.bf16.msra.mxu0 %v5034_v20  ;;  %3795 = vmatpush1.bf16.msra.mxu1 %v5194_v6 }
 0x142   :  { %3765 = vmatprep.subr.bf16.mxu0 %v5038_v21  ;;  %3797 = vmatprep.subr.bf16.mxu1 %v5197_v7 }
 0x145   :  { %3767 = vmatpush1.bf16.msra.mxu0 %v5054_v26  ;;  %3799 = vmatpush1.bf16.msra.mxu1 %v5212_v16 }
 0x146   :  { %3769 = vmatprep.subr.bf16.mxu0 %v5058_v27  ;;  %3801 = vmatprep.subr.bf16.mxu1 %v5215_v17 }
 0x149   :  { %3771 = vmatpush1.bf16.msra.mxu0 %v5074_v32  ;;  %3803 = vmatpush1.bf16.msra.mxu1 %v5230_v24 }
 0x14a   :  { %3773 = vmatprep.subr.bf16.mxu0 %v5078_v33  ;;  %3805 = vmatprep.subr.bf16.mxu1 %v5233_v25 }
 0x14d   :  { %3775 = vmatpush1.bf16.msra.mxu0 %v5094_v38  ;;  %3807 = vmatpush1.bf16.msra.mxu1 %v5248_v34 }
 0x14e   :  { %3777 = vmatprep.subr.bf16.mxu0 %v5098_v39  ;;  %3809 = vmatprep.subr.bf16.mxu1 %v5251_v35 }
 0x151   :  { %3779 = vmatpush1.bf16.msra.mxu0 %v5114_v44  ;;  %3811 = vmatpush1.bf16.msra.mxu1 %v5266_v42 }
 0x152   :  { %3781 = vmatprep.subr.bf16.mxu0 %v5118_v45  ;;  %3813 = vmatprep.subr.bf16.mxu1 %v5269_v43 }
 0x155   :  { %3783 = vmatpush1.bf16.msra.mxu0 %v5134_v50  ;;  %3815 = vmatpush1.bf16.msra.mxu1 %v5278_v48 }
 0x156   :  { %3817 = vmatprep.subr.bf16.mxu0 %v4984_v4  ;;  %3849 = vmatprep.subr.bf16.mxu1 %v5138_v51 }
 0x20b   :  { %v331_v52 = vpop.f32.mrb[0].mxu0  ;;  %v402_v53 = vpop.f32.mrb[4].mxu1 }
 0x20c   :  { %v407_v54 = vadd.f32 %v331_v52, %v261_v47  ;;  %v333_v55 = vpop.f32.mrb[1].mxu0  ;;  %v404_v58 = vpop.f32.mrb[5].mxu1  ;;  %v409_v1 = vadd.f32 %v402_v53, %v263_v0  ;;  %v436_v47 = vld [vmem:[%s6730_s0 + $0x48] sm:$0xff] }
 0x20d   :  { %v408_v59 = vadd.f32 %v333_v55, %v262_v49  ;;  %v410_v5 = vadd.f32 %v404_v58, %v264_v2 }
 0x20e   :  { %v3579_v60 = vmul.f32 -1.442695, %v407_v54  ;;  %v3581_v10 = vmul.f32 -1.442695, %v409_v1  ;;  %v438_v1 = vld [vmem:[%s6730_s0 + $0x58] sm:$0xff] }
 0x20f   :  { %v3580_v61 = vmul.f32 -1.442695, %v408_v59 }
 0x210   :  { %4697 = vpow2.f32 %v3579_v60 }
 0x211   :  { %4699 = vpow2.f32 %v3580_v61  ;;  %v437_v61 = vld [vmem:[%s6730_s0 + $0x50] sm:$0xff] }
 0x212   :  { %4701 = vtanh.f32 %v410_v5 }
 0x213   :  { %4703 = vpow2.f32 %v3581_v10 }
 0x21a   :  { %v4698_v11 = vpop.eup %4697 }
 0x21b   :  { %v420_v12 = vadd.f32 1.0, %v4698_v11  ;;  %v4700_v13 = vpop.eup %4699 }
 0x21c   :  { %v421_v18 = vadd.f32 1.0, %v4700_v13  ;;  %v4702_v19 = vpop.eup %4701 }
 0x21d   :  { %4705 = vrcp.f32 %v420_v12  ;;  %v4704_v22 = vpop.eup %4703 }
 0x21e   :  { %4707 = vrcp.f32 %v421_v18  ;;  %v422_v30 = vadd.f32 1.0, %v4704_v22 }
 0x220   :  { %4709 = vrcp.f32 %v422_v30 }
 0x227   :  { %v4706_v23 = vpop.eup %4705 }
 0x228   :  { %v431_v28 = vmul.f32 %v4706_v23, %v4702_v19  ;;  %v4708_v29 = vpop.eup %4707 }
 0x229   :  { %v430_v31 = vmul.f32 %v4708_v29, %v5313_v37  ;;  %v435_v37 = vld [vmem:[%s6730_s0 + $0x40] sm:$0xff] }
 0x22a   :  { %v4710_v40 = vpop.eup %4709 }
 0x22b   :  { %v5363_v36 = vadd.f32 %v431_v28, %v430_v31 }
 0x22d   :  { %4711 = vtanh.f32 %v5363_v36 }
 0x237   :  { %v4712_v41 = vpop.eup %4711 }
 0x238   :  { %v434_v46 = vmul.f32 %v4712_v41, %v4710_v40 }
 0x23a   :  { %504 = vmatmul.mubr.f32.vlgmr.msra.gmra.mrb[2].mxu0 %v434_v46  ;;  %575 = vmatmul.mubr.f32.vlgmr.msra.gmra.mrb[6].mxu1 %v434_v46 }
 0x23b   :  { %3819 = vmatpush1.bf16.msra.mxu0 %v4995_v8  ;;  %3851 = vmatpush1.bf16.msra.mxu1 %v5154_v56 }
 0x23c   :  { %3821 = vmatprep.subr.bf16.mxu0 %v4997_v9  ;;  %3853 = vmatprep.subr.bf16.mxu1 %v5158_v57 }
 0x23d   :  { %677 = vmatprep.mubr.f32.mxu0 %v4937_v3  ;;  %748 = vmatprep.mubr.f32.mxu1 %v4937_v3 }
 0x23f   :  { %3823 = vmatpush1.bf16.msra.mxu0 %v5014_v14  ;;  %3855 = vmatpush1.bf16.msra.mxu1 %v5175_v62 }
 0x240   :  { %3825 = vmatprep.subr.bf16.mxu0 %v5018_v15  ;;  %3857 = vmatprep.subr.bf16.mxu1 %v5179_v63 }
 0x243   :  { %3827 = vmatpush1.bf16.msra.mxu0 %v5034_v20  ;;  %3859 = vmatpush1.bf16.msra.mxu1 %v5194_v6 }
 0x244   :  { %3829 = vmatprep.subr.bf16.mxu0 %v5038_v21  ;;  %3861 = vmatprep.subr.bf16.mxu1 %v5197_v7 }
 0x247   :  { %3831 = vmatpush1.bf16.msra.mxu0 %v5054_v26  ;;  %3863 = vmatpush1.bf16.msra.mxu1 %v5212_v16 }
 0x248   :  { %3833 = vmatprep.subr.bf16.mxu0 %v5058_v27  ;;  %3865 = vmatprep.subr.bf16.mxu1 %v5215_v17 }
 0x24b   :  { %3835 = vmatpush1.bf16.msra.mxu0 %v5074_v32  ;;  %3867 = vmatpush1.bf16.msra.mxu1 %v5230_v24 }
 0x24c   :  { %3837 = vmatprep.subr.bf16.mxu0 %v5078_v33  ;;  %3869 = vmatprep.subr.bf16.mxu1 %v5233_v25 }
 0x24f   :  { %3839 = vmatpush1.bf16.msra.mxu0 %v5094_v38  ;;  %3871 = vmatpush1.bf16.msra.mxu1 %v5248_v34 }
 0x250   :  { %3841 = vmatprep.subr.bf16.mxu0 %v5098_v39  ;;  %3873 = vmatprep.subr.bf16.mxu1 %v5251_v35 }
 0x253   :  { %3843 = vmatpush1.bf16.msra.mxu0 %v5114_v44  ;;  %3875 = vmatpush1.bf16.msra.mxu1 %v5266_v42 }
 0x254   :  { %3845 = vmatprep.subr.bf16.mxu0 %v5118_v45  ;;  %3877 = vmatprep.subr.bf16.mxu1 %v5269_v43 }
 0x257   :  { %3847 = vmatpush1.bf16.msra.mxu0 %v5134_v50  ;;  %3879 = vmatpush1.bf16.msra.mxu1 %v5278_v48 }
 0x258   :  { %3881 = vmatprep.subr.bf16.mxu0 %v4984_v4  ;;  %3913 = vmatprep.subr.bf16.mxu1 %v5138_v51 }
 0x30d   :  { %v505_v49 = vpop.f32.mrb[2].mxu0  ;;  %v576_v52 = vpop.f32.mrb[6].mxu1 }
 0x30e   :  { %v581_v53 = vadd.f32 %v505_v49, %v435_v37  ;;  %v507_v54 = vpop.f32.mrb[3].mxu0  ;;  %v578_v55 = vpop.f32.mrb[7].mxu1  ;;  %v583_v0 = vadd.f32 %v576_v52, %v437_v61  ;;  %v610_v37 = vld [vmem:[%s6730_s0 + $0x68] sm:$0xff] }
 0x30f   :  { %v582_v58 = vadd.f32 %v507_v54, %v436_v47  ;;  %v584_v2 = vadd.f32 %v578_v55, %v438_v1 }
 0x310   :  { %v3582_v59 = vmul.f32 -1.442695, %v581_v53  ;;  %v3584_v5 = vmul.f32 -1.442695, %v583_v0  ;;  %v612_v0 = vld [vmem:[%s6730_s0 + $0x78] sm:$0xff] }
 0x311   :  { %v3583_v60 = vmul.f32 -1.442695, %v582_v58 }
 0x312   :  { %4713 = vpow2.f32 %v3582_v59 }
 0x313   :  { %4715 = vpow2.f32 %v3583_v60  ;;  %v611_v60 = vld [vmem:[%s6730_s0 + $0x70] sm:$0xff] }
 0x314   :  { %4717 = vtanh.f32 %v584_v2 }
 0x315   :  { %4719 = vpow2.f32 %v3584_v5 }
 0x31c   :  { %v4714_v10 = vpop.eup %4713 }
 0x31d   :  { %v594_v11 = vadd.f32 1.0, %v4714_v10  ;;  %v4716_v12 = vpop.eup %4715 }
 0x31e   :  { %v595_v13 = vadd.f32 1.0, %v4716_v12  ;;  %v4718_v18 = vpop.eup %4717 }
 0x31f   :  { %4721 = vrcp.f32 %v594_v11  ;;  %v4720_v19 = vpop.eup %4719 }
 0x320   :  { %4723 = vrcp.f32 %v595_v13  ;;  %v596_v29 = vadd.f32 1.0, %v4720_v19 }
 0x322   :  { %4725 = vrcp.f32 %v596_v29 }
 0x329   :  { %v4722_v22 = vpop.eup %4721 }
 0x32a   :  { %v605_v23 = vmul.f32 %v4722_v22, %v4718_v18  ;;  %v4724_v28 = vpop.eup %4723 }
 0x32b   :  { %v604_v30 = vmul.f32 %v4724_v28, %v5363_v36  ;;  %v609_v36 = vld [vmem:[%s6730_s0 + $0x60] sm:$0xff] }
 0x32c   :  { %v4726_v40 = vpop.eup %4725 }
 0x32d   :  { %v5413_v31 = vadd.f32 %v605_v23, %v604_v30 }
 0x32f   :  { %4727 = vtanh.f32 %v5413_v31 }
 0x339   :  { %v4728_v41 = vpop.eup %4727 }
 0x33a   :  { %v608_v46 = vmul.f32 %v4728_v41, %v4726_v40 }
 0x33c   :  { %678 = vmatmul.mubr.f32.vlgmr.msra.gmra.mrb[4].mxu0 %v608_v46  ;;  %749 = vmatmul.mubr.f32.vlgmr.msra.gmra.mrb[8].mxu1 %v608_v46 }
 0x33d   :  { %3883 = vmatpush1.bf16.msra.mxu0 %v4995_v8  ;;  %3915 = vmatpush1.bf16.msra.mxu1 %v5154_v56 }
 0x33e   :  { %3885 = vmatprep.subr.bf16.mxu0 %v4997_v9  ;;  %3917 = vmatprep.subr.bf16.mxu1 %v5158_v57 }
 0x33f   :  { %851 = vmatprep.mubr.f32.mxu0 %v4937_v3  ;;  %922 = vmatprep.mubr.f32.mxu1 %v4937_v3 }
 0x341   :  { %3887 = vmatpush1.bf16.msra.mxu0 %v5014_v14  ;;  %3919 = vmatpush1.bf16.msra.mxu1 %v5175_v62 }
 0x342   :  { %3889 = vmatprep.subr.bf16.mxu0 %v5018_v15  ;;  %3921 = vmatprep.subr.bf16.mxu1 %v5179_v63 }
 0x345   :  { %3891 = vmatpush1.bf16.msra.mxu0 %v5034_v20  ;;  %3923 = vmatpush1.bf16.msra.mxu1 %v5194_v6 }
 0x346   :  { %3893 = vmatprep.subr.bf16.mxu0 %v5038_v21  ;;  %3925 = vmatprep.subr.bf16.mxu1 %v5197_v7 }
 0x349   :  { %3895 = vmatpush1.bf16.msra.mxu0 %v5054_v26  ;;  %3927 = vmatpush1.bf16.msra.mxu1 %v5212_v16 }
 0x34a   :  { %3897 = vmatprep.subr.bf16.mxu0 %v5058_v27  ;;  %3929 = vmatprep.subr.bf16.mxu1 %v5215_v17 }
 0x34d   :  { %3899 = vmatpush1.bf16.msra.mxu0 %v5074_v32  ;;  %3931 = vmatpush1.bf16.msra.mxu1 %v5230_v24 }
 0x34e   :  { %3901 = vmatprep.subr.bf16.mxu0 %v5078_v33  ;;  %3933 = vmatprep.subr.bf16.mxu1 %v5233_v25 }
 0x351   :  { %3903 = vmatpush1.bf16.msra.mxu0 %v5094_v38  ;;  %3935 = vmatpush1.bf16.msra.mxu1 %v5248_v34 }
 0x352   :  { %3905 = vmatprep.subr.bf16.mxu0 %v5098_v39  ;;  %3937 = vmatprep.subr.bf16.mxu1 %v5251_v35 }
 0x355   :  { %3907 = vmatpush1.bf16.msra.mxu0 %v5114_v44  ;;  %3939 = vmatpush1.bf16.msra.mxu1 %v5266_v42 }
 0x356   :  { %3909 = vmatprep.subr.bf16.mxu0 %v5118_v45  ;;  %3941 = vmatprep.subr.bf16.mxu1 %v5269_v43 }
 0x359   :  { %3911 = vmatpush1.bf16.msra.mxu0 %v5134_v50  ;;  %3943 = vmatpush1.bf16.msra.mxu1 %v5278_v48 }
 0x35a   :  { %3945 = vmatprep.subr.bf16.mxu0 %v4984_v4  ;;  %3977 = vmatprep.subr.bf16.mxu1 %v5138_v51 }
 0x40f   :  { %v679_v47 = vpop.f32.mrb[4].mxu0  ;;  %v750_v49 = vpop.f32.mrb[8].mxu1 }
 0x410   :  { %v755_v52 = vadd.f32 %v679_v47, %v609_v36  ;;  %v681_v53 = vpop.f32.mrb[5].mxu0  ;;  %v752_v54 = vpop.f32.mrb[9].mxu1  ;;  %v757_v61 = vadd.f32 %v750_v49, %v611_v60  ;;  %v784_v36 = vld [vmem:[%s6730_s0 + $0x88] sm:$0xff] }
 0x411   :  { %v756_v55 = vadd.f32 %v681_v53, %v610_v37  ;;  %v758_v1 = vadd.f32 %v752_v54, %v612_v0 }
 0x412   :  { %v3585_v58 = vmul.f32 -1.442695, %v755_v52  ;;  %v3587_v2 = vmul.f32 -1.442695, %v757_v61  ;;  %v786_v61 = vld [vmem:[%s6730_s0 + $0x98] sm:$0xff] }
 0x413   :  { %v3586_v59 = vmul.f32 -1.442695, %v756_v55 }
 0x414   :  { %4729 = vpow2.f32 %v3585_v58 }
 0x415   :  { %4731 = vpow2.f32 %v3586_v59  ;;  %v785_v59 = vld [vmem:[%s6730_s0 + $0x90] sm:$0xff] }
 0x416   :  { %4733 = vtanh.f32 %v758_v1 }
 0x417   :  { %4735 = vpow2.f32 %v3587_v2 }
 0x41e   :  { %v4730_v5 = vpop.eup %4729 }
 0x41f   :  { %v768_v10 = vadd.f32 1.0, %v4730_v5  ;;  %v4732_v11 = vpop.eup %4731 }
 0x420   :  { %v769_v12 = vadd.f32 1.0, %v4732_v11  ;;  %v4734_v13 = vpop.eup %4733 }
 0x421   :  { %4737 = vrcp.f32 %v768_v10  ;;  %v4736_v18 = vpop.eup %4735 }
 0x422   :  { %4739 = vrcp.f32 %v769_v12  ;;  %v770_v28 = vadd.f32 1.0, %v4736_v18 }
 0x424   :  { %4741 = vrcp.f32 %v770_v28 }
 0x42b   :  { %v4738_v19 = vpop.eup %4737 }
 0x42c   :  { %v779_v22 = vmul.f32 %v4738_v19, %v4734_v13  ;;  %v4740_v23 = vpop.eup %4739 }
 0x42d   :  { %v778_v29 = vmul.f32 %v4740_v23, %v5413_v31  ;;  %v783_v31 = vld [vmem:[%s6730_s0 + $0x80] sm:$0xff] }
 0x42e   :  { %v4742_v40 = vpop.eup %4741 }
 0x42f   :  { %v5463_v30 = vadd.f32 %v779_v22, %v778_v29 }
 0x431   :  { %4743 = vtanh.f32 %v5463_v30 }
 0x43b   :  { %v4744_v41 = vpop.eup %4743 }
 0x43c   :  { %v782_v46 = vmul.f32 %v4744_v41, %v4742_v40 }
 0x43e   :  { %852 = vmatmul.mubr.f32.vlgmr.msra.gmra.mrb[6].mxu0 %v782_v46  ;;  %923 = vmatmul.mubr.f32.vlgmr.msra.gmra.mrb[10].mxu1 %v782_v46 }
 0x43f   :  { %3947 = vmatpush1.bf16.msra.mxu0 %v4995_v8  ;;  %3979 = vmatpush1.bf16.msra.mxu1 %v5154_v56 }
 0x440   :  { %3949 = vmatprep.subr.bf16.mxu0 %v4997_v9  ;;  %3981 = vmatprep.subr.bf16.mxu1 %v5158_v57 }
 0x441   :  { %1025 = vmatprep.mubr.f32.mxu0 %v4937_v3  ;;  %1096 = vmatprep.mubr.f32.mxu1 %v4937_v3 }
 0x443   :  { %3951 = vmatpush1.bf16.msra.mxu0 %v5014_v14  ;;  %3983 = vmatpush1.bf16.msra.mxu1 %v5175_v62 }
 0x444   :  { %3953 = vmatprep.subr.bf16.mxu0 %v5018_v15  ;;  %3985 = vmatprep.subr.bf16.mxu1 %v5179_v63 }
 0x447   :  { %3955 = vmatpush1.bf16.msra.mxu0 %v5034_v20  ;;  %3987 = vmatpush1.bf16.msra.mxu1 %v5194_v6 }
 0x448   :  { %3957 = vmatprep.subr.bf16.mxu0 %v5038_v21  ;;  %3989 = vmatprep.subr.bf16.mxu1 %v5197_v7 }
 0x44b   :  { %3959 = vmatpush1.bf16.msra.mxu0 %v5054_v26  ;;  %3991 = vmatpush1.bf16.msra.mxu1 %v5212_v16 }
 0x44c   :  { %3961 = vmatprep.subr.bf16.mxu0 %v5058_v27  ;;  %3993 = vmatprep.subr.bf16.mxu1 %v5215_v17 }
 0x44f   :  { %3963 = vmatpush1.bf16.msra.mxu0 %v5074_v32  ;;  %3995 = vmatpush1.bf16.msra.mxu1 %v5230_v24 }
 0x450   :  { %3965 = vmatprep.subr.bf16.mxu0 %v5078_v33  ;;  %3997 = vmatprep.subr.bf16.mxu1 %v5233_v25 }
 0x453   :  { %3967 = vmatpush1.bf16.msra.mxu0 %v5094_v38  ;;  %3999 = vmatpush1.bf16.msra.mxu1 %v5248_v34 }
 0x454   :  { %3969 = vmatprep.subr.bf16.mxu0 %v5098_v39  ;;  %4001 = vmatprep.subr.bf16.mxu1 %v5251_v35 }
 0x457   :  { %3971 = vmatpush1.bf16.msra.mxu0 %v5114_v44  ;;  %4003 = vmatpush1.bf16.msra.mxu1 %v5266_v42 }
 0x458   :  { %3973 = vmatprep.subr.bf16.mxu0 %v5118_v45  ;;  %4005 = vmatprep.subr.bf16.mxu1 %v5269_v43 }
 0x45b   :  { %3975 = vmatpush1.bf16.msra.mxu0 %v5134_v50  ;;  %4007 = vmatpush1.bf16.msra.mxu1 %v5278_v48 }
 0x45c   :  { %4009 = vmatprep.subr.bf16.mxu0 %v4984_v4  ;;  %4041 = vmatprep.subr.bf16.mxu1 %v5138_v51 }
 0x511   :  { %v853_v37 = vpop.f32.mrb[6].mxu0  ;;  %v924_v47 = vpop.f32.mrb[10].mxu1 }
 0x512   :  { %v929_v49 = vadd.f32 %v853_v37, %v783_v31  ;;  %v855_v52 = vpop.f32.mrb[7].mxu0  ;;  %v926_v53 = vpop.f32.mrb[11].mxu1  ;;  %v931_v60 = vadd.f32 %v924_v47, %v785_v59  ;;  %v958_v31 = vld [vmem:[%s6730_s0 + $0xa8] sm:$0xff] }
 0x513   :  { %v930_v54 = vadd.f32 %v855_v52, %v784_v36  ;;  %v932_v0 = vadd.f32 %v926_v53, %v786_v61 }
 0x514   :  { %v3588_v55 = vmul.f32 -1.442695, %v929_v49  ;;  %v3590_v1 = vmul.f32 -1.442695, %v931_v60 }
 0x515   :  { %v3589_v58 = vmul.f32 -1.442695, %v930_v54 }
 0x516   :  { %4745 = vpow2.f32 %v3588_v55 }
 0x517   :  { %4747 = vpow2.f32 %v3589_v58  ;;  %v960_v58 = vld [vmem:[%s6730_s0 + $0xb8] sm:$0xff] }
 0x518   :  { %4749 = vtanh.f32 %v932_v0 }
 0x519   :  { %4751 = vpow2.f32 %v3590_v1 }
 0x520   :  { %v4746_v2 = vpop.eup %4745 }
 0x521   :  { %v942_v5 = vadd.f32 1.0, %v4746_v2  ;;  %v4748_v10 = vpop.eup %4747 }
 0x522   :  { %v943_v11 = vadd.f32 1.0, %v4748_v10  ;;  %v4750_v12 = vpop.eup %4749 }
 0x523   :  { %4753 = vrcp.f32 %v942_v5  ;;  %v4752_v13 = vpop.eup %4751 }
 0x524   :  { %4755 = vrcp.f32 %v943_v11  ;;  %v944_v23 = vadd.f32 1.0, %v4752_v13 }
 0x526   :  { %4757 = vrcp.f32 %v944_v23 }
 0x52d   :  { %v4754_v18 = vpop.eup %4753 }
 0x52e   :  { %v953_v19 = vmul.f32 %v4754_v18, %v4750_v12  ;;  %v4756_v22 = vpop.eup %4755 }
 0x52f   :  { %v952_v28 = vmul.f32 %v4756_v22, %v5463_v30  ;;  %v957_v30 = vld [vmem:[%s6730_s0 + $0xa0] sm:$0xff] }
 0x530   :  { %v4758_v40 = vpop.eup %4757 }
 0x531   :  { %v5513_v29 = vadd.f32 %v953_v19, %v952_v28 }
 0x533   :  { %4759 = vtanh.f32 %v5513_v29 }
 0x53d   :  { %v4760_v41 = vpop.eup %4759 }
 0x53e   :  { %v956_v46 = vmul.f32 %v4760_v41, %v4758_v40  ;;  %v1488_v41 = vld [vmem:[%s6731_s3 + $0x28] sm:$0xff] }
 0x540   :  { %1026 = vmatmul.mubr.f32.vlgmr.msra.gmra.mrb[8].mxu0 %v956_v46  ;;  %1097 = vmatmul.mubr.f32.vlgmr.msra.gmra.mrb[12].mxu1 %v956_v46  ;;  %v1486_v46 = vld [vmem:[%s6731_s3 + $0x18] sm:$0xff] }
 0x541   :  { %4011 = vmatpush1.bf16.msra.mxu0 %v4995_v8  ;;  %4043 = vmatpush1.bf16.msra.mxu1 %v5154_v56 }
 0x542   :  { %4013 = vmatprep.subr.bf16.mxu0 %v4997_v9  ;;  %4045 = vmatprep.subr.bf16.mxu1 %v5158_v57 }
 0x543   :  { %1199 = vmatprep.mubr.f32.mxu0 %v4937_v3  ;;  %1270 = vmatprep.mubr.f32.mxu1 %v4937_v3 }
 0x545   :  { %4015 = vmatpush1.bf16.msra.mxu0 %v5014_v14  ;;  %4047 = vmatpush1.bf16.msra.mxu1 %v5175_v62 }
 0x546   :  { %4017 = vmatprep.subr.bf16.mxu0 %v5018_v15  ;;  %4049 = vmatprep.subr.bf16.mxu1 %v5179_v63 }
 0x549   :  { %4019 = vmatpush1.bf16.msra.mxu0 %v5034_v20  ;;  %4051 = vmatpush1.bf16.msra.mxu1 %v5194_v6 }
 0x54a   :  { %4021 = vmatprep.subr.bf16.mxu0 %v5038_v21  ;;  %4053 = vmatprep.subr.bf16.mxu1 %v5197_v7 }
 0x54d   :  { %4023 = vmatpush1.bf16.msra.mxu0 %v5054_v26  ;;  %4055 = vmatpush1.bf16.msra.mxu1 %v5212_v16 }
 0x54e   :  { %4025 = vmatprep.subr.bf16.mxu0 %v5058_v27  ;;  %4057 = vmatprep.subr.bf16.mxu1 %v5215_v17 }
 0x551   :  { %4027 = vmatpush1.bf16.msra.mxu0 %v5074_v32  ;;  %4059 = vmatpush1.bf16.msra.mxu1 %v5230_v24 }
 0x552   :  { %4029 = vmatprep.subr.bf16.mxu0 %v5078_v33  ;;  %4061 = vmatprep.subr.bf16.mxu1 %v5233_v25 }
 0x555   :  { %4031 = vmatpush1.bf16.msra.mxu0 %v5094_v38  ;;  %4063 = vmatpush1.bf16.msra.mxu1 %v5248_v34 }
 0x556   :  { %4033 = vmatprep.subr.bf16.mxu0 %v5098_v39  ;;  %4065 = vmatprep.subr.bf16.mxu1 %v5251_v35 }
 0x559   :  { %4035 = vmatpush1.bf16.msra.mxu0 %v5114_v44  ;;  %4067 = vmatpush1.bf16.msra.mxu1 %v5266_v42 }
 0x55a   :  { %4037 = vmatprep.subr.bf16.mxu0 %v5118_v45  ;;  %4069 = vmatprep.subr.bf16.mxu1 %v5269_v43 }
 0x55d   :  { %4039 = vmatpush1.bf16.msra.mxu0 %v5134_v50  ;;  %4071 = vmatpush1.bf16.msra.mxu1 %v5278_v48 }
 0x55e   :  { %4073 = vmatprep.subr.bf16.mxu0 %v4984_v4  ;;  %4105 = vmatprep.subr.bf16.mxu1 %v5138_v51  ;;  %v959_v4 = vld [vmem:[%s6730_s0 + $0xb0] sm:$0xff] }
 0x613   :  { %v1027_v36 = vpop.f32.mrb[8].mxu0  ;;  %v1098_v37 = vpop.f32.mrb[12].mxu1 }
 0x614   :  { %v1103_v47 = vadd.f32 %v1027_v36, %v957_v30  ;;  %v1029_v49 = vpop.f32.mrb[9].mxu0  ;;  %v1100_v52 = vpop.f32.mrb[13].mxu1  ;;  %v1105_v51 = vadd.f32 %v1098_v37, %v959_v4  ;;  %v1483_v36 = vld [vmem:[%s6731_s3] sm:$0xff]  ;;  %v1496_v4 = vld [vmem:[%s6731_s3 + $0x68] sm:$0xff] }
 0x615   :  { %v1104_v53 = vadd.f32 %v1029_v49, %v958_v31  ;;  %v1106_v59 = vadd.f32 %v1100_v52, %v960_v58  ;;  %v1490_v31 = vld [vmem:[%s6731_s3 + $0x38] sm:$0xff]  ;;  %v1487_v37 = vld [vmem:[%s6731_s3 + $0x20] sm:$0xff]  ;;  %v1485_v52 = vld [vmem:[%s6731_s3 + $0x10] sm:$0xff] }
 0x616   :  { %v3591_v54 = vmul.f32 -1.442695, %v1103_v47  ;;  %v3593_v60 = vmul.f32 -1.442695, %v1105_v51  ;;  %v5636_v47 = vpack.c.bf16 %v1490_v31, %v1486_v46  ;;  %v5638_v49 = vpack.c.bf16 %v1487_v37, %v1483_v36  ;;  %v1494_v51 = vld [vmem:[%s6731_s3 + $0x58] sm:$0xff]  ;;  %v1523_v31 = vld [vmem:[%s6731_s3 + $0x140] sm:$0xff] }
 0x617   :  { %v3592_v55 = vmul.f32 -1.442695, %v1104_v53  ;;  %v1489_v53 = vld [vmem:[%s6731_s3 + $0x30] sm:$0xff]  ;;  %v1530_v46 = vld [vmem:[%s6731_s3 + $0x178] sm:$0xff]  ;;  %v1527_v36 = vld [vmem:[%s6731_s3 + $0x160] sm:$0xff] }
 0x618   :  { %4761 = vpow2.f32 %v3591_v54  ;;  %v5647_v54 = vpack.c.bf16 %v1489_v53, %v1485_v52  ;;  %v5818_v52 = vpack.c.bf16 %v1527_v36, %v1523_v31  ;;  %v1525_v53 = vld [vmem:[%s6731_s3 + $0x150] sm:$0xff] }
 0x619   :  { %4763 = vpow2.f32 %v3592_v55  ;;  %v1492_v55 = vld [vmem:[%s6731_s3 + $0x48] sm:$0xff]  ;;  %v1307_v31 = vld [vmem:[%s6730_s0 + $0xf0] sm:$0xff] }
 0x61a   :  { %4765 = vtanh.f32 %v1106_v59  ;;  %v5661_v58 = vpack.c.bf16 %v1496_v4, %v1492_v55  ;;  %v1498_v59 = vld [vmem:[%s6731_s3 + $0x78] sm:$0xff]  ;;  %v1529_v55 = vld [vmem:[%s6731_s3 + $0x170] sm:$0xff]  ;;  %v1532_v4 = vld [vmem:[%s6731_s3 + $0x188] sm:$0xff] }
 0x61b   :  { %4767 = vpow2.f32 %v3593_v60  ;;  %v1491_v60 = vld [vmem:[%s6731_s3 + $0x40] sm:$0xff] }
 0x622   :  { %v4762_v61 = vpop.eup %4761 }
 0x623   :  { %v1116_v0 = vadd.f32 1.0, %v4762_v61  ;;  %v4764_v1 = vpop.eup %4763  ;;  %v1495_v61 = vld [vmem:[%s6731_s3 + $0x60] sm:$0xff] }
 0x624   :  { %v1117_v2 = vadd.f32 1.0, %v4764_v1  ;;  %v4766_v5 = vpop.eup %4765  ;;  %v5674_v1 = vpack.c.bf16 %v1495_v61, %v1491_v60  ;;  %v1534_v60 = vld [vmem:[%s6731_s3 + $0x198] sm:$0xff] }
 0x625   :  { %4769 = vrcp.f32 %v1116_v0  ;;  %v4768_v10 = vpop.eup %4767  ;;  %v5672_v0 = vpack.c.bf16 %v1498_v59, %v1494_v51  ;;  %v5830_v51 = vpack.c.bf16 %v1529_v55, %v1525_v53  ;;  %v1536_v59 = vld [vmem:[%s6731_s3 + $0x1a8] sm:$0xff]  ;;  %v1538_v61 = vld [vmem:[%s6731_s3 + $0x1b8] sm:$0xff] }
 0x626   :  { %4771 = vrcp.f32 %v1117_v2  ;;  %v1118_v18 = vadd.f32 1.0, %v4768_v10  ;;  %v1493_v2 = vld [vmem:[%s6731_s3 + $0x50] sm:$0xff]  ;;  %v1308_v53 = vld [vmem:[%s6730_s0 + $0xf8] sm:$0xff] }
 0x628   :  { %4773 = vrcp.f32 %v1118_v18 }
 0x62f   :  { %v4770_v11 = vpop.eup %4769 }
 0x630   :  { %v1127_v12 = vmul.f32 %v4770_v11, %v4766_v5  ;;  %v4772_v13 = vpop.eup %4771  ;;  %v1497_v5 = vld [vmem:[%s6731_s3 + $0x70] sm:$0xff]  ;;  %v1500_v11 = vld [vmem:[%s6731_s3 + $0x88] sm:$0xff] }
 0x631   :  { %v1126_v19 = vmul.f32 %v4772_v13, %v5513_v29  ;;  %v1484_v29 = vld [vmem:[%s6731_s3 + $0x8] sm:$0xff]  ;;  %v5683_v10 = vpack.c.bf16 %v1497_v5, %v1493_v2  ;;  %v1502_v13 = vld [vmem:[%s6731_s3 + $0x98] sm:$0xff]  ;;  %v5843_v2 = vpack.c.bf16 %v1536_v59, %v1532_v4  ;;  %v5845_v5 = vpack.c.bf16 %v1538_v61, %v1534_v60 }
 0x632   :  { %v4774_v23 = vpop.eup %4773  ;;  %v5625_v30 = vpack.c.bf16 %v1488_v41, %v1484_v29  ;;  %v1526_v29 = vld [vmem:[%s6731_s3 + $0x158] sm:$0xff] }
 0x633   :  { %v5563_v22 = vadd.f32 %v1127_v12, %v1126_v19  ;;  %v1504_v12 = vld [vmem:[%s6731_s3 + $0xa8] sm:$0xff]  ;;  %v1506_v19 = vld [vmem:[%s6731_s3 + $0xb8] sm:$0xff]  ;;  %v5816_v37 = vpack.c.bf16 %v1530_v46, %v1526_v29 }
 0x634   :  { %v5697_v18 = vpack.c.bf16 %v1504_v12, %v1500_v11  ;;  %v1531_v11 = vld [vmem:[%s6731_s3 + $0x180] sm:$0xff] }
 0x635   :  { %4775 = vtanh.f32 %v5563_v22  ;;  %v1535_v12 = vld [vmem:[%s6731_s3 + $0x1a0] sm:$0xff] }
 0x63f   :  { %v4776_v28 = vpop.eup %4775 }
 0x640   :  { %v1130_v40 = vmul.f32 %v4776_v28, %v4774_v23  ;;  %v1503_v23 = vld [vmem:[%s6731_s3 + $0xa0] sm:$0xff]  ;;  %v5708_v28 = vpack.c.bf16 %v1506_v19, %v1502_v13  ;;  %v1533_v13 = vld [vmem:[%s6731_s3 + $0x190] sm:$0xff]  ;;  %v5857_v19 = vpack.c.bf16 %v1535_v12, %v1531_v11 }
 0x642   :  { %1200 = vmatmul.mubr.f32.vlgmr.msra.gmra.mrb[10].mxu0 %v1130_v40  ;;  %1271 = vmatmul.mubr.f32.vlgmr.msra.gmra.mrb[14].mxu1 %v1130_v40 }
 0x643   :  { %4075 = vmatpush1.bf16.msra.mxu0 %v4995_v8  ;;  %4107 = vmatpush1.bf16.msra.mxu1 %v5154_v56  ;;  %v1131_v8 = vld [vmem:[%s6730_s0 + $0xc0] sm:$0xff] }
 0x644   :  { %4077 = vmatprep.subr.bf16.mxu0 %v4997_v9  ;;  %4109 = vmatprep.subr.bf16.mxu1 %v5158_v57  ;;  %v1132_v9 = vld [vmem:[%s6730_s0 + $0xc8] sm:$0xff] }
 0x645   :  { %1373 = vmatprep.mubr.f32.mxu0 %v4937_v3  ;;  %1444 = vmatprep.mubr.f32.mxu1 %v4937_v3 }
 0x647   :  { %4079 = vmatpush1.bf16.msra.mxu0 %v5014_v14  ;;  %4111 = vmatpush1.bf16.msra.mxu1 %v5175_v62 }
 0x648   :  { %4081 = vmatprep.subr.bf16.mxu0 %v5018_v15  ;;  %4113 = vmatprep.subr.bf16.mxu1 %v5179_v63 }
 0x64b   :  { %4083 = vmatpush1.bf16.msra.mxu0 %v5034_v20  ;;  %4115 = vmatpush1.bf16.msra.mxu1 %v5194_v6 }
 0x64c   :  { %4085 = vmatprep.subr.bf16.mxu0 %v5038_v21  ;;  %4117 = vmatprep.subr.bf16.mxu1 %v5197_v7 }
 0x64f   :  { %4087 = vmatpush1.bf16.msra.mxu0 %v5054_v26  ;;  %4119 = vmatpush1.bf16.msra.mxu1 %v5212_v16 }
 0x650   :  { %4089 = vmatprep.subr.bf16.mxu0 %v5058_v27  ;;  %4121 = vmatprep.subr.bf16.mxu1 %v5215_v17 }
 0x653   :  { %4091 = vmatpush1.bf16.msra.mxu0 %v5074_v32  ;;  %4123 = vmatpush1.bf16.msra.mxu1 %v5230_v24 }
 0x654   :  { %4093 = vmatprep.subr.bf16.mxu0 %v5078_v33  ;;  %4125 = vmatprep.subr.bf16.mxu1 %v5233_v25 }
 0x657   :  { %4095 = vmatpush1.bf16.msra.mxu0 %v5094_v38  ;;  %4127 = vmatpush1.bf16.msra.mxu1 %v5248_v34  ;;  %v1133_v38 = vld [vmem:[%s6730_s0 + $0xd0] sm:$0xff] }
 0x658   :  { %4097 = vmatprep.subr.bf16.mxu0 %v5098_v39  ;;  %4129 = vmatprep.subr.bf16.mxu1 %v5251_v35 }
 0x65b   :  { %4099 = vmatpush1.bf16.msra.mxu0 %v5114_v44  ;;  %4131 = vmatpush1.bf16.msra.mxu1 %v5266_v42  ;;  %v1134_v44 = vld [vmem:[%s6730_s0 + $0xd8] sm:$0xff] }
 0x65c   :  { %4101 = vmatprep.subr.bf16.mxu0 %v5118_v45  ;;  %4133 = vmatprep.subr.bf16.mxu1 %v5269_v43 }
 0x65f   :  { %4103 = vmatpush1.bf16.msra.mxu0 %v5134_v50  ;;  %4135 = vmatpush1.bf16.msra.mxu1 %v5278_v48 }
 0x660   :  { %4137 = vmatprep.subr.bf16.mxu0 %v5625_v30  ;;  %4169 = vmatprep.subr.bf16.mxu1 %v5636_v47 }
 0x715   :  { %v1201_v14 = vpop.f32.mrb[10].mxu0  ;;  %v1272_v15 = vpop.f32.mrb[14].mxu1 }
 0x716   :  { %v1277_v20 = vadd.f32 %v1201_v14, %v1131_v8  ;;  %v1203_v21 = vpop.f32.mrb[11].mxu0  ;;  %v1274_v26 = vpop.f32.mrb[15].mxu1  ;;  %v1279_v39 = vadd.f32 %v1272_v15, %v1133_v38  ;;  %v1501_v8 = vld [vmem:[%s6731_s3 + $0x90] sm:$0xff]  ;;  %v1508_v15 = vld [vmem:[%s6731_s3 + $0xc8] sm:$0xff] }
 0x717   :  { %v1278_v27 = vadd.f32 %v1203_v21, %v1132_v9  ;;  %v1280_v45 = vadd.f32 %v1274_v26, %v1134_v44  ;;  %v1505_v9 = vld [vmem:[%s6731_s3 + $0xb0] sm:$0xff]  ;;  %v1510_v21 = vld [vmem:[%s6731_s3 + $0xd8] sm:$0xff] }
 0x718   :  { %v3594_v32 = vmul.f32 -1.442695, %v1277_v20  ;;  %v3596_v50 = vmul.f32 -1.442695, %v1279_v39  ;;  %v5719_v14 = vpack.c.bf16 %v1505_v9, %v1501_v8  ;;  %v1512_v20 = vld [vmem:[%s6731_s3 + $0xe8] sm:$0xff]  ;;  %v1509_v44 = vld [vmem:[%s6731_s3 + $0xd0] sm:$0xff] }
 0x719   :  { %v3595_v33 = vmul.f32 -1.442695, %v1278_v27  ;;  %v5733_v26 = vpack.c.bf16 %v1512_v20, %v1508_v15  ;;  %v1514_v27 = vld [vmem:[%s6731_s3 + $0xf8] sm:$0xff]  ;;  %v1544_v8 = vld [vmem:[%s6731_s3 + $0x1e8] sm:$0xff] }
 0x71a   :  { %4777 = vpow2.f32 %v3594_v32  ;;  %v1507_v32 = vld [vmem:[%s6731_s3 + $0xc0] sm:$0xff]  ;;  %v5744_v38 = vpack.c.bf16 %v1514_v27, %v1510_v21  ;;  %v1542_v20 = vld [vmem:[%s6731_s3 + $0x1d8] sm:$0xff] }
 0x71b   :  { %4779 = vpow2.f32 %v3595_v33  ;;  %v1511_v33 = vld [vmem:[%s6731_s3 + $0xe0] sm:$0xff]  ;;  %v1546_v21 = vld [vmem:[%s6731_s3 + $0x1f8] sm:$0xff] }
 0x71c   :  { %4781 = vtanh.f32 %v1280_v45  ;;  %v5746_v39 = vpack.c.bf16 %v1511_v33, %v1507_v32  ;;  %v1513_v45 = vld [vmem:[%s6731_s3 + $0xf0] sm:$0xff]  ;;  %v1539_v27 = vld [vmem:[%s6731_s3 + $0x1c0] sm:$0xff]  ;;  %v5883_v32 = vpack.c.bf16 %v1546_v21, %v1542_v20 }
 0x71d   :  { %4783 = vpow2.f32 %v3596_v50  ;;  %v5755_v50 = vpack.c.bf16 %v1513_v45, %v1509_v44  ;;  %v1543_v33 = vld [vmem:[%s6731_s3 + $0x1e0] sm:$0xff]  ;;  %v1541_v44 = vld [vmem:[%s6731_s3 + $0x1d0] sm:$0xff] }
 0x71e   :  { %v1545_v45 = vld [vmem:[%s6731_s3 + $0x1f0] sm:$0xff] }
 0x724   :  { %v4778_v56 = vpop.eup %4777 }
 0x725   :  { %v1290_v57 = vadd.f32 1.0, %v4778_v56  ;;  %v4780_v62 = vpop.eup %4779  ;;  %v1516_v56 = vld [vmem:[%s6731_s3 + $0x108] sm:$0xff] }
 0x726   :  { %v1291_v63 = vadd.f32 1.0, %v4780_v62  ;;  %v4782_v6 = vpop.eup %4781  ;;  %v1518_v62 = vld [vmem:[%s6731_s3 + $0x118] sm:$0xff] }
 0x727   :  { %4785 = vrcp.f32 %v1290_v57  ;;  %v4784_v7 = vpop.eup %4783  ;;  %v1520_v57 = vld [vmem:[%s6731_s3 + $0x128] sm:$0xff] }
 0x728   :  { %4787 = vrcp.f32 %v1291_v63  ;;  %v1292_v25 = vadd.f32 1.0, %v4784_v7  ;;  %v5769_v63 = vpack.c.bf16 %v1520_v57, %v1516_v56  ;;  %v1515_v7 = vld [vmem:[%s6731_s3 + $0x100] sm:$0xff]  ;;  %v5895_v56 = vpack.c.bf16 %v1543_v33, %v1539_v27 }
 0x729   :  { %v5899_v57 = vpack.c.bf16 %v1545_v45, %v1541_v44 }
 0x72a   :  { %4789 = vrcp.f32 %v1292_v25  ;;  %v1517_v25 = vld [vmem:[%s6731_s3 + $0x110] sm:$0xff] }
 0x731   :  { %v4786_v16 = vpop.eup %4785 }
 0x732   :  { %v1301_v17 = vmul.f32 %v4786_v16, %v4782_v6  ;;  %v4788_v24 = vpop.eup %4787  ;;  %v1522_v6 = vld [vmem:[%s6731_s3 + $0x138] sm:$0xff]  ;;  %v1519_v16 = vld [vmem:[%s6731_s3 + $0x120] sm:$0xff] }
 0x733   :  { %v1300_v34 = vmul.f32 %v4788_v24, %v5563_v22  ;;  %v1499_v22 = vld [vmem:[%s6731_s3 + $0x80] sm:$0xff]  ;;  %v5782_v24 = vpack.c.bf16 %v1519_v16, %v1515_v7 }
 0x734   :  { %v4790_v42 = vpop.eup %4789  ;;  %v5710_v40 = vpack.c.bf16 %v1503_v23, %v1499_v22  ;;  %v1537_v22 = vld [vmem:[%s6731_s3 + $0x1b0] sm:$0xff]  ;;  %v1540_v23 = vld [vmem:[%s6731_s3 + $0x1c8] sm:$0xff] }
 0x735   :  { %v5611_v35 = vadd.f32 %v1301_v17, %v1300_v34  ;;  %v5780_v17 = vpack.c.bf16 %v1522_v6, %v1518_v62  ;;  %v1521_v34 = vld [vmem:[%s6731_s3 + $0x130] sm:$0xff]  ;;  %v5870_v9 = vpack.c.bf16 %v1537_v22, %v1533_v13  ;;  %v5872_v15 = vpack.c.bf16 %v1544_v8, %v1540_v23  ;;  %v1305_v62 = vld [vmem:[%s6730_s0 + $0xe0] sm:$0xff]  ;;  %v1306_v6 = vld [vmem:[%s6730_s0 + $0xe8] sm:$0xff] }
 0x737   :  { %4791 = vtanh.f32 %v5611_v35 }
 0x741   :  { %v4792_v43 = vpop.eup %4791 }
 0x742   :  { %v1304_v48 = vmul.f32 %v4792_v43, %v4790_v42  ;;  %v5791_v42 = vpack.c.bf16 %v1521_v34, %v1517_v25  ;;  %v1524_v43 = vld [vmem:[%s6731_s3 + $0x148] sm:$0xff] }
 0x744   :  { %1374 = vmatmul.mubr.f32.vlgmr.msra.gmra.mrb[12].mxu0 %v1304_v48  ;;  %1445 = vmatmul.mubr.f32.vlgmr.msra.gmra.mrb[16].mxu1 %v1304_v48  ;;  %v1528_v48 = vld [vmem:[%s6731_s3 + $0x168] sm:$0xff] }
 0x745   :  { %1611 = vmatprep.mubr.f32.mxu0 %v4937_v3  ;;  %1682 = vmatprep.mubr.f32.mxu1 %v4937_v3  ;;  %v5805_v41 = vpack.c.bf16 %v1528_v48, %v1524_v43 }
 0x746   :  { %4139 = vmatpush1.bf16.msra.mxu0 %v5638_v49  ;;  %4171 = vmatpush1.bf16.msra.mxu1 %v5647_v54 }
 0x747   :  { %4141 = vmatprep.subr.bf16.mxu0 %v5661_v58  ;;  %4173 = vmatprep.subr.bf16.mxu1 %v5672_v0 }
 0x74a   :  { %4143 = vmatpush1.bf16.msra.mxu0 %v5674_v1  ;;  %4175 = vmatpush1.bf16.msra.mxu1 %v5683_v10 }
 0x74b   :  { %4145 = vmatprep.subr.bf16.mxu0 %v5697_v18  ;;  %4177 = vmatprep.subr.bf16.mxu1 %v5708_v28 }
 0x74e   :  { %4147 = vmatpush1.bf16.msra.mxu0 %v5710_v40  ;;  %4179 = vmatpush1.bf16.msra.mxu1 %v5719_v14 }
 0x74f   :  { %4149 = vmatprep.subr.bf16.mxu0 %v5733_v26  ;;  %4181 = vmatprep.subr.bf16.mxu1 %v5744_v38 }
 0x752   :  { %4151 = vmatpush1.bf16.msra.mxu0 %v5746_v39  ;;  %4183 = vmatpush1.bf16.msra.mxu1 %v5755_v50 }
 0x753   :  { %4153 = vmatprep.subr.bf16.mxu0 %v5769_v63  ;;  %4185 = vmatprep.subr.bf16.mxu1 %v5780_v17 }
 0x756   :  { %4155 = vmatpush1.bf16.msra.mxu0 %v5782_v24  ;;  %4187 = vmatpush1.bf16.msra.mxu1 %v5791_v42 }
 0x757   :  { %4157 = vmatprep.subr.bf16.mxu0 %v5805_v41  ;;  %4189 = vmatprep.subr.bf16.mxu1 %v5816_v37 }
 0x75a   :  { %4159 = vmatpush1.bf16.msra.mxu0 %v5818_v52  ;;  %4191 = vmatpush1.bf16.msra.mxu1 %v5830_v51 }
 0x75b   :  { %4161 = vmatprep.subr.bf16.mxu0 %v5843_v2  ;;  %4193 = vmatprep.subr.bf16.mxu1 %v5845_v5 }
 0x75e   :  { %4163 = vmatpush1.bf16.msra.mxu0 %v5857_v19  ;;  %4195 = vmatpush1.bf16.msra.mxu1 %v5870_v9 }
 0x75f   :  { %4165 = vmatprep.subr.bf16.mxu0 %v5872_v15  ;;  %4197 = vmatprep.subr.bf16.mxu1 %v5883_v32 }
 0x762   :  { %4167 = vmatpush1.bf16.msra.mxu0 %v5895_v56  ;;  %4199 = vmatpush1.bf16.msra.mxu1 %v5899_v57 }
 0x763   :  { %4201 = vmatprep.subr.bf16.mxu0 %v5625_v30  ;;  %4233 = vmatprep.subr.bf16.mxu1 %v5636_v47 }
 0x817   :  { %v1375_v7 = vpop.f32.mrb[12].mxu0  ;;  %v1446_v16 = vpop.f32.mrb[16].mxu1 }
 0x818   :  { %v1451_v25 = vadd.f32 %v1375_v7, %v1305_v62  ;;  %v1377_v34 = vpop.f32.mrb[13].mxu0  ;;  %v1448_v43 = vpop.f32.mrb[17].mxu1  ;;  %v1453_v36 = vadd.f32 %v1446_v16, %v1307_v31  ;;  %v1480_v62 = vld [vmem:[%s6732_s1 + $0x8] sm:$0xff] }
 0x819   :  { %v1452_v48 = vadd.f32 %v1377_v34, %v1306_v6  ;;  %v1454_v55 = vadd.f32 %v1448_v43, %v1308_v53 }
 0x81a   :  { %v3597_v29 = vmul.f32 -1.442695, %v1451_v25  ;;  %v3599_v4 = vmul.f32 -1.442695, %v1453_v36  ;;  %v1482_v36 = vld [vmem:[%s6732_s1 + $0x18] sm:$0xff] }
 0x81b   :  { %v3598_v46 = vmul.f32 -1.442695, %v1452_v48 }
 0x81c   :  { %4793 = vpow2.f32 %v3597_v29 }
 0x81d   :  { %4795 = vpow2.f32 %v3598_v46  ;;  %v1481_v46 = vld [vmem:[%s6732_s1 + $0x10] sm:$0xff] }
 0x81e   :  { %4797 = vtanh.f32 %v1454_v55 }
 0x81f   :  { %4799 = vpow2.f32 %v3599_v4 }
 0x826   :  { %v4794_v59 = vpop.eup %4793 }
 0x827   :  { %v1464_v60 = vadd.f32 1.0, %v4794_v59  ;;  %v4796_v61 = vpop.eup %4795 }
 0x828   :  { %v1465_v11 = vadd.f32 1.0, %v4796_v61  ;;  %v4798_v12 = vpop.eup %4797 }
 0x829   :  { %4801 = vrcp.f32 %v1464_v60  ;;  %v4800_v13 = vpop.eup %4799 }
 0x82a   :  { %4803 = vrcp.f32 %v1465_v11  ;;  %v1466_v20 = vadd.f32 1.0, %v4800_v13 }
 0x82c   :  { %4805 = vrcp.f32 %v1466_v20 }
 0x833   :  { %v4802_v22 = vpop.eup %4801 }
 0x834   :  { %v1475_v23 = vmul.f32 %v4802_v22, %v4798_v12  ;;  %v4804_v8 = vpop.eup %4803 }
 0x835   :  { %v1474_v21 = vmul.f32 %v4804_v8, %v5611_v35  ;;  %v1479_v35 = vld [vmem:[%s6732_s1] sm:$0xff] }
 0x836   :  { %v4806_v33 = vpop.eup %4805 }
 0x837   :  { %v5919_v27 = vadd.f32 %v1475_v23, %v1474_v21 }
 0x839   :  { %4807 = vtanh.f32 %v5919_v27 }
 0x843   :  { %v4808_v44 = vpop.eup %4807 }
 0x844   :  { %v1478_v45 = vmul.f32 %v4808_v44, %v4806_v33 }
 0x846   :  { %1612 = vmatmul.mubr.f32.vlgmr.msra.gmra.mrb[14].mxu0 %v1478_v45  ;;  %1683 = vmatmul.mubr.f32.vlgmr.msra.gmra.mrb[18].mxu1 %v1478_v45 }
 0x847   :  { %4203 = vmatpush1.bf16.msra.mxu0 %v5638_v49  ;;  %4235 = vmatpush1.bf16.msra.mxu1 %v5647_v54 }
 0x848   :  { %4205 = vmatprep.subr.bf16.mxu0 %v5661_v58  ;;  %4237 = vmatprep.subr.bf16.mxu1 %v5672_v0 }
 0x849   :  { %1850 = vmatprep.mubr.f32.mxu0 %v4937_v3  ;;  %1921 = vmatprep.mubr.f32.mxu1 %v4937_v3 }
 0x84b   :  { %4207 = vmatpush1.bf16.msra.mxu0 %v5674_v1  ;;  %4239 = vmatpush1.bf16.msra.mxu1 %v5683_v10 }
 0x84c   :  { %4209 = vmatprep.subr.bf16.mxu0 %v5697_v18  ;;  %4241 = vmatprep.subr.bf16.mxu1 %v5708_v28 }
 0x84f   :  { %4211 = vmatpush1.bf16.msra.mxu0 %v5710_v40  ;;  %4243 = vmatpush1.bf16.msra.mxu1 %v5719_v14 }
 0x850   :  { %4213 = vmatprep.subr.bf16.mxu0 %v5733_v26  ;;  %4245 = vmatprep.subr.bf16.mxu1 %v5744_v38 }
 0x853   :  { %4215 = vmatpush1.bf16.msra.mxu0 %v5746_v39  ;;  %4247 = vmatpush1.bf16.msra.mxu1 %v5755_v50 }
 0x854   :  { %4217 = vmatprep.subr.bf16.mxu0 %v5769_v63  ;;  %4249 = vmatprep.subr.bf16.mxu1 %v5780_v17 }
 0x857   :  { %4219 = vmatpush1.bf16.msra.mxu0 %v5782_v24  ;;  %4251 = vmatpush1.bf16.msra.mxu1 %v5791_v42 }
 0x858   :  { %4221 = vmatprep.subr.bf16.mxu0 %v5805_v41  ;;  %4253 = vmatprep.subr.bf16.mxu1 %v5816_v37 }
 0x85b   :  { %4223 = vmatpush1.bf16.msra.mxu0 %v5818_v52  ;;  %4255 = vmatpush1.bf16.msra.mxu1 %v5830_v51 }
 0x85c   :  { %4225 = vmatprep.subr.bf16.mxu0 %v5843_v2  ;;  %4257 = vmatprep.subr.bf16.mxu1 %v5845_v5 }
 0x85f   :  { %4227 = vmatpush1.bf16.msra.mxu0 %v5857_v19  ;;  %4259 = vmatpush1.bf16.msra.mxu1 %v5870_v9 }
 0x860   :  { %4229 = vmatprep.subr.bf16.mxu0 %v5872_v15  ;;  %4261 = vmatprep.subr.bf16.mxu1 %v5883_v32 }
 0x863   :  { %4231 = vmatpush1.bf16.msra.mxu0 %v5895_v56  ;;  %4263 = vmatpush1.bf16.msra.mxu1 %v5899_v57 }
 0x864   :  { %4265 = vmatprep.subr.bf16.mxu0 %v5625_v30  ;;  %4297 = vmatprep.subr.bf16.mxu1 %v5636_v47 }
 0x919   :  { %v1613_v6 = vpop.f32.mrb[14].mxu0  ;;  %v1684_v7 = vpop.f32.mrb[18].mxu1 }
 0x91a   :  { %v1689_v16 = vadd.f32 %v1613_v6, %v1479_v35  ;;  %v1615_v25 = vpop.f32.mrb[15].mxu0  ;;  %v1686_v34 = vpop.f32.mrb[19].mxu1  ;;  %v1691_v31 = vadd.f32 %v1684_v7, %v1481_v46  ;;  %v1719_v35 = vld [vmem:[%s6732_s1 + $0x28] sm:$0xff] }
 0x91b   :  { %v1690_v43 = vadd.f32 %v1615_v25, %v1480_v62  ;;  %v1692_v53 = vadd.f32 %v1686_v34, %v1482_v36 }
 0x91c   :  { %v3600_v48 = vmul.f32 -1.442695, %v1689_v16  ;;  %v3602_v55 = vmul.f32 -1.442695, %v1691_v31 }
 0x91d   :  { %v3601_v29 = vmul.f32 -1.442695, %v1690_v43 }
 0x91e   :  { %4809 = vpow2.f32 %v3600_v48 }
 0x91f   :  { %4811 = vpow2.f32 %v3601_v29  ;;  %v1721_v29 = vld [vmem:[%s6732_s1 + $0x38] sm:$0xff] }
 0x920   :  { %4813 = vtanh.f32 %v1692_v53 }
 0x921   :  { %4815 = vpow2.f32 %v3602_v55 }
 0x928   :  { %v4810_v4 = vpop.eup %4809 }
 0x929   :  { %v1702_v59 = vadd.f32 1.0, %v4810_v4  ;;  %v4812_v60 = vpop.eup %4811 }
 0x92a   :  { %v1703_v61 = vadd.f32 1.0, %v4812_v60  ;;  %v4814_v11 = vpop.eup %4813 }
 0x92b   :  { %4817 = vrcp.f32 %v1702_v59  ;;  %v4816_v12 = vpop.eup %4815 }
 0x92c   :  { %4819 = vrcp.f32 %v1703_v61  ;;  %v1704_v8 = vadd.f32 1.0, %v4816_v12 }
 0x92e   :  { %4821 = vrcp.f32 %v1704_v8 }
 0x935   :  { %v4818_v13 = vpop.eup %4817 }
 0x936   :  { %v1713_v22 = vmul.f32 %v4818_v13, %v4814_v11  ;;  %v4820_v23 = vpop.eup %4819 }
 0x937   :  { %v1712_v20 = vmul.f32 %v4820_v23, %v5919_v27  ;;  %v1718_v27 = vld [vmem:[%s6732_s1 + $0x20] sm:$0xff] }
 0x938   :  { %v4822_v33 = vpop.eup %4821 }
 0x939   :  { %v5969_v21 = vadd.f32 %v1713_v22, %v1712_v20 }
 0x93b   :  { %4823 = vtanh.f32 %v5969_v21 }
 0x945   :  { %v4824_v44 = vpop.eup %4823 }
 0x946   :  { %v5972_v45 = vmul.f32 %v4824_v44, %v4822_v33  ;;  %v2444_v44 = vld [vmem:[%s6731_s3 + $0x28] sm:$0xff] }
 0x948   :  { %1851 = vmatmul.mubr.f32.vlgmr.msra.gmra.mrb[16].mxu0 %v5972_v45  ;;  %1922 = vmatmul.mubr.f32.vlgmr.msra.gmra.mrb[20].mxu1 %v5972_v45 }
 0x949   :  { %4267 = vmatpush1.bf16.msra.mxu0 %v5638_v49  ;;  %4299 = vmatpush1.bf16.msra.mxu1 %v5647_v54 }
 0x94a   :  { %4269 = vmatprep.subr.bf16.mxu0 %v5661_v58  ;;  %4301 = vmatprep.subr.bf16.mxu1 %v5672_v0 }
 0x94b   :  { %2089 = vmatprep.mubr.f32.mxu0 %v4937_v3  ;;  %2160 = vmatprep.mubr.f32.mxu1 %v4937_v3 }
 0x94d   :  { %4271 = vmatpush1.bf16.msra.mxu0 %v5674_v1  ;;  %4303 = vmatpush1.bf16.msra.mxu1 %v5683_v10 }
 0x94e   :  { %4273 = vmatprep.subr.bf16.mxu0 %v5697_v18  ;;  %4305 = vmatprep.subr.bf16.mxu1 %v5708_v28 }
 0x951   :  { %4275 = vmatpush1.bf16.msra.mxu0 %v5710_v40  ;;  %4307 = vmatpush1.bf16.msra.mxu1 %v5719_v14 }
 0x952   :  { %4277 = vmatprep.subr.bf16.mxu0 %v5733_v26  ;;  %4309 = vmatprep.subr.bf16.mxu1 %v5744_v38 }
 0x955   :  { %4279 = vmatpush1.bf16.msra.mxu0 %v5746_v39  ;;  %4311 = vmatpush1.bf16.msra.mxu1 %v5755_v50 }
 0x956   :  { %4281 = vmatprep.subr.bf16.mxu0 %v5769_v63  ;;  %4313 = vmatprep.subr.bf16.mxu1 %v5780_v17 }
 0x959   :  { %4283 = vmatpush1.bf16.msra.mxu0 %v5782_v24  ;;  %4315 = vmatpush1.bf16.msra.mxu1 %v5791_v42 }
 0x95a   :  { %4285 = vmatprep.subr.bf16.mxu0 %v5805_v41  ;;  %4317 = vmatprep.subr.bf16.mxu1 %v5816_v37 }
 0x95d   :  { %4287 = vmatpush1.bf16.msra.mxu0 %v5818_v52  ;;  %4319 = vmatpush1.bf16.msra.mxu1 %v5830_v51 }
 0x95e   :  { %4289 = vmatprep.subr.bf16.mxu0 %v5843_v2  ;;  %4321 = vmatprep.subr.bf16.mxu1 %v5845_v5 }
 0x961   :  { %4291 = vmatpush1.bf16.msra.mxu0 %v5857_v19  ;;  %4323 = vmatpush1.bf16.msra.mxu1 %v5870_v9 }
 0x962   :  { %4293 = vmatprep.subr.bf16.mxu0 %v5872_v15  ;;  %4325 = vmatprep.subr.bf16.mxu1 %v5883_v32 }
 0x965   :  { %4295 = vmatpush1.bf16.msra.mxu0 %v5895_v56  ;;  %4327 = vmatpush1.bf16.msra.mxu1 %v5899_v57 }
 0x966   :  { %4329 = vmatprep.subr.bf16.mxu0 %v5625_v30  ;;  %4361 = vmatprep.subr.bf16.mxu1 %v5636_v47  ;;  %v1720_v30 = vld [vmem:[%s6732_s1 + $0x30] sm:$0xff] }
 0xa1b   :  { %v1852_v62 = vpop.f32.mrb[16].mxu0  ;;  %v1923_v6 = vpop.f32.mrb[20].mxu1 }
 0xa1c   :  { %v1928_v7 = vadd.f32 %v1852_v62, %v1718_v27  ;;  %v1854_v16 = vpop.f32.mrb[17].mxu0  ;;  %v1925_v25 = vpop.f32.mrb[21].mxu1  ;;  %v1930_v47 = vadd.f32 %v1923_v6, %v1720_v30  ;;  %v2442_v27 = vld [vmem:[%s6731_s3 + $0x18] sm:$0xff]  ;;  %v2439_v6 = vld [vmem:[%s6731_s3] sm:$0xff]  ;;  %v2448_v30 = vld [vmem:[%s6731_s3 + $0x48] sm:$0xff] }
 0xa1d   :  { %v1929_v34 = vadd.f32 %v1854_v16, %v1719_v35  ;;  %v1931_v46 = vadd.f32 %v1925_v25, %v1721_v29  ;;  %v2446_v62 = vld [vmem:[%s6731_s3 + $0x38] sm:$0xff] }
 0xa1e   :  { %v3603_v43 = vmul.f32 -1.442695, %v1928_v7  ;;  %v3605_v31 = vmul.f32 -1.442695, %v1930_v47  ;;  %v2443_v7 = vld [vmem:[%s6731_s3 + $0x20] sm:$0xff]  ;;  %v6104_v16 = vpack.c.bf16 %v2446_v62, %v2442_v27  ;;  %v2452_v47 = vld [vmem:[%s6731_s3 + $0x68] sm:$0xff] }
 0xa1f   :  { %v3604_v48 = vmul.f32 -1.442695, %v1929_v34  ;;  %v6106_v25 = vpack.c.bf16 %v2443_v7, %v2439_v6  ;;  %v2441_v34 = vld [vmem:[%s6731_s3 + $0x10] sm:$0xff]  ;;  %v2450_v29 = vld [vmem:[%s6731_s3 + $0x58] sm:$0xff]  ;;  %v2484_v27 = vld [vmem:[%s6731_s3 + $0x168] sm:$0xff] }
 0xa20   :  { %4825 = vpow2.f32 %v3603_v43  ;;  %v2445_v43 = vld [vmem:[%s6731_s3 + $0x30] sm:$0xff]  ;;  %v2482_v62 = vld [vmem:[%s6731_s3 + $0x158] sm:$0xff] }
 0xa21   :  { %4827 = vpow2.f32 %v3604_v48  ;;  %v6115_v48 = vpack.c.bf16 %v2445_v43, %v2441_v34  ;;  %v2486_v7 = vld [vmem:[%s6731_s3 + $0x178] sm:$0xff]  ;;  %v2479_v34 = vld [vmem:[%s6731_s3 + $0x140] sm:$0xff] }
 0xa22   :  { %4829 = vtanh.f32 %v1931_v46  ;;  %v6129_v46 = vpack.c.bf16 %v2452_v47, %v2448_v30  ;;  %v2483_v43 = vld [vmem:[%s6731_s3 + $0x160] sm:$0xff]  ;;  %v6284_v30 = vpack.c.bf16 %v2486_v7, %v2482_v62 }
 0xa23   :  { %4831 = vpow2.f32 %v3605_v31  ;;  %v2454_v31 = vld [vmem:[%s6731_s3 + $0x78] sm:$0xff]  ;;  %v6286_v47 = vpack.c.bf16 %v2483_v43, %v2479_v34 }
 0xa2a   :  { %v4826_v36 = vpop.eup %4825 }
 0xa2b   :  { %v1941_v53 = vadd.f32 1.0, %v4826_v36  ;;  %v4828_v55 = vpop.eup %4827  ;;  %v2447_v36 = vld [vmem:[%s6731_s3 + $0x40] sm:$0xff] }
 0xa2c   :  { %v1942_v4 = vadd.f32 1.0, %v4828_v55  ;;  %v4830_v59 = vpop.eup %4829  ;;  %v6140_v55 = vpack.c.bf16 %v2454_v31, %v2450_v29  ;;  %v2481_v29 = vld [vmem:[%s6731_s3 + $0x150] sm:$0xff] }
 0xa2d   :  { %4833 = vrcp.f32 %v1941_v53  ;;  %v4832_v60 = vpop.eup %4831  ;;  %v2451_v53 = vld [vmem:[%s6731_s3 + $0x60] sm:$0xff]  ;;  %v2485_v31 = vld [vmem:[%s6731_s3 + $0x170] sm:$0xff] }
 0xa2e   :  { %4835 = vrcp.f32 %v1942_v4  ;;  %v1943_v13 = vadd.f32 1.0, %v4832_v60  ;;  %v6142_v4 = vpack.c.bf16 %v2451_v53, %v2447_v36  ;;  %v2453_v60 = vld [vmem:[%s6731_s3 + $0x70] sm:$0xff]  ;;  %v2488_v36 = vld [vmem:[%s6731_s3 + $0x188] sm:$0xff]  ;;  %v6298_v53 = vpack.c.bf16 %v2485_v31, %v2481_v29 }
 0xa2f   :  { %v2198_v31 = vld [vmem:[%s6732_s1 + $0x70] sm:$0xff] }
 0xa30   :  { %4837 = vrcp.f32 %v1943_v13  ;;  %v2458_v13 = vld [vmem:[%s6731_s3 + $0x98] sm:$0xff] }
 0xa37   :  { %v4834_v61 = vpop.eup %4833 }
 0xa38   :  { %v1952_v11 = vmul.f32 %v4834_v61, %v4830_v59  ;;  %v4836_v12 = vpop.eup %4835  ;;  %v2449_v59 = vld [vmem:[%s6731_s3 + $0x50] sm:$0xff] }
 0xa39   :  { %v1951_v22 = vmul.f32 %v4836_v12, %v5969_v21  ;;  %v2440_v21 = vld [vmem:[%s6731_s3 + $0x8] sm:$0xff]  ;;  %v6151_v61 = vpack.c.bf16 %v2453_v60, %v2449_v59  ;;  %v2490_v60 = vld [vmem:[%s6731_s3 + $0x198] sm:$0xff] }
 0xa3a   :  { %v4838_v8 = vpop.eup %4837  ;;  %v6093_v35 = vpack.c.bf16 %v2444_v44, %v2440_v21  ;;  %v2460_v12 = vld [vmem:[%s6731_s3 + $0xa8] sm:$0xff] }
 0xa3b   :  { %v6023_v23 = vadd.f32 %v1952_v11, %v1951_v22  ;;  %v2456_v11 = vld [vmem:[%s6731_s3 + $0x88] sm:$0xff] }
 0xa3c   :  { %v6165_v22 = vpack.c.bf16 %v2460_v12, %v2456_v11  ;;  %v2480_v44 = vld [vmem:[%s6731_s3 + $0x148] sm:$0xff]  ;;  %v2494_v11 = vld [vmem:[%s6731_s3 + $0x1b8] sm:$0xff] }
 0xa3d   :  { %4839 = vtanh.f32 %v6023_v23  ;;  %v6273_v6 = vpack.c.bf16 %v2484_v27, %v2480_v44  ;;  %v2492_v59 = vld [vmem:[%s6731_s3 + $0x1a8] sm:$0xff] }
 0xa3e   :  { %v6311_v12 = vpack.c.bf16 %v2492_v59, %v2488_v36  ;;  %v2199_v59 = vld [vmem:[%s6732_s1 + $0x78] sm:$0xff] }
 0xa47   :  { %v4840_v20 = vpop.eup %4839 }
 0xa48   :  { %v6026_v33 = vmul.f32 %v4840_v20, %v4838_v8  ;;  %v2455_v8 = vld [vmem:[%s6731_s3 + $0x80] sm:$0xff] }
 0xa49   :  { %v2459_v20 = vld [vmem:[%s6731_s3 + $0xa0] sm:$0xff] }
 0xa4a   :  { %2090 = vmatmul.mubr.f32.vlgmr.msra.gmra.mrb[18].mxu0 %v6026_v33  ;;  %2161 = vmatmul.mubr.f32.vlgmr.msra.gmra.mrb[22].mxu1 %v6026_v33 }
 0xa4b   :  { %4331 = vmatpush1.bf16.msra.mxu0 %v5638_v49  ;;  %4363 = vmatpush1.bf16.msra.mxu1 %v5647_v54  ;;  %v1957_v49 = vld [vmem:[%s6732_s1 + $0x40] sm:$0xff]  ;;  %v1958_v54 = vld [vmem:[%s6732_s1 + $0x48] sm:$0xff] }
 0xa4c   :  { %4333 = vmatprep.subr.bf16.mxu0 %v5661_v58  ;;  %4365 = vmatprep.subr.bf16.mxu1 %v5672_v0 }
 0xa4d   :  { %2328 = vmatprep.mubr.f32.mxu0 %v4937_v3  ;;  %2399 = vmatprep.mubr.f32.mxu1 %v4937_v3 }
 0xa4f   :  { %4335 = vmatpush1.bf16.msra.mxu0 %v5674_v1  ;;  %4367 = vmatpush1.bf16.msra.mxu1 %v5683_v10 }
 0xa50   :  { %4337 = vmatprep.subr.bf16.mxu0 %v5697_v18  ;;  %4369 = vmatprep.subr.bf16.mxu1 %v5708_v28 }
 0xa53   :  { %4339 = vmatpush1.bf16.msra.mxu0 %v5710_v40  ;;  %4371 = vmatpush1.bf16.msra.mxu1 %v5719_v14 }
 0xa54   :  { %4341 = vmatprep.subr.bf16.mxu0 %v5733_v26  ;;  %4373 = vmatprep.subr.bf16.mxu1 %v5744_v38  ;;  %v1959_v26 = vld [vmem:[%s6732_s1 + $0x50] sm:$0xff] }
 0xa57   :  { %4343 = vmatpush1.bf16.msra.mxu0 %v5746_v39  ;;  %4375 = vmatpush1.bf16.msra.mxu1 %v5755_v50  ;;  %v1960_v39 = vld [vmem:[%s6732_s1 + $0x58] sm:$0xff] }
 0xa58   :  { %4345 = vmatprep.subr.bf16.mxu0 %v5769_v63  ;;  %4377 = vmatprep.subr.bf16.mxu1 %v5780_v17 }
 0xa5b   :  { %4347 = vmatpush1.bf16.msra.mxu0 %v5782_v24  ;;  %4379 = vmatpush1.bf16.msra.mxu1 %v5791_v42 }
 0xa5c   :  { %4349 = vmatprep.subr.bf16.mxu0 %v5805_v41  ;;  %4381 = vmatprep.subr.bf16.mxu1 %v5816_v37 }
 0xa5f   :  { %4351 = vmatpush1.bf16.msra.mxu0 %v5818_v52  ;;  %4383 = vmatpush1.bf16.msra.mxu1 %v5830_v51 }
 0xa60   :  { %4353 = vmatprep.subr.bf16.mxu0 %v5843_v2  ;;  %4385 = vmatprep.subr.bf16.mxu1 %v5845_v5 }
 0xa63   :  { %4355 = vmatpush1.bf16.msra.mxu0 %v5857_v19  ;;  %4387 = vmatpush1.bf16.msra.mxu1 %v5870_v9 }
 0xa64   :  { %4357 = vmatprep.subr.bf16.mxu0 %v5872_v15  ;;  %4389 = vmatprep.subr.bf16.mxu1 %v5883_v32 }
 0xa67   :  { %4359 = vmatpush1.bf16.msra.mxu0 %v5895_v56  ;;  %4391 = vmatpush1.bf16.msra.mxu1 %v5899_v57 }
 0xa68   :  { %4393 = vmatprep.subr.bf16.mxu0 %v6093_v35  ;;  %4425 = vmatprep.subr.bf16.mxu1 %v6104_v16 }
 0xb1d   :  { %v2091_v58 = vpop.f32.mrb[18].mxu0  ;;  %v2162_v0 = vpop.f32.mrb[22].mxu1 }
 0xb1e   :  { %v2167_v1 = vadd.f32 %v2091_v58, %v1957_v49  ;;  %v2093_v10 = vpop.f32.mrb[19].mxu0  ;;  %v2164_v18 = vpop.f32.mrb[23].mxu1  ;;  %v2169_v38 = vadd.f32 %v2162_v0, %v1959_v26  ;;  %v2457_v58 = vld [vmem:[%s6731_s3 + $0x90] sm:$0xff]  ;;  %v2463_v26 = vld [vmem:[%s6731_s3 + $0xc0] sm:$0xff] }
 0xb1f   :  { %v2168_v28 = vadd.f32 %v2093_v10, %v1958_v54  ;;  %v2170_v50 = vadd.f32 %v2164_v18, %v1960_v39  ;;  %v6178_v54 = vpack.c.bf16 %v2459_v20, %v2455_v8  ;;  %v2461_v0 = vld [vmem:[%s6731_s3 + $0xb0] sm:$0xff]  ;;  %v2464_v10 = vld [vmem:[%s6731_s3 + $0xc8] sm:$0xff]  ;;  %v2491_v8 = vld [vmem:[%s6731_s3 + $0x1a0] sm:$0xff] }
 0xb20   :  { %v3606_v40 = vmul.f32 -1.442695, %v2167_v1  ;;  %v3608_v63 = vmul.f32 -1.442695, %v2169_v38  ;;  %v6187_v1 = vpack.c.bf16 %v2461_v0, %v2457_v58  ;;  %v2468_v18 = vld [vmem:[%s6731_s3 + $0xe8] sm:$0xff]  ;;  %v2467_v38 = vld [vmem:[%s6731_s3 + $0xe0] sm:$0xff] }
 0xb21   :  { %v3607_v14 = vmul.f32 -1.442695, %v2168_v28  ;;  %v2466_v28 = vld [vmem:[%s6731_s3 + $0xd8] sm:$0xff]  ;;  %v2489_v20 = vld [vmem:[%s6731_s3 + $0x190] sm:$0xff] }
 0xb22   :  { %4841 = vpow2.f32 %v3606_v40  ;;  %v6201_v40 = vpack.c.bf16 %v2468_v18, %v2464_v10  ;;  %v2493_v0 = vld [vmem:[%s6731_s3 + $0x1b0] sm:$0xff]  ;;  %v2496_v10 = vld [vmem:[%s6731_s3 + $0x1c8] sm:$0xff] }
 0xb23   :  { %4843 = vpow2.f32 %v3607_v14  ;;  %v2470_v14 = vld [vmem:[%s6731_s3 + $0xf8] sm:$0xff]  ;;  %v2500_v18 = vld [vmem:[%s6731_s3 + $0x1e8] sm:$0xff] }
 0xb24   :  { %4845 = vtanh.f32 %v2170_v50  ;;  %v6212_v39 = vpack.c.bf16 %v2470_v14, %v2466_v28  ;;  %v6214_v50 = vpack.c.bf16 %v2467_v38, %v2463_v26  ;;  %v6338_v28 = vpack.c.bf16 %v2493_v0, %v2489_v20  ;;  %v2498_v26 = vld [vmem:[%s6731_s3 + $0x1d8] sm:$0xff] }
 0xb25   :  { %4847 = vpow2.f32 %v3608_v63  ;;  %v2465_v63 = vld [vmem:[%s6731_s3 + $0xd0] sm:$0xff]  ;;  %v6340_v14 = vpack.c.bf16 %v2500_v18, %v2496_v10  ;;  %v2502_v38 = vld [vmem:[%s6731_s3 + $0x1f8] sm:$0xff] }
 0xb2c   :  { %v4842_v17 = vpop.eup %4841 }
 0xb2d   :  { %v2180_v24 = vadd.f32 1.0, %v4842_v17  ;;  %v4844_v42 = vpop.eup %4843  ;;  %v2469_v17 = vld [vmem:[%s6731_s3 + $0xf0] sm:$0xff] }
 0xb2e   :  { %v2181_v41 = vadd.f32 1.0, %v4844_v42  ;;  %v4846_v37 = vpop.eup %4845  ;;  %v2472_v42 = vld [vmem:[%s6731_s3 + $0x108] sm:$0xff] }
 0xb2f   :  { %4849 = vrcp.f32 %v2180_v24  ;;  %v4848_v52 = vpop.eup %4847  ;;  %v6223_v24 = vpack.c.bf16 %v2469_v17, %v2465_v63  ;;  %v2495_v63 = vld [vmem:[%s6731_s3 + $0x1c0] sm:$0xff]  ;;  %v6351_v17 = vpack.c.bf16 %v2502_v38, %v2498_v26 }
 0xb30   :  { %4851 = vrcp.f32 %v2181_v41  ;;  %v2182_v19 = vadd.f32 1.0, %v4848_v52  ;;  %v2476_v41 = vld [vmem:[%s6731_s3 + $0x128] sm:$0xff] }
 0xb31   :  { %v6237_v52 = vpack.c.bf16 %v2476_v41, %v2472_v42  ;;  %v2499_v42 = vld [vmem:[%s6731_s3 + $0x1e0] sm:$0xff]  ;;  %v2497_v41 = vld [vmem:[%s6731_s3 + $0x1d0] sm:$0xff] }
 0xb32   :  { %4853 = vrcp.f32 %v2182_v19 }
 0xb39   :  { %v4850_v51 = vpop.eup %4849 }
 0xb3a   :  { %v2191_v2 = vmul.f32 %v4850_v51, %v4846_v37  ;;  %v4852_v5 = vpop.eup %4851  ;;  %v2474_v37 = vld [vmem:[%s6731_s3 + $0x118] sm:$0xff] }
 0xb3b   :  { %v2190_v9 = vmul.f32 %v4852_v5, %v6023_v23  ;;  %v2462_v23 = vld [vmem:[%s6731_s3 + $0xb8] sm:$0xff]  ;;  %v2475_v5 = vld [vmem:[%s6731_s3 + $0x120] sm:$0xff] }
 0xb3c   :  { %v4854_v32 = vpop.eup %4853  ;;  %v6176_v49 = vpack.c.bf16 %v2462_v23, %v2458_v13  ;;  %v2478_v51 = vld [vmem:[%s6731_s3 + $0x138] sm:$0xff]  ;;  %v6313_v13 = vpack.c.bf16 %v2494_v11, %v2490_v60  ;;  %v2487_v23 = vld [vmem:[%s6731_s3 + $0x180] sm:$0xff] }
 0xb3d   :  { %v6075_v15 = vadd.f32 %v2191_v2, %v2190_v9  ;;  %v2471_v2 = vld [vmem:[%s6731_s3 + $0x100] sm:$0xff]  ;;  %v6248_v19 = vpack.c.bf16 %v2478_v51, %v2474_v37  ;;  %v6325_v58 = vpack.c.bf16 %v2491_v8, %v2487_v23  ;;  %v2501_v37 = vld [vmem:[%s6731_s3 + $0x1f0] sm:$0xff]  ;;  %v6363_v51 = vpack.c.bf16 %v2499_v42, %v2495_v63 }
 0xb3e   :  { %v6250_v9 = vpack.c.bf16 %v2475_v5, %v2471_v2  ;;  %v6367_v2 = vpack.c.bf16 %v2501_v37, %v2497_v41  ;;  %v2196_v5 = vld [vmem:[%s6732_s1 + $0x60] sm:$0xff] }
 0xb3f   :  { %4855 = vtanh.f32 %v6075_v15 }
 0xb49   :  { %v4856_v56 = vpop.eup %4855 }
 0xb4a   :  { %v6078_v57 = vmul.f32 %v4856_v56, %v4854_v32  ;;  %v2473_v32 = vld [vmem:[%s6731_s3 + $0x110] sm:$0xff] }
 0xb4b   :  { %v2477_v56 = vld [vmem:[%s6731_s3 + $0x130] sm:$0xff] }
 0xb4c   :  { %2329 = vmatmul.mubr.f32.vlgmr.msra.gmra.mrb[20].mxu0 %v6078_v57  ;;  %2400 = vmatmul.mubr.f32.vlgmr.msra.gmra.mrb[24].mxu1 %v6078_v57  ;;  %v6259_v21 = vpack.c.bf16 %v2477_v56, %v2473_v32  ;;  %v2197_v32 = vld [vmem:[%s6732_s1 + $0x68] sm:$0xff] }
 0xb4d   :  { %2567 = vmatprep.mubr.f32.mxu0 %v4937_v3  ;;  %2638 = vmatprep.mubr.f32.mxu1 %v4937_v3 }
 0xb4e   :  { %4395 = vmatpush1.bf16.msra.mxu0 %v6106_v25  ;;  %4427 = vmatpush1.bf16.msra.mxu1 %v6115_v48 }
 0xb4f   :  { %4397 = vmatprep.subr.bf16.mxu0 %v6129_v46  ;;  %4429 = vmatprep.subr.bf16.mxu1 %v6140_v55 }
 0xb52   :  { %4399 = vmatpush1.bf16.msra.mxu0 %v6142_v4  ;;  %4431 = vmatpush1.bf16.msra.mxu1 %v6151_v61 }
 0xb53   :  { %4401 = vmatprep.subr.bf16.mxu0 %v6165_v22  ;;  %4433 = vmatprep.subr.bf16.mxu1 %v6176_v49 }
 0xb56   :  { %4403 = vmatpush1.bf16.msra.mxu0 %v6178_v54  ;;  %4435 = vmatpush1.bf16.msra.mxu1 %v6187_v1 }
 0xb57   :  { %4405 = vmatprep.subr.bf16.mxu0 %v6201_v40  ;;  %4437 = vmatprep.subr.bf16.mxu1 %v6212_v39 }
 0xb5a   :  { %4407 = vmatpush1.bf16.msra.mxu0 %v6214_v50  ;;  %4439 = vmatpush1.bf16.msra.mxu1 %v6223_v24 }
 0xb5b   :  { %4409 = vmatprep.subr.bf16.mxu0 %v6237_v52  ;;  %4441 = vmatprep.subr.bf16.mxu1 %v6248_v19 }
 0xb5e   :  { %4411 = vmatpush1.bf16.msra.mxu0 %v6250_v9  ;;  %4443 = vmatpush1.bf16.msra.mxu1 %v6259_v21 }
 0xb5f   :  { %4413 = vmatprep.subr.bf16.mxu0 %v6273_v6  ;;  %4445 = vmatprep.subr.bf16.mxu1 %v6284_v30 }
 0xb62   :  { %4415 = vmatpush1.bf16.msra.mxu0 %v6286_v47  ;;  %4447 = vmatpush1.bf16.msra.mxu1 %v6298_v53 }
 0xb63   :  { %4417 = vmatprep.subr.bf16.mxu0 %v6311_v12  ;;  %4449 = vmatprep.subr.bf16.mxu1 %v6313_v13 }
 0xb66   :  { %4419 = vmatpush1.bf16.msra.mxu0 %v6325_v58  ;;  %4451 = vmatpush1.bf16.msra.mxu1 %v6338_v28 }
 0xb67   :  { %4421 = vmatprep.subr.bf16.mxu0 %v6340_v14  ;;  %4453 = vmatprep.subr.bf16.mxu1 %v6351_v17 }
 0xb6a   :  { %4423 = vmatpush1.bf16.msra.mxu0 %v6363_v51  ;;  %4455 = vmatpush1.bf16.msra.mxu1 %v6367_v2 }
 0xb6b   :  { %4457 = vmatprep.subr.bf16.mxu0 %v6093_v35  ;;  %4489 = vmatprep.subr.bf16.mxu1 %v6104_v16 }
 0xc1f   :  { %v2330_v56 = vpop.f32.mrb[20].mxu0  ;;  %v2401_v44 = vpop.f32.mrb[24].mxu1 }
 0xc20   :  { %v2406_v27 = vadd.f32 %v2330_v56, %v2196_v5  ;;  %v2332_v62 = vpop.f32.mrb[21].mxu0  ;;  %v2403_v7 = vpop.f32.mrb[25].mxu1  ;;  %v2408_v36 = vadd.f32 %v2401_v44, %v2198_v31  ;;  %v2436_v44 = vld [vmem:[%s6732_s1 + $0x88] sm:$0xff] }
 0xc21   :  { %v2407_v34 = vadd.f32 %v2332_v62, %v2197_v32  ;;  %v2409_v60 = vadd.f32 %v2403_v7, %v2199_v59  ;;  %v2437_v59 = vld [vmem:[%s6732_s1 + $0x90] sm:$0xff] }
 0xc22   :  { %v3609_v43 = vmul.f32 -1.442695, %v2406_v27  ;;  %v3611_v11 = vmul.f32 -1.442695, %v2408_v36 }
 0xc23   :  { %v3610_v29 = vmul.f32 -1.442695, %v2407_v34 }
 0xc24   :  { %4857 = vpow2.f32 %v3609_v43 }
 0xc25   :  { %4859 = vpow2.f32 %v3610_v29 }
 0xc26   :  { %4861 = vtanh.f32 %v2409_v60 }
 0xc27   :  { %4863 = vpow2.f32 %v3611_v11  ;;  %v2438_v11 = vld [vmem:[%s6732_s1 + $0x98] sm:$0xff] }
 0xc2e   :  { %v4858_v23 = vpop.eup %4857 }
 0xc2f   :  { %v2419_v8 = vadd.f32 1.0, %v4858_v23  ;;  %v4860_v20 = vpop.eup %4859 }
 0xc30   :  { %v2420_v0 = vadd.f32 1.0, %v4860_v20  ;;  %v4862_v10 = vpop.eup %4861 }
 0xc31   :  { %4865 = vrcp.f32 %v2419_v8  ;;  %v4864_v18 = vpop.eup %4863 }
 0xc32   :  { %4867 = vrcp.f32 %v2420_v0  ;;  %v2421_v42 = vadd.f32 1.0, %v4864_v18 }
 0xc34   :  { %4869 = vrcp.f32 %v2421_v42 }
 0xc3b   :  { %v4866_v26 = vpop.eup %4865 }
 0xc3c   :  { %v2430_v38 = vmul.f32 %v4866_v26, %v4862_v10  ;;  %v4868_v63 = vpop.eup %4867 }
 0xc3d   :  { %v2429_v41 = vmul.f32 %v4868_v63, %v6075_v15  ;;  %v2435_v15 = vld [vmem:[%s6732_s1 + $0x80] sm:$0xff] }
 0xc3e   :  { %v4870_v5 = vpop.eup %4869 }
 0xc3f   :  { %v6387_v37 = vadd.f32 %v2430_v38, %v2429_v41 }
 0xc41   :  { %4871 = vtanh.f32 %v6387_v37 }
 0xc4b   :  { %v4872_v32 = vpop.eup %4871 }
 0xc4c   :  { %v6390_v56 = vmul.f32 %v4872_v32, %v4870_v5 }
 0xc4e   :  { %2568 = vmatmul.mubr.f32.vlgmr.msra.gmra.mrb[22].mxu0 %v6390_v56  ;;  %2639 = vmatmul.mubr.f32.vlgmr.msra.gmra.mrb[26].mxu1 %v6390_v56 }
 0xc4f   :  { %4459 = vmatpush1.bf16.msra.mxu0 %v6106_v25  ;;  %4491 = vmatpush1.bf16.msra.mxu1 %v6115_v48 }
 0xc50   :  { %4461 = vmatprep.subr.bf16.mxu0 %v6129_v46  ;;  %4493 = vmatprep.subr.bf16.mxu1 %v6140_v55 }
 0xc51   :  { %2806 = vmatprep.mubr.f32.mxu0 %v4937_v3  ;;  %2877 = vmatprep.mubr.f32.mxu1 %v4937_v3 }
 0xc53   :  { %4463 = vmatpush1.bf16.msra.mxu0 %v6142_v4  ;;  %4495 = vmatpush1.bf16.msra.mxu1 %v6151_v61 }
 0xc54   :  { %4465 = vmatprep.subr.bf16.mxu0 %v6165_v22  ;;  %4497 = vmatprep.subr.bf16.mxu1 %v6176_v49 }
 0xc57   :  { %4467 = vmatpush1.bf16.msra.mxu0 %v6178_v54  ;;  %4499 = vmatpush1.bf16.msra.mxu1 %v6187_v1 }
 0xc58   :  { %4469 = vmatprep.subr.bf16.mxu0 %v6201_v40  ;;  %4501 = vmatprep.subr.bf16.mxu1 %v6212_v39 }
 0xc5b   :  { %4471 = vmatpush1.bf16.msra.mxu0 %v6214_v50  ;;  %4503 = vmatpush1.bf16.msra.mxu1 %v6223_v24 }
 0xc5c   :  { %4473 = vmatprep.subr.bf16.mxu0 %v6237_v52  ;;  %4505 = vmatprep.subr.bf16.mxu1 %v6248_v19 }
 0xc5f   :  { %4475 = vmatpush1.bf16.msra.mxu0 %v6250_v9  ;;  %4507 = vmatpush1.bf16.msra.mxu1 %v6259_v21 }
 0xc60   :  { %4477 = vmatprep.subr.bf16.mxu0 %v6273_v6  ;;  %4509 = vmatprep.subr.bf16.mxu1 %v6284_v30 }
 0xc63   :  { %4479 = vmatpush1.bf16.msra.mxu0 %v6286_v47  ;;  %4511 = vmatpush1.bf16.msra.mxu1 %v6298_v53 }
 0xc64   :  { %4481 = vmatprep.subr.bf16.mxu0 %v6311_v12  ;;  %4513 = vmatprep.subr.bf16.mxu1 %v6313_v13 }
 0xc67   :  { %4483 = vmatpush1.bf16.msra.mxu0 %v6325_v58  ;;  %4515 = vmatpush1.bf16.msra.mxu1 %v6338_v28 }
 0xc68   :  { %4485 = vmatprep.subr.bf16.mxu0 %v6340_v14  ;;  %4517 = vmatprep.subr.bf16.mxu1 %v6351_v17 }
 0xc6b   :  { %4487 = vmatpush1.bf16.msra.mxu0 %v6363_v51  ;;  %4519 = vmatpush1.bf16.msra.mxu1 %v6367_v2 }
 0xc6c   :  { %4521 = vmatprep.subr.bf16.mxu0 %v6093_v35  ;;  %4553 = vmatprep.subr.bf16.mxu1 %v6104_v16 }
 0xd21   :  { %v2569_v27 = vpop.f32.mrb[22].mxu0  ;;  %v2640_v62 = vpop.f32.mrb[26].mxu1 }
 0xd22   :  { %v2645_v7 = vadd.f32 %v2569_v27, %v2435_v15  ;;  %v2571_v34 = vpop.f32.mrb[23].mxu0  ;;  %v2642_v43 = vpop.f32.mrb[27].mxu1  ;;  %v2647_v60 = vadd.f32 %v2640_v62, %v2437_v59 }
 0xd23   :  { %v2646_v29 = vadd.f32 %v2571_v34, %v2436_v44  ;;  %v2648_v23 = vadd.f32 %v2642_v43, %v2438_v11 }
 0xd24   :  { %v3612_v31 = vmul.f32 -1.442695, %v2645_v7  ;;  %v3614_v8 = vmul.f32 -1.442695, %v2647_v60  ;;  %v2675_v7 = vld [vmem:[%s6732_s1 + $0xa8] sm:$0xff] }
 0xd25   :  { %v3613_v36 = vmul.f32 -1.442695, %v2646_v29 }
 0xd26   :  { %4873 = vpow2.f32 %v3612_v31 }
 0xd27   :  { %4875 = vpow2.f32 %v3613_v36 }
 0xd28   :  { %4877 = vtanh.f32 %v2648_v23  ;;  %v2677_v23 = vld [vmem:[%s6732_s1 + $0xb8] sm:$0xff] }
 0xd29   :  { %4879 = vpow2.f32 %v3614_v8 }
 0xd30   :  { %v4874_v20 = vpop.eup %4873 }
 0xd31   :  { %v2658_v0 = vadd.f32 1.0, %v4874_v20  ;;  %v4876_v10 = vpop.eup %4875 }
 0xd32   :  { %v2659_v18 = vadd.f32 1.0, %v4876_v10  ;;  %v4878_v26 = vpop.eup %4877 }
 0xd33   :  { %4881 = vrcp.f32 %v2658_v0  ;;  %v4880_v38 = vpop.eup %4879 }
 0xd34   :  { %4883 = vrcp.f32 %v2659_v18  ;;  %v2660_v5 = vadd.f32 1.0, %v4880_v38 }
 0xd36   :  { %4885 = vrcp.f32 %v2660_v5 }
 0xd3d   :  { %v4882_v63 = vpop.eup %4881 }
 0xd3e   :  { %v2669_v42 = vmul.f32 %v4882_v63, %v4878_v26  ;;  %v4884_v41 = vpop.eup %4883 }
 0xd3f   :  { %v2668_v32 = vmul.f32 %v4884_v41, %v6387_v37  ;;  %v2674_v37 = vld [vmem:[%s6732_s1 + $0xa0] sm:$0xff] }
 0xd40   :  { %v4886_v44 = vpop.eup %4885 }
 0xd41   :  { %v6441_v15 = vadd.f32 %v2669_v42, %v2668_v32 }
 0xd43   :  { %4887 = vtanh.f32 %v6441_v15 }
 0xd4d   :  { %v4888_v27 = vpop.eup %4887 }
 0xd4e   :  { %v6444_v62 = vmul.f32 %v4888_v27, %v4886_v44 }
 0xd50   :  { %2807 = vmatmul.mubr.f32.vlgmr.msra.gmra.mrb[24].mxu0 %v6444_v62  ;;  %2878 = vmatmul.mubr.f32.vlgmr.msra.gmra.mrb[28].mxu1 %v6444_v62 }
 0xd51   :  { %4523 = vmatpush1.bf16.msra.mxu0 %v6106_v25  ;;  %4555 = vmatpush1.bf16.msra.mxu1 %v6115_v48 }
 0xd52   :  { %4525 = vmatprep.subr.bf16.mxu0 %v6129_v46  ;;  %4557 = vmatprep.subr.bf16.mxu1 %v6140_v55 }
 0xd53   :  { %3045 = vmatprep.mubr.f32.mxu0 %v4937_v3  ;;  %3116 = vmatprep.mubr.f32.mxu1 %v4937_v3 }
 0xd55   :  { %4527 = vmatpush1.bf16.msra.mxu0 %v6142_v4  ;;  %4559 = vmatpush1.bf16.msra.mxu1 %v6151_v61 }
 0xd56   :  { %4529 = vmatprep.subr.bf16.mxu0 %v6165_v22  ;;  %4561 = vmatprep.subr.bf16.mxu1 %v6176_v49 }
 0xd59   :  { %4531 = vmatpush1.bf16.msra.mxu0 %v6178_v54  ;;  %4563 = vmatpush1.bf16.msra.mxu1 %v6187_v1 }
 0xd5a   :  { %4533 = vmatprep.subr.bf16.mxu0 %v6201_v40  ;;  %4565 = vmatprep.subr.bf16.mxu1 %v6212_v39 }
 0xd5d   :  { %4535 = vmatpush1.bf16.msra.mxu0 %v6214_v50  ;;  %4567 = vmatpush1.bf16.msra.mxu1 %v6223_v24 }
 0xd5e   :  { %4537 = vmatprep.subr.bf16.mxu0 %v6237_v52  ;;  %4569 = vmatprep.subr.bf16.mxu1 %v6248_v19 }
 0xd61   :  { %4539 = vmatpush1.bf16.msra.mxu0 %v6250_v9  ;;  %4571 = vmatpush1.bf16.msra.mxu1 %v6259_v21 }
 0xd62   :  { %4541 = vmatprep.subr.bf16.mxu0 %v6273_v6  ;;  %4573 = vmatprep.subr.bf16.mxu1 %v6284_v30 }
 0xd65   :  { %4543 = vmatpush1.bf16.msra.mxu0 %v6286_v47  ;;  %4575 = vmatpush1.bf16.msra.mxu1 %v6298_v53 }
 0xd66   :  { %4545 = vmatprep.subr.bf16.mxu0 %v6311_v12  ;;  %4577 = vmatprep.subr.bf16.mxu1 %v6313_v13 }
 0xd69   :  { %4547 = vmatpush1.bf16.msra.mxu0 %v6325_v58  ;;  %4579 = vmatpush1.bf16.msra.mxu1 %v6338_v28 }
 0xd6a   :  { %4549 = vmatprep.subr.bf16.mxu0 %v6340_v14  ;;  %4581 = vmatprep.subr.bf16.mxu1 %v6351_v17 }
 0xd6d   :  { %4551 = vmatpush1.bf16.msra.mxu0 %v6363_v51  ;;  %4583 = vmatpush1.bf16.msra.mxu1 %v6367_v2 }
 0xd6e   :  { %4585 = vmatprep.subr.bf16.mxu0 %v6093_v35  ;;  %4617 = vmatprep.subr.bf16.mxu1 %v6104_v16  ;;  %v2676_v35 = vld [vmem:[%s6732_s1 + $0xb0] sm:$0xff] }
 0xe23   :  { %v2808_v34 = vpop.f32.mrb[24].mxu0  ;;  %v2879_v43 = vpop.f32.mrb[28].mxu1 }
 0xe24   :  { %v2884_v29 = vadd.f32 %v2808_v34, %v2674_v37  ;;  %v2810_v31 = vpop.f32.mrb[25].mxu0  ;;  %v2881_v36 = vpop.f32.mrb[29].mxu1  ;;  %v2886_v16 = vadd.f32 %v2879_v43, %v2676_v35  ;;  %v3401_v43 = vld [vmem:[%s6733_s4 + $0x10] sm:$0xff] }
 0xe25   :  { %v2885_v59 = vadd.f32 %v2810_v31, %v2675_v7  ;;  %v2887_v8 = vadd.f32 %v2881_v36, %v2677_v23  ;;  %v3406_v31 = vld [vmem:[%s6733_s4 + $0x38] sm:$0xff]  ;;  %v3405_v23 = vld [vmem:[%s6733_s4 + $0x30] sm:$0xff] }
 0xe26   :  { %v3615_v60 = vmul.f32 -1.442695, %v2884_v29  ;;  %v3617_v20 = vmul.f32 -1.442695, %v2886_v16  ;;  %v3404_v29 = vld [vmem:[%s6733_s4 + $0x28] sm:$0xff]  ;;  %v3403_v16 = vld [vmem:[%s6733_s4 + $0x20] sm:$0xff] }
 0xe27   :  { %v3616_v11 = vmul.f32 -1.442695, %v2885_v59  ;;  %v4652_v35 = vpack.c.bf16 %v3406_v31, %v3404_v29  ;;  %v3433_v31 = vlaneseq }
 0xe28   :  { %4889 = vpow2.f32 %v3615_v60 }
 0xe29   :  { %4891 = vpow2.f32 %v3616_v11 }
 0xe2a   :  { %4893 = vtanh.f32 %v2887_v8  ;;  %v3408_v8 = vld [vmem:[%s6733_s4 + $0x48] sm:$0xff] }
 0xe2b   :  { %4895 = vpow2.f32 %v3617_v20  ;;  %v3410_v20 = vld [vmem:[%s6733_s4 + $0x58] sm:$0xff] }
 0xe32   :  { %v4890_v0 = vpop.eup %4889 }
 0xe33   :  { %v2897_v10 = vadd.f32 1.0, %v4890_v0  ;;  %v4892_v18 = vpop.eup %4891  ;;  %v4654_v0 = vpack.c.bf16 %v3405_v23, %v3403_v16 }
 0xe34   :  { %v2898_v26 = vadd.f32 1.0, %v4892_v18  ;;  %v4894_v38 = vpop.eup %4893  ;;  %v3407_v18 = vld [vmem:[%s6733_s4 + $0x40] sm:$0xff] }
 0xe35   :  { %4897 = vrcp.f32 %v2897_v10  ;;  %v4896_v63 = vpop.eup %4895  ;;  %v4656_v10 = vpack.c.bf16 %v3410_v20, %v3408_v8 }
 0xe36   :  { %4899 = vrcp.f32 %v2898_v26  ;;  %v2899_v32 = vadd.f32 1.0, %v4896_v63  ;;  %v3409_v26 = vld [vmem:[%s6733_s4 + $0x50] sm:$0xff]  ;;  %v3414_v63 = vld [vmem:[%s6733_s4 + $0x78] sm:$0xff] }
 0xe38   :  { %4901 = vrcp.f32 %v2899_v32  ;;  %v3413_v32 = vld [vmem:[%s6733_s4 + $0x70] sm:$0xff] }
 0xe3f   :  { %v4898_v42 = vpop.eup %4897 }
 0xe40   :  { %v2908_v41 = vmul.f32 %v4898_v42, %v4894_v38  ;;  %v4900_v5 = vpop.eup %4899  ;;  %v3412_v38 = vld [vmem:[%s6733_s4 + $0x68] sm:$0xff]  ;;  %v4658_v42 = vpack.c.bf16 %v3409_v26, %v3407_v18 }
 0xe41   :  { %v2907_v44 = vmul.f32 %v4900_v5, %v6441_v15  ;;  %v3399_v15 = vld [vmem:[%s6733_s4] sm:$0xff] }
 0xe42   :  { %v4902_v37 = vpop.eup %4901  ;;  %v4650_v60 = vpack.c.bf16 %v3401_v43, %v3399_v15  ;;  %v3411_v5 = vld [vmem:[%s6733_s4 + $0x60] sm:$0xff] }
 0xe43   :  { %v6495_v27 = vadd.f32 %v2908_v41, %v2907_v44  ;;  %v4660_v41 = vpack.c.bf16 %v3414_v63, %v3412_v38  ;;  %v3416_v44 = vld [vmem:[%s6733_s4 + $0x88] sm:$0xff] }
 0xe45   :  { %4903 = vtanh.f32 %v6495_v27 }
 0xe4f   :  { %v4904_v7 = vpop.eup %4903 }
 0xe50   :  { %v6498_v34 = vmul.f32 %v4904_v7, %v4902_v37  ;;  %v4662_v37 = vpack.c.bf16 %v3413_v32, %v3411_v5 }
 0xe52   :  { %3046 = vmatmul.mubr.f32.vlgmr.msra.gmra.mrb[26].mxu0 %v6498_v34  ;;  %3117 = vmatmul.mubr.f32.vlgmr.msra.gmra.mrb[30].mxu1 %v6498_v34 }
 0xe53   :  { %4587 = vmatpush1.bf16.msra.mxu0 %v6106_v25  ;;  %4619 = vmatpush1.bf16.msra.mxu1 %v6115_v48  ;;  %v3400_v25 = vld [vmem:[%s6733_s4 + $0x8] sm:$0xff]  ;;  %v3402_v48 = vld [vmem:[%s6733_s4 + $0x18] sm:$0xff] }
 0xe54   :  { %4589 = vmatprep.subr.bf16.mxu0 %v6129_v46  ;;  %4621 = vmatprep.subr.bf16.mxu1 %v6140_v55  ;;  %v4648_v46 = vpack.c.bf16 %v3402_v48, %v3400_v25  ;;  %v2913_v55 = vld [vmem:[%s6732_s1 + $0xc0] sm:$0xff]  ;;  %v3417_v48 = vld [vmem:[%s6733_s4 + $0x90] sm:$0xff] }
 0xe55   :  { %3284 = vmatprep.mubr.f32.mxu0 %v4937_v3  ;;  %3355 = vmatprep.mubr.f32.mxu1 %v4937_v3  ;;  %v3415_v25 = vld [vmem:[%s6733_s4 + $0x80] sm:$0xff] }
 0xe57   :  { %4591 = vmatpush1.bf16.msra.mxu0 %v6142_v4  ;;  %4623 = vmatpush1.bf16.msra.mxu1 %v6151_v61  ;;  %v2914_v4 = vld [vmem:[%s6732_s1 + $0xc8] sm:$0xff] }
 0xe58   :  { %4593 = vmatprep.subr.bf16.mxu0 %v6165_v22  ;;  %4625 = vmatprep.subr.bf16.mxu1 %v6176_v49 }
 0xe5b   :  { %4595 = vmatpush1.bf16.msra.mxu0 %v6178_v54  ;;  %4627 = vmatpush1.bf16.msra.mxu1 %v6187_v1 }
 0xe5c   :  { %4597 = vmatprep.subr.bf16.mxu0 %v6201_v40  ;;  %4629 = vmatprep.subr.bf16.mxu1 %v6212_v39 }
 0xe5f   :  { %4599 = vmatpush1.bf16.msra.mxu0 %v6214_v50  ;;  %4631 = vmatpush1.bf16.msra.mxu1 %v6223_v24  ;;  %v2915_v24 = vld [vmem:[%s6732_s1 + $0xd0] sm:$0xff] }
 0xe60   :  { %4601 = vmatprep.subr.bf16.mxu0 %v6237_v52  ;;  %4633 = vmatprep.subr.bf16.mxu1 %v6248_v19  ;;  %v2916_v19 = vld [vmem:[%s6732_s1 + $0xd8] sm:$0xff] }
 0xe63   :  { %4603 = vmatpush1.bf16.msra.mxu0 %v6250_v9  ;;  %4635 = vmatpush1.bf16.msra.mxu1 %v6259_v21 }
 0xe64   :  { %4605 = vmatprep.subr.bf16.mxu0 %v6273_v6  ;;  %4637 = vmatprep.subr.bf16.mxu1 %v6284_v30 }
 0xe67   :  { %4607 = vmatpush1.bf16.msra.mxu0 %v6286_v47  ;;  %4639 = vmatpush1.bf16.msra.mxu1 %v6298_v53 }
 0xe68   :  { %4609 = vmatprep.subr.bf16.mxu0 %v6311_v12  ;;  %4641 = vmatprep.subr.bf16.mxu1 %v6313_v13 }
 0xe6b   :  { %4611 = vmatpush1.bf16.msra.mxu0 %v6325_v58  ;;  %4643 = vmatpush1.bf16.msra.mxu1 %v6338_v28 }
 0xe6c   :  { %4613 = vmatprep.subr.bf16.mxu0 %v6340_v14  ;;  %4645 = vmatprep.subr.bf16.mxu1 %v6351_v17 }
 0xe6f   :  { %4615 = vmatpush1.bf16.msra.mxu0 %v6363_v51  ;;  %4647 = vmatpush1.bf16.msra.mxu1 %v6367_v2 }
 0xe70   :  { %4649 = vmatprep.subr.bf16.mxu0 %v4648_v46  ;;  %v3420_v46 = vld [vmem:[%s6733_s4 + $0xa8] sm:$0xff] }
 0xf25   :  { %v3047_v61 = vpop.f32.mrb[26].mxu0  ;;  %v3118_v22 = vpop.f32.mrb[30].mxu1 }
 0xf26   :  { %v3123_v49 = vadd.f32 %v3047_v61, %v2913_v55  ;;  %v3049_v54 = vpop.f32.mrb[27].mxu0  ;;  %v3120_v1 = vpop.f32.mrb[31].mxu1  ;;  %v3125_v52 = vadd.f32 %v3118_v22, %v2915_v24  ;;  %v3422_v55 = vld [vmem:[%s6733_s4 + $0xb8] sm:$0xff]  ;;  %v3419_v22 = vld [vmem:[%s6733_s4 + $0xa0] sm:$0xff]  ;;  %v3425_v24 = vld [vmem:[%s6733_s4 + $0xd0] sm:$0xff] }
 0xf27   :  { %v3124_v40 = vadd.f32 %v3049_v54, %v2914_v4  ;;  %v3126_v9 = vadd.f32 %v3120_v1, %v2916_v19  ;;  %v4666_v4 = vpack.c.bf16 %v3417_v48, %v3415_v25  ;;  %v4668_v61 = vpack.c.bf16 %v3422_v55, %v3420_v46  ;;  %v3424_v54 = vld [vmem:[%s6733_s4 + $0xc8] sm:$0xff]  ;;  %v3426_v1 = vld [vmem:[%s6733_s4 + $0xd8] sm:$0xff] }
 0xf28   :  { %v3618_v39 = vmul.f32 -1.442695, %v3123_v49  ;;  %v3620_v21 = vmul.f32 -1.442695, %v3125_v52  ;;  %v3421_v49 = vld [vmem:[%s6733_s4 + $0xb0] sm:$0xff]  ;;  %v3428_v52 = vld [vmem:[%s6733_s4 + $0xe8] sm:$0xff] }
 0xf29   :  { %v3619_v50 = vmul.f32 -1.442695, %v3124_v40  ;;  %v4670_v40 = vpack.c.bf16 %v3421_v49, %v3419_v22  ;;  %v3430_v19 = vld [vmem:[%s6733_s4 + $0xf8] sm:$0xff] }
 0xf2a   :  { %4905 = vpow2.f32 %v3618_v39  ;;  %v4672_v39 = vpack.c.bf16 %v3426_v1, %v3424_v54 }
 0xf2b   :  { %4907 = vpow2.f32 %v3619_v50  ;;  %v3423_v50 = vld [vmem:[%s6733_s4 + $0xc0] sm:$0xff] }
 0xf2c   :  { %4909 = vtanh.f32 %v3126_v9  ;;  %v4674_v9 = vpack.c.bf16 %v3425_v24, %v3423_v50 }
 0xf2d   :  { %4911 = vpow2.f32 %v3620_v21  ;;  %v4676_v21 = vpack.c.bf16 %v3430_v19, %v3428_v52 }
 0xf34   :  { %v4906_v6 = vpop.eup %4905 }
 0xf35   :  { %v3136_v30 = vadd.f32 1.0, %v4906_v6  ;;  %v4908_v47 = vpop.eup %4907  ;;  %v3427_v6 = vld [vmem:[%s6733_s4 + $0xe0] sm:$0xff] }
 0xf36   :  { %v3137_v53 = vadd.f32 1.0, %v4908_v47  ;;  %v4910_v12 = vpop.eup %4909 }
 0xf37   :  { %4913 = vrcp.f32 %v3136_v30  ;;  %v4912_v13 = vpop.eup %4911  ;;  %v3429_v30 = vld [vmem:[%s6733_s4 + $0xf0] sm:$0xff] }
 0xf38   :  { %4915 = vrcp.f32 %v3137_v53  ;;  %v3138_v17 = vadd.f32 1.0, %v4912_v13  ;;  %v4678_v47 = vpack.c.bf16 %v3429_v30, %v3427_v6 }
 0xf3a   :  { %4917 = vrcp.f32 %v3138_v17 }
 0xf41   :  { %v4914_v58 = vpop.eup %4913 }
 0xf42   :  { %v3147_v28 = vmul.f32 %v4914_v58, %v4910_v12  ;;  %v4916_v14 = vpop.eup %4915 }
 0xf43   :  { %v3146_v51 = vmul.f32 %v4916_v14, %v6495_v27  ;;  %v3418_v27 = vld [vmem:[%s6733_s4 + $0x98] sm:$0xff] }
 0xf44   :  { %v4918_v36 = vpop.eup %4917  ;;  %v4664_v7 = vpack.c.bf16 %v3418_v27, %v3416_v44  ;;  %v3155_v14 = vld [vmem:[%s6732_s1 + $0xf8] sm:$0xff] }
 0xf45   :  { %v6553_v2 = vadd.f32 %v3147_v28, %v3146_v51 }
 0xf47   :  { %4919 = vtanh.f32 %v6553_v2 }
 0xf51   :  { %v4920_v59 = vpop.eup %4919 }
 0xf52   :  { %v6568_v11 = vmul.f32 %v4920_v59, %v4918_v36  ;;  %v3434_v59 = vshrl.u32 %v3433_v31, 7 }
 0xf54   :  { %3285 = vmatmul.mubr.f32.vlgmr.msra.gmra.mrb[28].mxu0 %v6568_v11  ;;  %3356 = vmatmul.mubr.f32.vlgmr.msra.gmra.mrb[32].mxu1 %v6568_v11  ;;  %v3439_v16 = vsub.s32 1, %v3434_v59 }
 0xf55   :  { %4651 = vmatpush1.bf16.msra.mxu0 %v4650_v60  ;;  %3507 = vmatprep.mubr.f32.mxu0 %v4937_v3  ;;  %v3435_v60 = vsub.s32 0, %v3434_v59 }
 0xf56   :  { %4653 = vmatprep.subr.bf16.mxu0 %v4652_v35  ;;  %v3431_v35 = vld [vmem:[%s6734_s5] sm:$0x3] }
 0xf57   :  { %v3440_v26 = vrot.slane %v3431_v35, %v3439_v16 }
 0xf59   :  { %4655 = vmatpush1.bf16.msra.mxu0 %v4654_v0  ;;  %v3436_v0 = vrot.slane %v3431_v35, %v3435_v60 }
 0xf5a   :  { %4657 = vmatprep.subr.bf16.mxu0 %v4656_v10 }
 0xf5d   :  { %4659 = vmatpush1.bf16.msra.mxu0 %v4658_v42 }
 0xf5e   :  { %4661 = vmatprep.subr.bf16.mxu0 %v4660_v41 }
 0xf61   :  { %4663 = vmatpush1.bf16.msra.mxu0 %v4662_v37 }
 0xf62   :  { %4665 = vmatprep.subr.bf16.mxu0 %v4664_v7 }
 0xf65   :  { %4667 = vmatpush1.bf16.msra.mxu0 %v4666_v4 }
 0xf66   :  { %4669 = vmatprep.subr.bf16.mxu0 %v4668_v61 }
 0xf69   :  { %4671 = vmatpush1.bf16.msra.mxu0 %v4670_v40 }
 0xf6a   :  { %4673 = vmatprep.subr.bf16.mxu0 %v4672_v39 }
 0xf6d   :  { %4675 = vmatpush1.bf16.msra.mxu0 %v4674_v9 }
 0xf6e   :  { %4677 = vmatprep.subr.bf16.mxu0 %v4676_v21 }
 0xf71   :  { %4679 = vmatpush1.bf16.msra.mxu0 %v4678_v47 }
 0xf74   :  { %3508 = vmatmul.mubr.f32.vlgmr.msra.gmra.mrb[30].mxu0 %v5972_v45  ;;  %v3152_v45 = vld [vmem:[%s6732_s1 + $0xe0] sm:$0xff] }
 0xf75   :  { %3513 = vmatprep.mubr.f32.mxu0 %v4937_v3 }
 0xf78   :  { %3514 = vmatmul.mubr.f32.gmra.mrb[32].mxu0 %v6026_v33  ;;  %v3153_v33 = vld [vmem:[%s6732_s1 + $0xe8] sm:$0xff] }
 0xf79   :  { %3519 = vmatprep.mubr.f32.mxu0 %v4937_v3 }
 0xf7c   :  { %3520 = vmatmul.mubr.f32.gmra.mrb[34].mxu0 %v6078_v57 }
 0xf7d   :  { %3525 = vmatprep.mubr.f32.mxu0 %v4937_v3 }
 0xf80   :  { %3526 = vmatmul.mubr.f32.gmra.mrb[36].mxu0 %v6390_v56 }
 0xf81   :  { %3531 = vmatprep.mubr.f32.mxu0 %v4937_v3 }
 0xf84   :  { %3532 = vmatmul.mubr.f32.gmra.mrb[38].mxu0 %v6444_v62 }
 0xf85   :  { %3537 = vmatprep.mubr.f32.mxu0 %v4937_v3 }
 0xf88   :  { %3538 = vmatmul.mubr.f32.gmra.mrb[40].mxu0 %v6498_v34 }
 0xf89   :  { %3543 = vmatprep.mubr.f32.mxu0 %v4937_v3 }
 0xf8c   :  { %3544 = vmatmul.mubr.f32.gmra.mrb[42].mxu0 %v6568_v11 }
 0xf8d   :  { %3549 = vmatprep.mubr.f32.mxu0 %v4937_v3  ;;  %v3154_v3 = vld [vmem:[%s6732_s1 + $0xf0] sm:$0xff] }
0x1027   :  { %v3286_v57 = vpop.f32.mrb[28].mxu0  ;;  %v3357_v56 = vpop.f32.mrb[32].mxu1 }
0x1028   :  { %v3362_v62 = vadd.f32 %v3286_v57, %v3152_v45  ;;  %v3288_v53 = vpop.f32.mrb[29].mxu0  ;;  %v3359_v12 = vpop.f32.mrb[33].mxu1  ;;  %v3364_v28 = vadd.f32 %v3357_v56, %v3154_v3 }
0x1029   :  { %v3363_v34 = vadd.f32 %v3288_v53, %v3153_v33  ;;  %v3365_v17 = vadd.f32 %v3359_v12, %v3155_v14 }
0x102a   :  { %v3621_v13 = vmul.f32 -1.442695, %v3362_v62  ;;  %v3623_v51 = vmul.f32 -1.442695, %v3364_v28 }
0x102b   :  { %v3622_v58 = vmul.f32 -1.442695, %v3363_v34 }
0x102c   :  { %4921 = vpow2.f32 %v3621_v13 }
0x102d   :  { %4923 = vpow2.f32 %v3622_v58 }
0x102e   :  { %4925 = vtanh.f32 %v3365_v17 }
0x102f   :  { %4927 = vpow2.f32 %v3623_v51 }
0x1036   :  { %v4922_v15 = vpop.eup %4921 }
0x1037   :  { %v3375_v43 = vadd.f32 1.0, %v4922_v15  ;;  %v4924_v29 = vpop.eup %4923 }
0x1038   :  { %v3376_v36 = vadd.f32 1.0, %v4924_v29  ;;  %v4926_v11 = vpop.eup %4925 }
0x1039   :  { %4929 = vrcp.f32 %v3375_v43  ;;  %v4928_v23 = vpop.eup %4927 }
0x103a   :  { %4931 = vrcp.f32 %v3376_v36  ;;  %v3377_v18 = vadd.f32 1.0, %v4928_v23 }
0x103c   :  { %4933 = vrcp.f32 %v3377_v18 }
0x1043   :  { %v4930_v8 = vpop.eup %4929 }
0x1044   :  { %v3386_v20 = vmul.f32 %v4930_v8, %v4926_v11  ;;  %v4932_v10 = vpop.eup %4931 }
0x1045   :  { %v3385_v38 = vmul.f32 %v4932_v10, %v6553_v2 }
0x1046   :  { %v4934_v55 = vpop.eup %4933 }
0x1047   :  { %v3509_v63 = vpop.f32.mrb[30].mxu0  ;;  %v3387_v42 = vadd.f32 %v3386_v20, %v3385_v38 }
0x1048   :  { %v3510_v41 = vadd.f32 %v3509_v63, %v3436_v0  ;;  %v3511_v5 = vpop.f32.mrb[31].mxu0 }
0x1049   :  { %v3512_v32 = vadd.f32 %v3511_v5, %v3440_v26  ;;  %4935 = vtanh.f32 %v3387_v42 }
0x104a   :  { %3556 = vst [vmem:[%s6735_s6] sm:$0xff] %v3510_v41 }
0x104b   :  { %3557 = vst [vmem:[%s6735_s6 + $0x8] sm:$0xff] %v3512_v32  ;;  %v3515_v44 = vpop.f32.mrb[32].mxu0 }
0x104c   :  { %v3516_v27 = vadd.f32 %v3515_v44, %v3436_v0  ;;  %v3517_v37 = vpop.f32.mrb[33].mxu0 }
0x104d   :  { %v3518_v7 = vadd.f32 %v3517_v37, %v3440_v26 }
0x104e   :  { %3558 = vst [vmem:[%s6735_s6 + $0x10] sm:$0xff] %v3516_v27 }
0x104f   :  { %3559 = vst [vmem:[%s6735_s6 + $0x18] sm:$0xff] %v3518_v7  ;;  %v3521_v2 = vpop.f32.mrb[34].mxu0 }
0x1050   :  { %v3522_v25 = vadd.f32 %v3521_v2, %v3436_v0  ;;  %v3523_v48 = vpop.f32.mrb[35].mxu0 }
0x1051   :  { %v3524_v46 = vadd.f32 %v3523_v48, %v3440_v26 }
0x1052   :  { %3560 = vst [vmem:[%s6735_s6 + $0x20] sm:$0xff] %v3522_v25 }
0x1053   :  { %3561 = vst [vmem:[%s6735_s6 + $0x28] sm:$0xff] %v3524_v46  ;;  %v3527_v4 = vpop.f32.mrb[36].mxu0  ;;  %v4936_v61 = vpop.eup %4935 }
0x1054   :  { %v3528_v22 = vadd.f32 %v3527_v4, %v3436_v0  ;;  %v3529_v49 = vpop.f32.mrb[37].mxu0  ;;  %v3389_v1 = vmul.f32 %v4936_v61, %v4934_v55 }
0x1055   :  { %v3530_v54 = vadd.f32 %v3529_v49, %v3440_v26 }
0x1056   :  { %3562 = vst [vmem:[%s6735_s6 + $0x30] sm:$0xff] %v3528_v22  ;;  %3550 = vmatmul.mubr.f32.gmra.mrb[44].mxu0 %v3389_v1 }
0x1057   :  { %3563 = vst [vmem:[%s6735_s6 + $0x38] sm:$0xff] %v3530_v54  ;;  %v3533_v40 = vpop.f32.mrb[38].mxu0 }
0x1058   :  { %v3534_v39 = vadd.f32 %v3533_v40, %v3436_v0  ;;  %v3535_v50 = vpop.f32.mrb[39].mxu0 }
0x1059   :  { %v3536_v24 = vadd.f32 %v3535_v50, %v3440_v26 }
0x105a   :  { %3564 = vst [vmem:[%s6735_s6 + $0x40] sm:$0xff] %v3534_v39 }
0x105b   :  { %3565 = vst [vmem:[%s6735_s6 + $0x48] sm:$0xff] %v3536_v24  ;;  %v3539_v52 = vpop.f32.mrb[40].mxu0 }
0x105c   :  { %v3540_v19 = vadd.f32 %v3539_v52, %v3436_v0  ;;  %v3541_v9 = vpop.f32.mrb[41].mxu0 }
0x105d   :  { %v3542_v21 = vadd.f32 %v3541_v9, %v3440_v26 }
0x105e   :  { %3566 = vst [vmem:[%s6735_s6 + $0x50] sm:$0xff] %v3540_v19 }
0x105f   :  { %3567 = vst [vmem:[%s6735_s6 + $0x58] sm:$0xff] %v3542_v21  ;;  %v3545_v6 = vpop.f32.mrb[42].mxu0 }
0x1060   :  { %v3546_v30 = vadd.f32 %v3545_v6, %v3436_v0  ;;  %v3547_v47 = vpop.f32.mrb[43].mxu0 }
0x1061   :  { %v3548_v45 = vadd.f32 %v3547_v47, %v3440_v26 }
0x1062   :  { %3568 = vst [vmem:[%s6735_s6 + $0x60] sm:$0xff] %v3546_v30 }
0x1063   :  { %3569 = vst [vmem:[%s6735_s6 + $0x68] sm:$0xff] %v3548_v45 }
0x1129   :  { %v3551_v33 = vpop.f32.mrb[44].mxu0 }
0x112a   :  { %v3552_v57 = vadd.f32 %v3551_v33, %v3436_v0  ;;  %v3553_v56 = vpop.f32.mrb[45].mxu0 }
0x112b   :  { %v3554_v62 = vadd.f32 %v3553_v56, %v3440_v26 }
0x112c   :  { %3570 = vst [vmem:[%s6735_s6 + $0x70] sm:$0xff] %v3552_v57 }
0x112d   :  { %3571 = vst [vmem:[%s6735_s6 + $0x78] sm:$0xff] %v3554_v62 }

</bundles_post_ra>
